<compile_context>
chip_gen: v5e
topology: v5e:2x2
jax: 0.10.0
libtpu: 0.0.40
codegen_flags: <defaults>
</compile_context>

<pallas_src>
import functools

import jax
import jax.numpy as jnp
from jax import lax
from jax.experimental import pallas as pl
from jax.experimental.pallas import tpu as pltpu


# ----------------------------- small helpers ----------------------------------

def _round_up(x, m):
    return ((x + m - 1) // m) * m


def _fake_quant_weight_per_channel(w, bit_width, ch_axis=0):
    """Symmetric per-output-channel int weight quant: returns (integer codes, scale)."""
    n = float(2 ** (bit_width - 1) - 1)
    reduce_axes = tuple(a for a in range(w.ndim) if a != ch_axis)
    absmax = jnp.max(jnp.abs(w), axis=reduce_axes, keepdims=True)
    scale = jnp.maximum(absmax, 2e-16) / n
    code = jnp.clip(jnp.round(w / scale), -n, n)
    return code, scale


def _vmem_budget_bytes():
    """Generation-aware scoped-VMEM cap: ~48 MiB on v7x (64 MiB/TC), ~96 MiB on v5e/v6e."""
    try:
        phys = int(pltpu.get_tpu_info().vmem_capacity_bytes)
    except Exception:
        phys = 64 << 20          # conservative fallback (v7x per-TensorCore VMEM)
    return int(phys * 3 // 4)


def _est_step_vmem_bytes(tro, stride, W, Wo, Cp, Coutp):
    """Per-grid-step VMEM estimate incl. fp32 intermediates (band, 3 taps, acc/hq/y)."""
    b = tro * stride
    x_band   = (b + 2) * W * Cp * 4
    col_taps = 3 * (b + 2) * Wo * Cp * 4
    acts     = 3 * tro * Wo * max(Cp, Coutp) * 4
    out_tile = tro * Wo * Coutp * 4
    weights  = 9 * Cp * 4 + Cp * Coutp * 2 + 3 * Coutp * 4
    # 2x for the double-buffered auto-pipeline on streamed operands + headroom.
    return 2 * (x_band + out_tile) + x_band + col_taps + acts + 2 * weights + (4 << 20)


def _auto_row_tile(H, Ho, W, Wo, Cp, Coutp, stride, vmem_cap, row_tile):
    if row_tile is None:
        # target MXU M = tro*Wo >= 512 (v6e/v7x MXU is 2x256^2), at least 8 rows.
        row_tile = max(-(-512 // Wo), 8)
    tro = max(1, min(row_tile, Ho, max(H // stride, 1)))
    while tro > 1 and _est_step_vmem_bytes(tro, stride, W, Wo, Cp, Coutp) > vmem_cap:
        tro = max(1, tro // 2)
    return tro


# --------------------------------- the kernel ---------------------------------

def _dws_block_kernel(top_ref, mid_ref, bot_ref, dww_ref, dwb_ref,
                      pww_ref, pws_ref, pwb_ref, out_ref,
                      *, stride, act_bits, img_h, dequant_scale):
    # top_ref : (1, W, Cp)        input row  t*B - 1   (zeroed for the first tile)
    # mid_ref : (B, W, Cp)        input rows [t*B, t*B + B)
    # bot_ref : (1, W, Cp)        input row  t*B + B   (zeroed past the image)
    # dww_ref : (3, 3, Cp)  f32   depthwise weights, BN scale and 1/act_scale folded in
    # dwb_ref : (1, Cp)     f32   depthwise bias on the quant grid
    # pww_ref : (Cp, Coutp) bf16  pointwise INTEGER weight codes (exact in bf16)
    # pws_ref : (1, Coutp)  f32   per-channel scale (dw act * w-quant * BN / pw act)
    # pwb_ref : (1, Coutp)  f32   pointwise bias on the quant grid
    # out_ref : (TRo, Wo, Coutp)
    t = pl.program_id(1)
    B, W, Cp = mid_ref.shape
    TRo, Wo, Coutp = out_ref.shape
    levels = float(2 ** act_bits - 1)

    # ---- assemble the (B+2)-row band; conv zero padding + edge-tile masking ----
    top = jnp.where(t > 0, top_ref[...], 0.0)
    bot = jnp.where((t + 1) * B < img_h, bot_ref[...], 0.0)
    mid = mid_ref[...]
    if img_h % B != 0:   # last tile may extend past the image: zero those rows
        rows = t * B + lax.broadcasted_iota(jnp.int32, (B, 1, 1), 0)
        mid = jnp.where(rows < img_h, mid, 0.0)
    xb = jnp.concatenate([top, mid, bot], axis=0)               # (B+2, W, Cp)

    # ---- 3 column taps (left / centre / right), built pre-strided ----
    # TODO(synk): if the bundle dump shows these shifted copies dominating ld/st slots,
    #             switch to pltpu.roll on the XLU (verify rotate direction first).
    if stride == 1:
        z = jnp.zeros_like(xb[:, :1, :])
        taps = (jnp.concatenate([z, xb[:, :W - 1, :]], axis=1),   # input col j-1
                xb,                                               # input col j
                jnp.concatenate([xb[:, 1:, :], z], axis=1))       # input col j+1
    else:  # stride == 2 (even W): deinterleave even/odd columns once per tile
        xe = xb[:, 0::2, :]                                       # input col 2j
        xo = xb[:, 1::2, :]                                       # input col 2j+1
        z = jnp.zeros_like(xo[:, :1, :])
        taps = (jnp.concatenate([z, xo[:, :-1, :]], axis=1),      # input col 2j-1
                xe, xo)

    # ---- depthwise 3x3 MAC chain on the VPU (all scales folded into dww) ----
    # TODO(synk): on v6e/v7x the MAC chain could run in bf16 (bf16 VALUs); kept fp32.
    w = dww_ref[...]                                              # (3, 3, Cp)
    acc = None
    for dx in range(3):
        xs = taps[dx]
        for dy in range(3):
            term = xs[dy:dy + stride * TRo:stride] * w[dy, dx]    # leading-dim row taps
            acc = term if acc is None else acc + term

    # QuantReLU on the integer grid (relu absorbed by the clip lower bound of 0).
    hq = jnp.clip(jnp.round(acc + dwb_ref[...]), 0.0, levels)     # exact codes 0..levels

    # ---- pointwise 1x1 on the MXU: exact integer-code matmul, fp32 accumulation ----
    # TODO(synk): for bit_width <= 4 on v7x, fp8 codes would raise MXU throughput.
    hm = hq.reshape(TRo * Wo, Cp).astype(pww_ref.dtype)
    y = jnp.dot(hm, pww_ref[...], preferred_element_type=jnp.float32)
    y = y * pws_ref[...] + pwb_ref[...]
    yq = jnp.clip(jnp.round(y), 0.0, levels)
    out_ref[...] = (yq * dequant_scale).reshape(TRo, Wo, Coutp).astype(out_ref.dtype)


# --------------------------------- wrappers ------------------------------------

def dws_conv_block_nhwc(x_nhwc, params, *, stride=1, bit_width=8, row_tile=None,
                        out_dtype=jnp.float32, lane_multiple=128):
    """DwsConvBlock on NHWC input; returns NHWC with Cout padded to `lane_multiple`.
    Chain blocks in padded NHWC (optionally with out_dtype=bf16 and the act scale folded
    into the next block) and slice / transpose only at the network boundary."""
    assert stride in (1, 2)
    N, H, W, C_in_arr = x_nhwc.shape
    Cin = params["dw_code"].shape[-1]
    Cout = params["pw_code"].shape[-1]
    Cp = _round_up(Cin, lane_multiple)
    Coutp = _round_up(Cout, lane_multiple)
    assert C_in_arr in (Cin, Cp)
    if stride == 2:
        assert W % 2 == 0, "TODO(synk): odd spatial width with stride 2"

    Ho = (H - 1) // stride + 1
    Wo = (W - 1) // stride + 1

    # Activation quant scales (CommonUintActQuant: max_val = 6.0, init-time scale).
    levels = float(2 ** bit_width - 1)
    act_scale_dw = 6.0 / levels
    act_scale_pw = 6.0 / levels

    def cpad(a, axis, size):
        pad = [(0, 0)] * a.ndim
        pad[axis] = (0, size - a.shape[axis])
        return jnp.pad(a, pad)

    # Depthwise: fold weight-quant scale, BN scale and 1/act_scale into fp32 weights/bias.
    dw_wf = params["dw_code"] * (params["dw_wscale"] * params["dw_bn_scale"] / act_scale_dw)
    dw_wf = cpad(dw_wf.astype(jnp.float32), 2, Cp)                               # (3,3,Cp)
    dw_bf = cpad((params["dw_bn_bias"] / act_scale_dw)
                 .reshape(1, Cin).astype(jnp.float32), 1, Cp)                    # (1,Cp)

    # Pointwise: keep integer codes (exact in bf16) for the MXU; per-output-channel
    # scale applied in fp32 after the matmul (bit-accurate vs an fp32 reference).
    pw_wq = cpad(cpad(params["pw_code"], 0, Cp), 1, Coutp).astype(jnp.bfloat16)  # (Cp,Coutp)
    pw_sf = cpad((act_scale_dw * params["pw_wscale"] * params["pw_bn_scale"] / act_scale_pw)
                 .reshape(1, Cout).astype(jnp.float32), 1, Coutp)                # (1,Coutp)
    pw_bf = cpad((params["pw_bn_bias"] / act_scale_pw)
                 .reshape(1, Cout).astype(jnp.float32), 1, Coutp)                # (1,Coutp)

    # Channel-pad the input to the lane width (fuses with the boundary transpose;
    # chained blocks should already arrive padded so this is a no-op).
    if C_in_arr != Cp:
        x_nhwc = cpad(x_nhwc, 3, Cp)

    # Generation-aware VMEM cap and row tiling; grid uses cdiv + in-kernel edge masking.
    vmem_cap = _vmem_budget_bytes()
    tro = _auto_row_tile(H, Ho, W, Wo, Cp, Coutp, stride, vmem_cap, row_tile)
    B = tro * stride
    n_tiles = int(pl.cdiv(Ho, tro))

    kernel = functools.partial(_dws_block_kernel, stride=stride, act_bits=bit_width,
                               img_h=H, dequant_scale=act_scale_pw)

    # The 1-row conv halos are two extra 1-row blocks of the SAME input array, so no
    # padded / gathered copy of the input is ever materialised in HBM.
    # TODO(synk): on v7x, order the larger of (N, n_tiles) first and single-buffer the
    #             resident weight operands (pl.Buffered(1)) inside the 64 MiB budget.
    out = pl.pallas_call(
        kernel,
        out_shape=jax.ShapeDtypeStruct((N, Ho, Wo, Coutp), out_dtype),
        grid_spec=pltpu.PrefetchScalarGridSpec(
            num_scalar_prefetch=0,
            grid=(N, n_tiles),
            in_specs=[
                pl.BlockSpec((None, 1, W, Cp),
                             lambda n, t: (n, jnp.maximum(t * B - 1, 0), 0, 0)),
                pl.BlockSpec((None, B, W, Cp), lambda n, t: (n, t, 0, 0)),
                pl.BlockSpec((None, 1, W, Cp),
                             lambda n, t: (n, jnp.minimum(t * B + B, H - 1), 0, 0)),
                pl.BlockSpec((3, 3, Cp), lambda n, t: (0, 0, 0)),
                pl.BlockSpec((1, Cp), lambda n, t: (0, 0)),
                pl.BlockSpec((Cp, Coutp), lambda n, t: (0, 0)),
                pl.BlockSpec((1, Coutp), lambda n, t: (0, 0)),
                pl.BlockSpec((1, Coutp), lambda n, t: (0, 0)),
            ],
            out_specs=pl.BlockSpec((None, tro, Wo, Coutp), lambda n, t: (n, t, 0, 0)),
        ),
        compiler_params=pltpu.CompilerParams(
            dimension_semantics=("parallel", "parallel"),
            vmem_limit_bytes=vmem_cap,
        ),
    )(x_nhwc, x_nhwc, x_nhwc, dw_wf, dw_bf, pw_wq, pw_sf, pw_bf)
    return out


def dws_conv_block(x_nchw, params, *, stride=1, bit_width=8, row_tile=None,
                   out_dtype=jnp.float32):
    """PyTorch-facing wrapper: NCHW in / NCHW out (pad+transpose only at the boundary)."""
    Cout = params["pw_code"].shape[1]
    x_nhwc = jnp.transpose(x_nchw, (0, 2, 3, 1))
    out_nhwc = dws_conv_block_nhwc(x_nhwc, params, stride=stride, bit_width=bit_width,
                                   row_tile=row_tile, out_dtype=out_dtype)
    return jnp.transpose(out_nhwc[..., :Cout], (0, 3, 1, 2))


# --------------------------- deterministic init -------------------------------

def init_params(key, in_channels, out_channels, bit_width=8, bn_eps=1e-5):
    ks = jax.random.split(key, 10)

    # depthwise conv weight (PyTorch layout (Cin, 1, 3, 3)), per-channel int quant
    dw_w = 0.5 * jax.random.normal(ks[0], (in_channels, 1, 3, 3), jnp.float32)
    dw_code, dw_ws = _fake_quant_weight_per_channel(dw_w, bit_width, ch_axis=0)
    dw_code_hwc = jnp.transpose(dw_code[:, 0], (1, 2, 0))            # (3, 3, Cin)
    dw_ws = dw_ws.reshape(in_channels)

    # pointwise conv weight (PyTorch layout (Cout, Cin, 1, 1)), per-channel int quant
    pw_w = 0.5 * jax.random.normal(ks[1], (out_channels, in_channels, 1, 1), jnp.float32)
    pw_code, pw_ws = _fake_quant_weight_per_channel(pw_w, bit_width, ch_axis=0)
    pw_code_mat = jnp.transpose(pw_code[:, :, 0, 0], (1, 0))         # (Cin, Cout)
    pw_ws = pw_ws.reshape(out_channels)

    def bn_fold(kg, kb, km, kv, c):
        gamma = 1.0 + 0.1 * jax.random.normal(kg, (c,), jnp.float32)
        beta = 0.1 * jax.random.normal(kb, (c,), jnp.float32)
        mean = 0.1 * jax.random.normal(km, (c,), jnp.float32)
        var = jax.random.uniform(kv, (c,), jnp.float32, 0.5, 1.5)
        scale = gamma / jnp.sqrt(var + bn_eps)                       # inference-mode BN
        bias = beta - mean * scale
        return scale, bias

    dw_bns, dw_bnb = bn_fold(ks[2], ks[3], ks[4], ks[5], in_channels)
    pw_bns, pw_bnb = bn_fold(ks[6], ks[7], ks[8], ks[9], out_channels)

    # TODO(synk): brevitas learned / LOG_FP-restricted scaling is approximated by the
    #             init-time scales (max|w| for weights, 6.0/(2^b-1) for activations).
    return dict(dw_code=dw_code_hwc, dw_wscale=dw_ws, dw_bn_scale=dw_bns, dw_bn_bias=dw_bnb,
                pw_code=pw_code_mat, pw_wscale=pw_ws, pw_bn_scale=pw_bns, pw_bn_bias=pw_bnb)


# ---------------------------- pure-JAX reference -------------------------------

def dws_conv_block_reference(x_nchw, params, *, stride=1, bit_width=8):
    """fp32 NCHW reference mirroring the PyTorch module (inference-mode BN)."""
    s = 6.0 / float(2 ** bit_width - 1)
    L = float(2 ** bit_width - 1)

    def qrelu(v):
        # jnp.round is round-half-to-even, matching torch.round.
        return jnp.clip(jnp.round(jnp.maximum(v, 0.0) / s), 0.0, L) * s

    def bn(v, sc, b):
        return v * sc.reshape(1, -1, 1, 1) + b.reshape(1, -1, 1, 1)

    Cin = params["dw_code"].shape[-1]
    dw_w = jnp.transpose(params["dw_code"] * params["dw_wscale"], (2, 0, 1))[:, None]
    h = lax.conv_general_dilated(x_nchw, dw_w, (stride, stride), ((1, 1), (1, 1)),
                                 dimension_numbers=("NCHW", "OIHW", "NCHW"),
                                 feature_group_count=Cin,
                                 precision=lax.Precision.HIGHEST)
    h = qrelu(bn(h, params["dw_bn_scale"], params["dw_bn_bias"]))

    pw_w = jnp.transpose(params["pw_code"] * params["pw_wscale"][None, :], (1, 0))
    pw_w = pw_w[:, :, None, None]
    y = lax.conv_general_dilated(h, pw_w, (1, 1), ((0, 0), (0, 0)),
                                 dimension_numbers=("NCHW", "OIHW", "NCHW"),
                                 precision=lax.Precision.HIGHEST)
    y = qrelu(bn(y, params["pw_bn_scale"], params["pw_bn_bias"]))
    return y


# ----------------------------------- main --------------------------------------

if __name__ == "__main__":
    key = jax.random.PRNGKey(0)
    k_x, k_p = jax.random.split(key)

    N, Cin, Cout, H, W = 2, 8, 16, 16, 16
    stride, bit_width = 1, 8

    x = jax.random.normal(k_x, (N, Cin, H, W), jnp.float32)
    params = init_params(k_p, Cin, Cout, bit_width=bit_width)

    fwd = jax.jit(functools.partial(dws_conv_block, stride=stride, bit_width=bit_width))
    out = jax.block_until_ready(fwd(x, params))

    Ho = (H - 1) // stride + 1
    Wo = (W - 1) // stride + 1
    assert out.shape == (N, Cout, Ho, Wo)
    assert bool(jnp.all(jnp.isfinite(out)))

    ref = dws_conv_block_reference(x, params, stride=stride, bit_width=bit_width)
    act_scale = 6.0 / float(2 ** bit_width - 1)
    max_err = float(jnp.max(jnp.abs(out - ref)))
    mean_err = float(jnp.mean(jnp.abs(out - ref)))
    # allow up to ~2 quant levels for rounding-boundary flips; real bugs are far larger.
    assert max_err <= 2.5 * act_scale + 1e-5, max_err
    assert mean_err < 1e-3, mean_err

    print("KERNEL_OK")
</pallas_src>

<mosaic_0001>
module attributes {stable_mosaic.version = 11 : i64} {
  func.func @_dws_block_kernel(%arg0: i32, %arg1: i32, %arg2: memref<1x1x16x128xf32, #tpu.memory_space<vmem>>, %arg3: memref<1x16x16x128xf32, #tpu.memory_space<vmem>>, %arg4: memref<1x1x16x128xf32, #tpu.memory_space<vmem>>, %arg5: memref<3x3x128xf32, #tpu.memory_space<vmem>>, %arg6: memref<1x128xf32, #tpu.memory_space<vmem>>, %arg7: memref<128x128xbf16, #tpu.memory_space<vmem>>, %arg8: memref<1x128xf32, #tpu.memory_space<vmem>>, %arg9: memref<1x128xf32, #tpu.memory_space<vmem>>, %arg10: memref<1x16x16x128xf32, #tpu.memory_space<vmem>>) attributes {dimension_semantics = [#tpu.dimension_semantics<parallel>, #tpu.dimension_semantics<parallel>], iteration_bounds = array<i64: 2, 1>, scalar_prefetch = 0 : i64, scratch_operands = 0 : i64, tpu.core_type = #tpu.core_type<tc>, window_params = [{transform_indices = @transform_0, window_bounds = array<i64: 1, 1, 16, 128>}, {transform_indices = @transform_1, window_bounds = array<i64: 1, 16, 16, 128>}, {transform_indices = @transform_2, window_bounds = array<i64: 1, 1, 16, 128>}, {pipeline_mode = #tpu.pipeline_mode<synchronous>, transform_indices = @transform_3, window_bounds = array<i64: 3, 3, 128>}, {pipeline_mode = #tpu.pipeline_mode<synchronous>, transform_indices = @transform_4, window_bounds = array<i64: 1, 128>}, {pipeline_mode = #tpu.pipeline_mode<synchronous>, transform_indices = @transform_5, window_bounds = array<i64: 128, 128>}, {pipeline_mode = #tpu.pipeline_mode<synchronous>, transform_indices = @transform_6, window_bounds = array<i64: 1, 128>}, {pipeline_mode = #tpu.pipeline_mode<synchronous>, transform_indices = @transform_7, window_bounds = array<i64: 1, 128>}, {transform_indices = @transform_8, window_bounds = array<i64: 1, 16, 16, 128>}]} {
    %c0_i32 = arith.constant 0 : i32
    %0 = arith.cmpi sgt, %arg1, %c0_i32 : i32
    %c0 = arith.constant 0 : index
    %c0_0 = arith.constant 0 : index
    %c0_1 = arith.constant 0 : index
    %c0_2 = arith.constant 0 : index
    %1 = vector.load %arg2[%c0, %c0_0, %c0_1, %c0_2] : memref<1x1x16x128xf32, #tpu.memory_space<vmem>>, vector<1x1x16x128xf32>
    %2 = vector.shape_cast %1 : vector<1x1x16x128xf32> to vector<1x16x128xf32>
    %cst = arith.constant 0.000000e+00 : f32
    %3 = vector.broadcast %cst : f32 to vector<1x16x128xf32>
    %4 = arith.select %0, %2, %3 : vector<1x16x128xf32>
    %c1_i32 = arith.constant 1 : i32
    %5 = arith.addi %arg1, %c1_i32 : i32
    %c16_i32 = arith.constant 16 : i32
    %6 = arith.muli %5, %c16_i32 : i32
    %c16_i32_3 = arith.constant 16 : i32
    %7 = arith.cmpi slt, %6, %c16_i32_3 : i32
    %c0_4 = arith.constant 0 : index
    %c0_5 = arith.constant 0 : index
    %c0_6 = arith.constant 0 : index
    %c0_7 = arith.constant 0 : index
    %8 = vector.load %arg4[%c0_4, %c0_5, %c0_6, %c0_7] : memref<1x1x16x128xf32, #tpu.memory_space<vmem>>, vector<1x1x16x128xf32>
    %9 = vector.shape_cast %8 : vector<1x1x16x128xf32> to vector<1x16x128xf32>
    %cst_8 = arith.constant 0.000000e+00 : f32
    %10 = vector.broadcast %cst_8 : f32 to vector<1x16x128xf32>
    %11 = arith.select %7, %9, %10 : vector<1x16x128xf32>
    %c0_9 = arith.constant 0 : index
    %c0_10 = arith.constant 0 : index
    %c0_11 = arith.constant 0 : index
    %c0_12 = arith.constant 0 : index
    %12 = vector.load %arg3[%c0_9, %c0_10, %c0_11, %c0_12] : memref<1x16x16x128xf32, #tpu.memory_space<vmem>>, vector<1x16x16x128xf32>
    %13 = vector.shape_cast %12 : vector<1x16x16x128xf32> to vector<16x16x128xf32>
    %14 = tpu.concatenate %4, %13, %11 in 0 : vector<1x16x128xf32>, vector<16x16x128xf32>, vector<1x16x128xf32> -> vector<18x16x128xf32>
    %cst_13 = arith.constant 0.000000e+00 : f32
    %15 = vector.broadcast %cst_13 : f32 to vector<18x1x128xf32>
    %16 = vector.extract_strided_slice %14 {offsets = [0, 0, 0], sizes = [18, 15, 128], strides = [1, 1, 1]} : vector<18x16x128xf32> to vector<18x15x128xf32>
    %17 = tpu.concatenate %15, %16 in 1 : vector<18x1x128xf32>, vector<18x15x128xf32> -> vector<18x16x128xf32>
    %18 = vector.extract_strided_slice %14 {offsets = [0, 1, 0], sizes = [18, 15, 128], strides = [1, 1, 1]} : vector<18x16x128xf32> to vector<18x15x128xf32>
    %19 = tpu.concatenate %18, %15 in 1 : vector<18x15x128xf32>, vector<18x1x128xf32> -> vector<18x16x128xf32>
    %c0_14 = arith.constant 0 : index
    %c0_15 = arith.constant 0 : index
    %c0_16 = arith.constant 0 : index
    %20 = vector.load %arg5[%c0_14, %c0_15, %c0_16] : memref<3x3x128xf32, #tpu.memory_space<vmem>>, vector<3x3x128xf32>
    %21 = vector.extract_strided_slice %17 {offsets = [0, 0, 0], sizes = [16, 16, 128], strides = [1, 1, 1]} : vector<18x16x128xf32> to vector<16x16x128xf32>
    %22 = vector.extract_strided_slice %20 {offsets = [0, 0, 0], sizes = [1, 1, 128], strides = [1, 1, 1]} : vector<3x3x128xf32> to vector<1x1x128xf32>
    %23 = vector.shape_cast %22 : vector<1x1x128xf32> to vector<128xf32>
    %24 = vector.shape_cast %23 : vector<128xf32> to vector<1x1x128xf32>
    %25 = vector.broadcast %24 : vector<1x1x128xf32> to vector<16x16x128xf32>
    %26 = arith.mulf %21, %25 : vector<16x16x128xf32>
    %27 = vector.extract_strided_slice %17 {offsets = [1, 0, 0], sizes = [16, 16, 128], strides = [1, 1, 1]} : vector<18x16x128xf32> to vector<16x16x128xf32>
    %28 = vector.extract_strided_slice %20 {offsets = [1, 0, 0], sizes = [1, 1, 128], strides = [1, 1, 1]} : vector<3x3x128xf32> to vector<1x1x128xf32>
    %29 = vector.shape_cast %28 : vector<1x1x128xf32> to vector<128xf32>
    %30 = vector.shape_cast %29 : vector<128xf32> to vector<1x1x128xf32>
    %31 = vector.broadcast %30 : vector<1x1x128xf32> to vector<16x16x128xf32>
    %32 = arith.mulf %27, %31 : vector<16x16x128xf32>
    %33 = arith.addf %26, %32 : vector<16x16x128xf32>
    %34 = vector.extract_strided_slice %17 {offsets = [2, 0, 0], sizes = [16, 16, 128], strides = [1, 1, 1]} : vector<18x16x128xf32> to vector<16x16x128xf32>
    %35 = vector.extract_strided_slice %20 {offsets = [2, 0, 0], sizes = [1, 1, 128], strides = [1, 1, 1]} : vector<3x3x128xf32> to vector<1x1x128xf32>
    %36 = vector.shape_cast %35 : vector<1x1x128xf32> to vector<128xf32>
    %37 = vector.shape_cast %36 : vector<128xf32> to vector<1x1x128xf32>
    %38 = vector.broadcast %37 : vector<1x1x128xf32> to vector<16x16x128xf32>
    %39 = arith.mulf %34, %38 : vector<16x16x128xf32>
    %40 = arith.addf %33, %39 : vector<16x16x128xf32>
    %41 = vector.extract_strided_slice %14 {offsets = [0, 0, 0], sizes = [16, 16, 128], strides = [1, 1, 1]} : vector<18x16x128xf32> to vector<16x16x128xf32>
    %42 = vector.extract_strided_slice %20 {offsets = [0, 1, 0], sizes = [1, 1, 128], strides = [1, 1, 1]} : vector<3x3x128xf32> to vector<1x1x128xf32>
    %43 = vector.shape_cast %42 : vector<1x1x128xf32> to vector<128xf32>
    %44 = vector.shape_cast %43 : vector<128xf32> to vector<1x1x128xf32>
    %45 = vector.broadcast %44 : vector<1x1x128xf32> to vector<16x16x128xf32>
    %46 = arith.mulf %41, %45 : vector<16x16x128xf32>
    %47 = arith.addf %40, %46 : vector<16x16x128xf32>
    %48 = vector.extract_strided_slice %14 {offsets = [1, 0, 0], sizes = [16, 16, 128], strides = [1, 1, 1]} : vector<18x16x128xf32> to vector<16x16x128xf32>
    %49 = vector.extract_strided_slice %20 {offsets = [1, 1, 0], sizes = [1, 1, 128], strides = [1, 1, 1]} : vector<3x3x128xf32> to vector<1x1x128xf32>
    %50 = vector.shape_cast %49 : vector<1x1x128xf32> to vector<128xf32>
    %51 = vector.shape_cast %50 : vector<128xf32> to vector<1x1x128xf32>
    %52 = vector.broadcast %51 : vector<1x1x128xf32> to vector<16x16x128xf32>
    %53 = arith.mulf %48, %52 : vector<16x16x128xf32>
    %54 = arith.addf %47, %53 : vector<16x16x128xf32>
    %55 = vector.extract_strided_slice %14 {offsets = [2, 0, 0], sizes = [16, 16, 128], strides = [1, 1, 1]} : vector<18x16x128xf32> to vector<16x16x128xf32>
    %56 = vector.extract_strided_slice %20 {offsets = [2, 1, 0], sizes = [1, 1, 128], strides = [1, 1, 1]} : vector<3x3x128xf32> to vector<1x1x128xf32>
    %57 = vector.shape_cast %56 : vector<1x1x128xf32> to vector<128xf32>
    %58 = vector.shape_cast %57 : vector<128xf32> to vector<1x1x128xf32>
    %59 = vector.broadcast %58 : vector<1x1x128xf32> to vector<16x16x128xf32>
    %60 = arith.mulf %55, %59 : vector<16x16x128xf32>
    %61 = arith.addf %54, %60 : vector<16x16x128xf32>
    %62 = vector.extract_strided_slice %19 {offsets = [0, 0, 0], sizes = [16, 16, 128], strides = [1, 1, 1]} : vector<18x16x128xf32> to vector<16x16x128xf32>
    %63 = vector.extract_strided_slice %20 {offsets = [0, 2, 0], sizes = [1, 1, 128], strides = [1, 1, 1]} : vector<3x3x128xf32> to vector<1x1x128xf32>
    %64 = vector.shape_cast %63 : vector<1x1x128xf32> to vector<128xf32>
    %65 = vector.shape_cast %64 : vector<128xf32> to vector<1x1x128xf32>
    %66 = vector.broadcast %65 : vector<1x1x128xf32> to vector<16x16x128xf32>
    %67 = arith.mulf %62, %66 : vector<16x16x128xf32>
    %68 = arith.addf %61, %67 : vector<16x16x128xf32>
    %69 = vector.extract_strided_slice %19 {offsets = [1, 0, 0], sizes = [16, 16, 128], strides = [1, 1, 1]} : vector<18x16x128xf32> to vector<16x16x128xf32>
    %70 = vector.extract_strided_slice %20 {offsets = [1, 2, 0], sizes = [1, 1, 128], strides = [1, 1, 1]} : vector<3x3x128xf32> to vector<1x1x128xf32>
    %71 = vector.shape_cast %70 : vector<1x1x128xf32> to vector<128xf32>
    %72 = vector.shape_cast %71 : vector<128xf32> to vector<1x1x128xf32>
    %73 = vector.broadcast %72 : vector<1x1x128xf32> to vector<16x16x128xf32>
    %74 = arith.mulf %69, %73 : vector<16x16x128xf32>
    %75 = arith.addf %68, %74 : vector<16x16x128xf32>
    %76 = vector.extract_strided_slice %19 {offsets = [2, 0, 0], sizes = [16, 16, 128], strides = [1, 1, 1]} : vector<18x16x128xf32> to vector<16x16x128xf32>
    %77 = vector.extract_strided_slice %20 {offsets = [2, 2, 0], sizes = [1, 1, 128], strides = [1, 1, 1]} : vector<3x3x128xf32> to vector<1x1x128xf32>
    %78 = vector.shape_cast %77 : vector<1x1x128xf32> to vector<128xf32>
    %79 = vector.shape_cast %78 : vector<128xf32> to vector<1x1x128xf32>
    %80 = vector.broadcast %79 : vector<1x1x128xf32> to vector<16x16x128xf32>
    %81 = arith.mulf %76, %80 : vector<16x16x128xf32>
    %82 = arith.addf %75, %81 : vector<16x16x128xf32>
    %c0_17 = arith.constant 0 : index
    %c0_18 = arith.constant 0 : index
    %83 = vector.load %arg6[%c0_17, %c0_18] : memref<1x128xf32, #tpu.memory_space<vmem>>, vector<1x128xf32>
    %84 = vector.shape_cast %83 : vector<1x128xf32> to vector<1x1x128xf32>
    %85 = vector.broadcast %84 : vector<1x1x128xf32> to vector<16x16x128xf32>
    %86 = arith.addf %82, %85 : vector<16x16x128xf32>
    %87 = math.roundeven %86 : vector<16x16x128xf32>
    %cst_19 = arith.constant 0.000000e+00 : f32
    %cst_20 = arith.constant 2.550000e+02 : f32
    %88 = vector.broadcast %cst_19 : f32 to vector<16x16x128xf32>
    %89 = arith.maximumf %88, %87 : vector<16x16x128xf32>
    %90 = vector.broadcast %cst_20 : f32 to vector<16x16x128xf32>
    %91 = arith.minimumf %90, %89 : vector<16x16x128xf32>
    %92 = vector.shape_cast %91 : vector<16x16x128xf32> to vector<256x128xf32>
    %93 = arith.truncf %92 : vector<256x128xf32> to vector<256x128xbf16>
    %c0_21 = arith.constant 0 : index
    %c0_22 = arith.constant 0 : index
    %94 = vector.load %arg7[%c0_21, %c0_22] : memref<128x128xbf16, #tpu.memory_space<vmem>>, vector<128x128xbf16>
    %cst_23 = arith.constant dense<0.000000e+00> : vector<256x128xf32>
    %95 = tpu.matmul %93, %94, %cst_23 {dimension_numbers = #tpu.dot_dimension_numbers<[1], [0], [0], [1], [0, 0, 1, 1], [], []>} : vector<256x128xbf16>, vector<128x128xbf16>, vector<256x128xf32> -> vector<256x128xf32>
    %c0_24 = arith.constant 0 : index
    %c0_25 = arith.constant 0 : index
    %96 = vector.load %arg8[%c0_24, %c0_25] : memref<1x128xf32, #tpu.memory_space<vmem>>, vector<1x128xf32>
    %97 = vector.broadcast %96 : vector<1x128xf32> to vector<256x128xf32>
    %98 = arith.mulf %95, %97 : vector<256x128xf32>
    %c0_26 = arith.constant 0 : index
    %c0_27 = arith.constant 0 : index
    %99 = vector.load %arg9[%c0_26, %c0_27] : memref<1x128xf32, #tpu.memory_space<vmem>>, vector<1x128xf32>
    %100 = vector.broadcast %99 : vector<1x128xf32> to vector<256x128xf32>
    %101 = arith.addf %98, %100 : vector<256x128xf32>
    %102 = math.roundeven %101 : vector<256x128xf32>
    %cst_28 = arith.constant 0.000000e+00 : f32
    %cst_29 = arith.constant 2.550000e+02 : f32
    %103 = vector.broadcast %cst_28 : f32 to vector<256x128xf32>
    %104 = arith.maximumf %103, %102 : vector<256x128xf32>
    %105 = vector.broadcast %cst_29 : f32 to vector<256x128xf32>
    %106 = arith.minimumf %105, %104 : vector<256x128xf32>
    %cst_30 = arith.constant 0.0235294122 : f32
    %107 = vector.broadcast %cst_30 : f32 to vector<256x128xf32>
    %108 = arith.mulf %106, %107 : vector<256x128xf32>
    %109 = vector.shape_cast %108 : vector<256x128xf32> to vector<16x16x128xf32>
    %c0_31 = arith.constant 0 : index
    %c0_32 = arith.constant 0 : index
    %c0_33 = arith.constant 0 : index
    %c0_34 = arith.constant 0 : index
    %110 = vector.load %arg10[%c0_31, %c0_32, %c0_33, %c0_34] : memref<1x16x16x128xf32, #tpu.memory_space<vmem>>, vector<1x16x16x128xf32>
    %111 = vector.shape_cast %110 : vector<1x16x16x128xf32> to vector<16x16x128xf32>
    %112 = vector.shape_cast %109 : vector<16x16x128xf32> to vector<1x16x16x128xf32>
    tpu.vector_store %arg10[%c0_31, %c0_32, %c0_33, %c0_34], %112 {strides = array<i32>} : memref<1x16x16x128xf32, #tpu.memory_space<vmem>>, vector<1x16x16x128xf32>,
    return
  }
  func.func @transform_0(%arg0: i32, %arg1: i32) -> (i32, i32, i32, i32) {
    %c16_i32 = arith.constant 16 : i32
    %0 = arith.muli %arg1, %c16_i32 : i32
    %c1_i32 = arith.constant 1 : i32
    %1 = arith.subi %0, %c1_i32 : i32
    %c0_i32 = arith.constant 0 : i32
    %2 = arith.maxsi %1, %c0_i32 : i32
    %c0_i32_0 = arith.constant 0 : i32
    %c0_i32_1 = arith.constant 0 : i32
    %c0_i32_2 = arith.constant 0 : i32
    return %arg0, %2, %c0_i32_0, %c0_i32_1 : i32, i32, i32, i32
  }
  func.func @transform_1(%arg0: i32, %arg1: i32) -> (i32, i32, i32, i32) {
    %c0_i32 = arith.constant 0 : i32
    %c0_i32_0 = arith.constant 0 : i32
    %c0_i32_1 = arith.constant 0 : i32
    return %arg0, %arg1, %c0_i32, %c0_i32_0 : i32, i32, i32, i32
  }
  func.func @transform_2(%arg0: i32, %arg1: i32) -> (i32, i32, i32, i32) {
    %c16_i32 = arith.constant 16 : i32
    %0 = arith.muli %arg1, %c16_i32 : i32
    %c16_i32_0 = arith.constant 16 : i32
    %1 = arith.addi %0, %c16_i32_0 : i32
    %c15_i32 = arith.constant 15 : i32
    %2 = arith.minsi %1, %c15_i32 : i32
    %c0_i32 = arith.constant 0 : i32
    %c0_i32_1 = arith.constant 0 : i32
    %c0_i32_2 = arith.constant 0 : i32
    return %arg0, %2, %c0_i32, %c0_i32_1 : i32, i32, i32, i32
  }
  func.func @transform_3(%arg0: i32, %arg1: i32) -> (i32, i32, i32) {
    %c0_i32 = arith.constant 0 : i32
    %c0_i32_0 = arith.constant 0 : i32
    %c0_i32_1 = arith.constant 0 : i32
    %c0_i32_2 = arith.constant 0 : i32
    return %c0_i32, %c0_i32_0, %c0_i32_1 : i32, i32, i32
  }
  func.func @transform_4(%arg0: i32, %arg1: i32) -> (i32, i32) {
    %c0_i32 = arith.constant 0 : i32
    %c0_i32_0 = arith.constant 0 : i32
    %c0_i32_1 = arith.constant 0 : i32
    return %c0_i32, %c0_i32_0 : i32, i32
  }
  func.func @transform_5(%arg0: i32, %arg1: i32) -> (i32, i32) {
    %c0_i32 = arith.constant 0 : i32
    %c0_i32_0 = arith.constant 0 : i32
    %c0_i32_1 = arith.constant 0 : i32
    return %c0_i32, %c0_i32_0 : i32, i32
  }
  func.func @transform_6(%arg0: i32, %arg1: i32) -> (i32, i32) {
    %c0_i32 = arith.constant 0 : i32
    %c0_i32_0 = arith.constant 0 : i32
    %c0_i32_1 = arith.constant 0 : i32
    return %c0_i32, %c0_i32_0 : i32, i32
  }
  func.func @transform_7(%arg0: i32, %arg1: i32) -> (i32, i32) {
    %c0_i32 = arith.constant 0 : i32
    %c0_i32_0 = arith.constant 0 : i32
    %c0_i32_1 = arith.constant 0 : i32
    return %c0_i32, %c0_i32_0 : i32, i32
  }
  func.func @transform_8(%arg0: i32, %arg1: i32) -> (i32, i32, i32, i32) {
    %c0_i32 = arith.constant 0 : i32
    %c0_i32_0 = arith.constant 0 : i32
    %c0_i32_1 = arith.constant 0 : i32
    return %arg0, %arg1, %c0_i32, %c0_i32_0 : i32, i32, i32, i32
  }
}

</mosaic_0001>

<bundles_post_ra>
// kernel: dws_conv_block.1
= control target key start
LH: loop header
LB: loop body
LE: loop exit
PB: predicated region body
PF: predicated region fallthrough
CT: control target
= control target key end

     0   :  { %s2729_s26 = smov 0   ;;  %s2731_s2 = smov 0   ;;  %s4190_s0 = inlined_call_operand.vmem [shape: f32[2,16,16,128], index: 0, kind: input, shape index: {}, may-alias: {0,1,2}]   ;;  %s4191_s1 = inlined_call_operand.vmem [shape: f32[2,16,16,128], index: 1, kind: input, shape index: {}, may-alias: {0,1,2}]   ;;  %s4192_s2 = inlined_call_operand.vmem [shape: f32[2,16,16,128], index: 2, kind: input, shape index: {}, may-alias: {0,1,2}]   ;;  %s4193_s3 = inlined_call_operand.vmem [shape: f32[3,3,128], index: 3, kind: input, shape index: {}]   ;;  %s4194_s4 = inlined_call_operand.vmem [shape: f32[1,128], index: 4, kind: input, shape index: {}]   ;;  %s4195_s5 = inlined_call_operand.vmem [shape: bf16[128,128], index: 5, kind: input, shape index: {}]   ;;  %s4196_s6 = inlined_call_operand.vmem [shape: f32[1,128], index: 6, kind: input, shape index: {}]   ;;  %s4197_s7 = inlined_call_operand.vmem [shape: f32[1,128], index: 7, kind: input, shape index: {}]   ;;  %s4198_s8 = inlined_call_operand.vmem [shape: f32[2,16,16,128], index: 8, kind: output, shape index: {}]  }
   0x1   :  { %s2733_s27 = smov 0  }
   0x2 LB: > { %s30_s28 = sadd.s32 1, %s2677_s2  ;;  %p2009_p0 = scmp.ge.s32.totalorder %s2681_s27, 1  ;;  %s2681_s27 = sphi %s2733_s27, %s18_s27   ;;  %s2677_s2 = sphi %s2731_s2, %s4520_s2   ;;  %s2673_s26 = sphi %s2729_s26, %s4519_s26  }
   0x3   : > { %p32_p1 = scmp.ge.s32.totalorder %s30_s28, 2  ;;  %p348_p2 = scmp.lt.s32.totalorder %s2681_s27, 3 }
   0x5   : > { %s4522_s28 = smov (%p32_p1, %s30_s28), 0  ;;  %p349_p3 = pnand %p2009_p0, %p348_p2 }
   0x7   : > { %352 = sbr.rel (%p349_p3) target bundleno = 452 (0x1c4), region = 52 }
   0xc   : > { %v2064_v0 = vld [vmem:[%s4195_s5 + $0x38] sm:$0xff]  ;;  %p436_p4 = scmp.lt.s32.totalorder %s2673_s26, 1  ;;  %vm560_vm0 = vcmask 1040384   ;;  %v2683_v1 = vmov 0.0   ;;  %vm669_vm1 = vcmask 1046528   ;;  %v2063_v4 = vld [vmem:[%s4195_s5 + $0x30] sm:$0xff] }
   0xd   : > { %v2750_v2 = vrot.slane %v2683_v1, 7  ;;  %v2752_v3 = vrot.slane %v2683_v1, 1  ;;  %1546 = vmatpush.bf16.msra.mxu0 %v2064_v0  ;;  %2065 = vmatpush.bf16.msra.mxu1 %v2064_v0  ;;  %v778_v5 = vld [vmem:[%s4193_s3] sm:$0x7]  ;;  %v779_v8 = vld [vmem:[%s4193_s3 + $0x4] sm:$0x7] }
   0xe   : > { %s4524_s26 = smov (!%p436_p4, %s2673_s26), 1  ;;  %2066 = vmatpush.bf16.msra.mxu2 %v2064_v0  ;;  %2067 = vmatpush.bf16.msra.mxu3 %v2064_v0  ;;  %v780_v9 = vld [vmem:[%s4193_s3 + $0x8] sm:$0x7]  ;;  %v2780_v11 = vperm.slane %v778_v5, 0  ;;  %v2782_v12 = vperm.slane %v779_v8, 0  ;;  %v2786_v14 = vperm.slane %v778_v5, 1 }
   0xf   : > { %4290 = vst [vmem:[#allocation2_spill] sm:$0xff] %v2750_v2  ;;  %v2764_v6 = vsel %vm560_vm0, 0.0, %v2750_v2  ;;  %v2768_v7 = vsel %vm669_vm1, %v2752_v3, 0.0  ;;  %v2062_v10 = vld [vmem:[%s4195_s5 + $0x28] sm:$0xff]  ;;  %s2053_s19 = sshll.u32 %s4524_s26, 8  ;;  %v2784_v13 = vperm.slane %v780_v9, 0 }
  0x10   : > { %4291 = vst [vmem:[#allocation3_spill] sm:$0xff] %v2752_v3  ;;  %s2793_s22 = scalar_lea.vmem %s4191_s1, %s2053_s19  ;;  %v2795_v15 = vperm.slane %v779_v8, 1  ;;  %v2797_v16 = vperm.slane %v780_v9, 1  ;;  %v2799_v17 = vperm.slane %v778_v5, 2  ;;  %v2801_v18 = vperm.slane %v779_v8, 2  ;;  %v2061_v39 = vld [vmem:[%s4195_s5 + $0x20] sm:$0xff]  ;;  %s4033_s0 = scalar_lea.vmem %s4198_s8, %s2053_s19 }
  0x11   : > { %4292 = vst [vmem:[#allocation4_spill] sm:$0xff] %v2764_v6  ;;  %1547 = vmatpush.bf16.msra.mxu0 %v2063_v4  ;;  %2068 = vmatpush.bf16.msra.mxu1 %v2063_v4  ;;  %v2804_v19 = vld [vmem:[%s2793_s22] sm:$0xff]  ;;  %v2807_v20 = vld [vmem:[%s2793_s22 + $0x8] sm:$0xff]  ;;  %v2810_v21 = vld [vmem:[%s2793_s22 + $0x10] sm:$0xff]  ;;  %v782_v22 = vmul.f32 %v2780_v11, %v2764_v6  ;;  %v783_v23 = vmul.f32 %v2780_v11, %v2750_v2  ;;  %v945_v24 = vmul.f32 0.0, %v2786_v14  ;;  %v2817_v25 = vperm.slane %v780_v9, 2 }
  0x12   : > { %4293 = vst [vmem:[#allocation5_spill] sm:$0xff] %v2768_v7  ;;  %2069 = vmatpush.bf16.msra.mxu2 %v2063_v4  ;;  %2070 = vmatpush.bf16.msra.mxu3 %v2063_v4  ;;  %v2820_v26 = vld [vmem:[%s2793_s22 + $0x18] sm:$0xff]  ;;  %v564_v27 = vrot.slane %v2804_v19, 7  ;;  %v565_v28 = vrot.slane %v2807_v20, 7  ;;  %v567_v29 = vrot.slane %v2810_v21, 7  ;;  %v673_v30 = vrot.slane %v2804_v19, 1 }
  0x13   : > { %v568_v31 = vrot.slane %v2820_v26, 7  ;;  %v674_v32 = vrot.slane %v2807_v20, 1  ;;  %v676_v33 = vrot.slane %v2810_v21, 1  ;;  %v677_v34 = vrot.slane %v2820_v26, 1  ;;  %v2866_v48 = vld [vmem:[%s2793_s22 + $0x30] sm:$0xff]  ;;  %v2877_v53 = vld [vmem:[%s2793_s22 + $0x38] sm:$0xff] }
  0x14   : > { %v2831_v35 = vsel %vm560_vm0, %v564_v27, %v565_v28  ;;  %v2834_v36 = vsel %vm560_vm0, 0.0, %v564_v27  ;;  %v2837_v37 = vsel %vm560_vm0, 0.0, %v567_v29  ;;  %v1010_v38 = vmul.f32 %v2795_v15, %v2804_v19  ;;  %v2880_v54 = vld [vmem:[%s2793_s22 + $0x40] sm:$0xff]  ;;  %v2887_v59 = vld [vmem:[%s2793_s22 + $0x48] sm:$0xff]  ;;  %v2890_v60 = vld [vmem:[%s2793_s22 + $0x50] sm:$0xff] }
  0x15   : > { %1548 = vmatpush.bf16.msra.mxu0 %v2062_v10  ;;  %2071 = vmatpush.bf16.msra.mxu1 %v2062_v10  ;;  %v2845_v40 = vsel %vm560_vm0, %v567_v29, %v568_v31  ;;  %v2848_v41 = vsel %vm669_vm1, %v673_v30, %v674_v32  ;;  %v2851_v42 = vsel %vm669_vm1, %v676_v33, %v677_v34  ;;  %v2854_v43 = vsel %vm669_vm1, %v674_v32, 0.0  ;;  %v2893_v61 = vld [vmem:[%s2793_s22 + $0x58] sm:$0xff]  ;;  %v2059_v33 = vld [vmem:[%s4195_s5 + $0x10] sm:$0xff]  ;;  %v3004_v2 = vld [vmem:[%s2793_s22 + $0x88] sm:$0xff] }
  0x16   : > { %4294 = vst [vmem:[#allocation6_spill] sm:$0xff] %v2851_v42  ;;  %2072 = vmatpush.bf16.msra.mxu2 %v2062_v10  ;;  %2073 = vmatpush.bf16.msra.mxu3 %v2062_v10  ;;  %v2857_v44 = vsel %vm669_vm1, %v677_v34, 0.0  ;;  %v815_v45 = vmul.f32 %v2782_v12, %v2834_v36  ;;  %v816_v46 = vmul.f32 %v2782_v12, %v2831_v35  ;;  %v2060_v62 = vld [vmem:[%s4195_s5 + $0x18] sm:$0xff]  ;;  %v573_v4 = vrot.slane %v2866_v48, 7 }
  0x17   : > { %v880_v47 = vmul.f32 %v2784_v13, %v2837_v37  ;;  %v881_v49 = vmul.f32 %v2784_v13, %v2845_v40  ;;  %v1011_v50 = vmul.f32 %v2795_v15, %v2807_v20  ;;  %v1075_v51 = vmul.f32 %v2797_v16, %v2810_v21  ;;  %4295 = vst [vmem:[#allocation7_spill] sm:$0xff] %v2880_v54 }
  0x18   : > { %v1076_v52 = vmul.f32 %v2797_v16, %v2820_v26  ;;  %v847_v55 = vadd.f32 %v815_v45, %v782_v22  ;;  %v848_v56 = vadd.f32 %v816_v46, %v783_v23  ;;  %v1140_v57 = vmul.f32 %v2799_v17, %v2752_v3  ;;  %4296 = vst [vmem:[#allocation8_spill] sm:$0xff] %v2887_v59 }
  0x19   : > { %v1141_v58 = vmul.f32 %v2799_v17, %v2768_v7  ;;  %4297 = vst [vmem:[#allocation9_spill] sm:$0xff] %v2890_v60  ;;  %1549 = vmatpush.bf16.msra.mxu0 %v2061_v39  ;;  %2074 = vmatpush.bf16.msra.mxu1 %v2061_v39  ;;  %v1205_v63 = vmul.f32 %v2801_v18, %v2848_v41  ;;  %v574_v10 = vrot.slane %v2877_v53, 7  ;;  %v576_v22 = vrot.slane %v2880_v54, 7 }
  0x1a   : > { %4298 = vst [vmem:[#allocation10_spill] sm:$0xff] %v2893_v61  ;;  %v1206_v0 = vmul.f32 %v2801_v18, %v2854_v43  ;;  %v2904_v1 = vmul.f32 %v2817_v25, %v2851_v42  ;;  %2075 = vmatpush.bf16.msra.mxu2 %v2061_v39  ;;  %2076 = vmatpush.bf16.msra.mxu3 %v2061_v39  ;;  %v577_v23 = vrot.slane %v2887_v59, 7  ;;  %v579_v27 = vrot.slane %v2890_v60, 7 }
  0x1b   : > { %v912_v5 = vadd.f32 %v880_v47, %v847_v55  ;;  %v913_v8 = vadd.f32 %v881_v49, %v848_v56  ;;  %v2909_v9 = vmul.f32 %v2817_v25, %v2857_v44  ;;  %v580_v28 = vrot.slane %v2893_v61, 7  ;;  %4310 = vst [vmem:[#allocation22_spill] sm:$0xff] %v3004_v2 }
  0x1c   : > { %v2917_v31 = vsel %vm560_vm0, %v573_v4, %v574_v10  ;;  %v2920_v32 = vsel %vm560_vm0, 0.0, %v573_v4  ;;  %v2926_v34 = vsel %vm560_vm0, %v576_v22, %v577_v23  ;;  %v2935_v45 = vsel %vm560_vm0, 0.0, %v579_v27  ;;  %v2944_v10 = vld [vmem:[%s2793_s22 + $0x70] sm:$0xff] }
  0x1d   : > { %v977_v29 = vadd.f32 %v945_v24, %v912_v5  ;;  %v978_v30 = vadd.f32 %v945_v24, %v913_v8  ;;  %4299 = vst [vmem:[#allocation11_spill] sm:$0xff] %v2917_v31  ;;  %1550 = vmatpush.bf16.msra.mxu0 %v2060_v62  ;;  %2077 = vmatpush.bf16.msra.mxu1 %v2060_v62  ;;  %v2932_v24 = vsel %vm560_vm0, 0.0, %v576_v22  ;;  %v682_v49 = vrot.slane %v2866_v48, 1 }
  0x1e   : > { %4300 = vst [vmem:[#allocation12_spill] sm:$0xff] %v2920_v32  ;;  %v2929_v39 = vsel %vm560_vm0, %v579_v27, %v580_v28  ;;  %2078 = vmatpush.bf16.msra.mxu2 %v2060_v62  ;;  %2079 = vmatpush.bf16.msra.mxu3 %v2060_v62  ;;  %v683_v55 = vrot.slane %v2877_v53, 1  ;;  %v685_v56 = vrot.slane %v2880_v54, 1  ;;  %v686_v4 = vrot.slane %v2887_v59, 1  ;;  %v2058_v62 = vld [vmem:[%s4195_s5 + $0x8] sm:$0xff] }
  0x1f   : > { %4301 = vst [vmem:[#allocation13_spill] sm:$0xff] %v2926_v34  ;;  %v1042_v46 = vadd.f32 %v1010_v38, %v977_v29  ;;  %v1043_v47 = vadd.f32 %v1011_v50, %v978_v30  ;;  %v688_v5 = vrot.slane %v2890_v60, 1  ;;  %v689_v8 = vrot.slane %v2893_v61, 1 }
  0x20   : > { %4302 = vst [vmem:[#allocation14_spill] sm:$0xff] %v2932_v24  ;;  %v2947_v38 = vsel %vm669_vm1, %v682_v49, %v683_v55  ;;  %v2950_v50 = vsel %vm669_vm1, %v683_v55, 0.0  ;;  %v2956_v27 = vsel %vm669_vm1, %v685_v56, %v686_v4  ;;  %v791_v55 = vmul.f32 %v2780_v11, %v2917_v31  ;;  %v2057_v49 = vld [vmem:[%s4195_s5] sm:$0xff] }
  0x21   : > { %v1107_v22 = vadd.f32 %v1075_v51, %v1042_v46  ;;  %v1108_v23 = vadd.f32 %v1076_v52, %v1043_v47  ;;  %4303 = vst [vmem:[#allocation15_spill] sm:$0xff] %v2947_v38  ;;  %1551 = vmatpush.bf16.msra.mxu0 %v2059_v33  ;;  %2080 = vmatpush.bf16.msra.mxu1 %v2059_v33  ;;  %v2962_v52 = vsel %vm669_vm1, %v686_v4, 0.0  ;;  %v2965_v28 = vsel %vm669_vm1, %v689_v8, 0.0  ;;  %v2970_v47 = vld [vmem:[%s2793_s22 + $0x78] sm:$0xff] }
  0x22   : > { %4304 = vst [vmem:[#allocation16_spill] sm:$0xff] %v2950_v50  ;;  %v2959_v51 = vsel %vm669_vm1, %v688_v5, %v689_v8  ;;  %2081 = vmatpush.bf16.msra.mxu2 %v2059_v33  ;;  %2082 = vmatpush.bf16.msra.mxu3 %v2059_v33  ;;  %v790_v46 = vmul.f32 %v2780_v11, %v2920_v32  ;;  %v2987_v8 = vld [vmem:[%s4194_s4] ss:$0 sm:$0xff] }
  0x23   : > { %4305 = vst [vmem:[#allocation17_spill] sm:$0xff] %v2956_v27  ;;  %v1172_v29 = vadd.f32 %v1140_v57, %v1107_v22  ;;  %v1173_v30 = vadd.f32 %v1141_v58, %v1108_v23  ;;  %v823_v56 = vmul.f32 %v2782_v12, %v2932_v24  ;;  %v824_v4 = vmul.f32 %v2782_v12, %v2926_v34  ;;  %v2982_v58 = vld [vmem:[%s2793_s22 + $0x80] sm:$0xff] }
  0x24   : > { %4306 = vst [vmem:[#allocation18_spill] sm:$0xff] %v2959_v51  ;;  %v888_v57 = vmul.f32 %v2784_v13, %v2935_v45  ;;  %v889_v22 = vmul.f32 %v2784_v13, %v2929_v39  ;;  %v953_v23 = vmul.f32 %v2786_v14, %v2866_v48  ;;  %v1018_v48 = vmul.f32 %v2795_v15, %v2880_v54 }
  0x25   : > { %4307 = vst [vmem:[#allocation19_spill] sm:$0xff] %v2962_v52  ;;  %v1237_v33 = vadd.f32 %v1205_v63, %v1172_v29  ;;  %v1238_v5 = vadd.f32 %v1206_v0, %v1173_v30  ;;  %1552 = vmatpush.bf16.msra.mxu0 %v2058_v62  ;;  %2083 = vmatpush.bf16.msra.mxu1 %v2058_v62  ;;  %v586_v30 = vrot.slane %v2970_v47, 7  ;;  %v588_v6 = vrot.slane %v2982_v58, 7 }
  0x26   : > { %4308 = vst [vmem:[#allocation20_spill] sm:$0xff] %v2965_v28  ;;  %v855_v63 = vadd.f32 %v823_v56, %v790_v46  ;;  %v856_v0 = vadd.f32 %v824_v4, %v791_v55  ;;  %v954_v29 = vmul.f32 %v2786_v14, %v2877_v53  ;;  %2084 = vmatpush.bf16.msra.mxu2 %v2058_v62 }
  0x27   : > { %4309 = vst [vmem:[#allocation21_spill] sm:$0xff] %v2982_v58  ;;  %2085 = vmatpush.bf16.msra.mxu3 %v2058_v62  ;;  %v1302_v7 = vadd.f32 %v2904_v1, %v1237_v33  ;;  %v1303_v3 = vadd.f32 %v2909_v9, %v1238_v5  ;;  %v1019_v53 = vmul.f32 %v2795_v15, %v2887_v59 }
  0x28   : > { %v920_v46 = vadd.f32 %v888_v57, %v855_v63  ;;  %v921_v55 = vadd.f32 %v889_v22, %v856_v0  ;;  %v1083_v56 = vmul.f32 %v2797_v16, %v2890_v60  ;;  %v1084_v9 = vmul.f32 %v2797_v16, %v2893_v61 }
  0x29   : > { %v1338_v62 = vadd.f32 %v2987_v8, %v1302_v7  ;;  %v1339_v1 = vadd.f32 %v2987_v8, %v1303_v3  ;;  %v1148_v4 = vmul.f32 %v2799_v17, %v2947_v38  ;;  %1553 = vmatpush.bf16.msra.mxu0 %v2057_v49  ;;  %2086 = vmatpush.bf16.msra.mxu1 %v2057_v49  ;;  %v589_v22 = vrot.slane %v3004_v2, 7 }
  0x2a   : > { %v985_v57 = vadd.f32 %v953_v23, %v920_v46  ;;  %v986_v33 = vadd.f32 %v954_v29, %v921_v55  ;;  %v1149_v5 = vmul.f32 %v2799_v17, %v2950_v50  ;;  %2087 = vmatpush.bf16.msra.mxu2 %v2057_v49  ;;  %v1214_v59 = vmul.f32 %v2801_v18, %v2962_v52 }
  0x2b   : > { %2088 = vmatpush.bf16.msra.mxu3 %v2057_v49  ;;  %v2089_v7 = vand.u32 2147483647, %v1338_v62  ;;  %v2091_v3 = vcvt.f32.s32 %v1338_v62  ;;  %v2094_v63 = vand.u32 2147483648, %v1338_v62  ;;  %v2097_v0 = vand.u32 2147483647, %v1339_v1 }
  0x2c   : > { %v2099_v31 = vcvt.f32.s32 %v1339_v1  ;;  %v2102_v32 = vand.u32 2147483648, %v1339_v1  ;;  %v1050_v38 = vadd.f32 %v1018_v48, %v985_v57  ;;  %v1051_v61 = vadd.f32 %v1019_v53, %v986_v33  ;;  %v3033_v48 = vld [vmem:[%s2793_s22 + $0x90] sm:$0xff]  ;;  %v3036_v53 = vld [vmem:[%s2793_s22 + $0x98] sm:$0xff] }
  0x2d   : > { %vm3020_vm2 = vcmp.lt.f32.partialorder %v2089_v7, 8388608.0  ;;  %v2092_v29 = vcvt.s32.f32 %v2091_v3  ;;  %vm3024_vm3 = vcmp.lt.f32.partialorder %v2097_v0, 8388608.0  ;;  %v1213_v49 = vmul.f32 %v2801_v18, %v2956_v27  ;;  %4315 = vst [vmem:[#allocation23_spill] sm:$0xff] %v3033_v48 }
  0x2e   : > { %v2100_v55 = vcvt.s32.f32 %v2099_v31  ;;  %v1115_v50 = vadd.f32 %v1083_v56, %v1050_v38  ;;  %v1116_v60 = vadd.f32 %v1084_v9, %v1051_v61  ;;  %4316 = vst [vmem:[#allocation24_spill] sm:$0xff] %v3036_v53  ;;  %v1278_v33 = vmul.f32 %v2817_v25, %v2959_v51 }
  0x2f   : > { %v2093_v57 = vand.u32 2147483647, %v2092_v29  ;;  %v1279_v7 = vmul.f32 %v2817_v25, %v2965_v28  ;;  %v4317_v3 = vrot.slane %v2944_v10, 7  ;;  %v3048_v9 = vsel %vm560_vm0, %v588_v6, %v589_v22 }
  0x30   : > { %v2101_v61 = vand.u32 2147483647, %v2100_v55  ;;  %v1180_v38 = vadd.f32 %v1148_v4, %v1115_v50  ;;  %v1181_v56 = vadd.f32 %v1149_v5, %v1116_v60  ;;  %4319 = vst [vmem:[#allocation26_spill] sm:$0xff] %v3048_v9  ;;  %v591_v29 = vrot.slane %v3033_v48, 7 }
  0x31   : > { %v3045_v31 = vsel %vm560_vm0, %v4317_v3, %v586_v30  ;;  %v2095_v0 = vor.u32 %v2094_v63, %v2093_v57  ;;  %v592_v52 = vrot.slane %v3036_v53, 7  ;;  %v4320_v51 = vmov %v4317_v3 }
  0x32   : > { %4318 = vst [vmem:[#allocation25_spill] sm:$0xff] %v3045_v31  ;;  %v3055_v28 = vsel %vm560_vm0, 0.0, %v4320_v51  ;;  %v2103_v27 = vor.u32 %v2102_v32, %v2101_v61  ;;  %v1245_v54 = vadd.f32 %v1213_v49, %v1180_v38  ;;  %v1246_v30 = vadd.f32 %v1214_v59, %v1181_v56 }
  0x33   : > { %4321 = vst [vmem:[#allocation27_spill] sm:$0xff] %v3055_v28  ;;  %v3058_v55 = vsel %vm560_vm0, 0.0, %v588_v6  ;;  %v2096_v60 = vsel %vm3020_vm2, %v2095_v0, %v1338_v62  ;;  %v3063_v50 = vsel %vm560_vm0, %v591_v29, %v592_v52  ;;  %v3066_v4 = vsel %vm560_vm0, 0.0, %v591_v29 }
  0x34   : > { %4322 = vst [vmem:[#allocation28_spill] sm:$0xff] %v3058_v55  ;;  %v694_v5 = vrot.slane %v2944_v10, 1  ;;  %v2104_v51 = vsel %vm3024_vm3, %v2103_v27, %v1339_v1  ;;  %v1402_v32 = vmax.f32 %v2096_v60, 0.0  ;;  %v1310_v22 = vadd.f32 %v1278_v33, %v1245_v54  ;;  %v514_v60 = vld [vmem:[%s2793_s22 + $0xb0] sm:$0xff] }
  0x35   : > { %4323 = vst [vmem:[#allocation29_spill] sm:$0xff] %v3063_v50  ;;  %v1311_v59 = vadd.f32 %v1279_v7, %v1246_v30  ;;  %v1403_v63 = vmax.f32 %v2104_v51, 0.0  ;;  %v695_v6 = vrot.slane %v2970_v47, 1  ;;  %v697_v23 = vrot.slane %v2982_v58, 1  ;;  %v3144_v51 = vld [vmem:[%s2793_s22 + $0xc8] sm:$0xff] }
  0x36   : > { %v698_v62 = vrot.slane %v3004_v2, 1  ;;  %v1434_v52 = vmin.f32 %v1402_v32, 255.0  ;;  %v1346_v49 = vadd.f32 %v2987_v8, %v1310_v22  ;;  %v700_v3 = vrot.slane %v3033_v48, 1 }
  0x37   : > { %v1347_v57 = vadd.f32 %v2987_v8, %v1311_v59  ;;  %v1435_v61 = vmin.f32 %v1403_v63, 255.0  ;;  %v3078_v27 = vsel %vm669_vm1, %v694_v5, %v695_v6  ;;  %v701_v1 = vrot.slane %v3036_v53, 1 }
  0x38   : > { %4324 = vst [vmem:[#allocation30_spill] sm:$0xff] %v3078_v27  ;;  %v3081_v54 = vsel %vm669_vm1, %v697_v23, %v698_v62  ;;  %v2153_v46 = vand.u32 2147483647, %v1346_v49  ;;  %v2155_v33 = vcvt.f32.s32 %v1346_v49  ;;  %v2158_v7 = vand.u32 2147483648, %v1346_v49 }
  0x39   : > { %4325 = vst [vmem:[#allocation31_spill] sm:$0xff] %v3081_v54  ;;  %v2161_v38 = vand.u32 2147483647, %v1347_v57  ;;  %v1466_v56 = vpack.c.bf16 %v1435_v61, %v1434_v52  ;;  %v2163_v0 = vcvt.f32.s32 %v1347_v57  ;;  %v2166_v29 = vand.u32 2147483648, %v1347_v57 }
  0x3a   : > { %v3085_v30 = vsel %vm669_vm1, %v700_v3, %v701_v1  ;;  %vm3087_vm4 = vcmp.lt.f32.partialorder %v2153_v46, 8388608.0  ;;  %v2156_v5 = vcvt.s32.f32 %v2155_v33  ;;  %v3096_v32 = vsel %vm669_vm1, %v695_v6, 0.0 }
  0x3b   : > { %4326 = vst [vmem:[#allocation32_spill] sm:$0xff] %v3085_v30  ;;  %vm3091_vm5 = vcmp.lt.f32.partialorder %v2161_v38, 8388608.0  ;;  %1554 = vmatmul.bf16.vlgmr.msra.gmra.mxu0 %v1466_v56  ;;  %v2164_v22 = vcvt.s32.f32 %v2163_v0  ;;  %v3099_v59 = vsel %vm669_vm1, %v698_v62, 0.0  ;;  %v3102_v63 = vsel %vm669_vm1, %v701_v1, 0.0 }
  0x3c   : > { %4331 = vst [vmem:[#allocation33_spill] sm:$0xff] %v3096_v32  ;;  %v798_v23 = vmul.f32 %v2780_v11, %v3055_v28  ;;  %v2157_v52 = vand.u32 2147483647, %v2156_v5  ;;  %v799_v3 = vmul.f32 %v2780_v11, %v3045_v31  ;;  %v831_v61 = vmul.f32 %v2782_v12, %v3058_v55 }
  0x3d   : > { %4332 = vst [vmem:[#allocation34_spill] sm:$0xff] %v3099_v59  ;;  %v832_v6 = vmul.f32 %v2782_v12, %v3048_v9  ;;  %v2165_v46 = vand.u32 2147483647, %v2164_v22  ;;  %v896_v62 = vmul.f32 %v2784_v13, %v3066_v4  ;;  %v897_v1 = vmul.f32 %v2784_v13, %v3063_v50 }
  0x3e   : > { %4333 = vst [vmem:[#allocation35_spill] sm:$0xff] %v3102_v63  ;;  %v961_v33 = vmul.f32 %v2786_v14, %v2944_v10  ;;  %v2159_v38 = vor.u32 %v2158_v7, %v2157_v52  ;;  %v863_v56 = vadd.f32 %v831_v61, %v798_v23  ;;  %v962_v5 = vmul.f32 %v2786_v14, %v2970_v47 }
  0x3f   : > { %v864_v0 = vadd.f32 %v832_v6, %v799_v3  ;;  %v2167_v31 = vor.u32 %v2166_v29, %v2165_v46  ;;  %v1026_v22 = vmul.f32 %v2795_v15, %v2982_v58  ;;  %v1027_v28 = vmul.f32 %v2795_v15, %v3004_v2  ;;  %v515_v6 = vld [vmem:[%s2793_s22 + $0xb8] sm:$0xff] }
  0x40   : > { %v1091_v50 = vmul.f32 %v2797_v16, %v3033_v48  ;;  %v2160_v10 = vsel %vm3087_vm4, %v2159_v38, %v1346_v49  ;;  %v928_v7 = vadd.f32 %v896_v62, %v863_v56  ;;  %v1092_v47 = vmul.f32 %v2797_v16, %v3036_v53  ;;  %v3141_v38 = vld [vmem:[%s2793_s22 + $0xc0] sm:$0xff] }
  0x41   : > { %v929_v23 = vadd.f32 %v897_v1, %v864_v0  ;;  %v2168_v29 = vsel %vm3091_vm5, %v2167_v31, %v1347_v57  ;;  %v1410_v52 = vmax.f32 %v2160_v10, 0.0  ;;  %v1156_v3 = vmul.f32 %v2799_v17, %v3078_v27  ;;  %v3147_v31 = vld [vmem:[%s2793_s22 + $0xd0] sm:$0xff] }
  0x42   : > { %v1157_v61 = vmul.f32 %v2799_v17, %v3096_v32  ;;  %v1411_v49 = vmax.f32 %v2168_v29, 0.0  ;;  %v993_v46 = vadd.f32 %v961_v33, %v928_v7  ;;  %v1221_v1 = vmul.f32 %v2801_v18, %v3081_v54 }
  0x43   : > { %v994_v62 = vadd.f32 %v962_v5, %v929_v23  ;;  %v1442_v57 = vmin.f32 %v1410_v52, 255.0  ;;  %v1222_v56 = vmul.f32 %v2801_v18, %v3099_v59  ;;  %v1286_v0 = vmul.f32 %v2817_v25, %v3085_v30  ;;  %v3156_v5 = vld [vmem:[%s2793_s22 + $0xd8] sm:$0xff] }
  0x44   : > { %v1287_v33 = vmul.f32 %v2817_v25, %v3102_v63  ;;  %v1443_v10 = vmin.f32 %v1411_v49, 255.0  ;;  %v1058_v7 = vadd.f32 %v1026_v22, %v993_v46  ;;  %v597_v29 = vrot.slane %v514_v60, 7 }
  0x45   : > { %v1059_v23 = vadd.f32 %v1027_v28, %v994_v62  ;;  %v598_v32 = vrot.slane %v515_v6, 7  ;;  %v600_v27 = vrot.slane %v3141_v38, 7  ;;  %v601_v52 = vrot.slane %v3144_v51, 7 }
  0x46   : > { %v603_v54 = vrot.slane %v3147_v31, 7  ;;  %v1470_v59 = vpack.c.bf16 %v1443_v10, %v1442_v57  ;;  %v1123_v53 = vadd.f32 %v1091_v50, %v1058_v7  ;;  %v604_v30 = vrot.slane %v3156_v5, 7 }
  0x47   : > { %v1124_v48 = vadd.f32 %v1092_v47, %v1059_v23  ;;  %v3163_v63 = vsel %vm560_vm0, %v597_v29, %v598_v32  ;;  %v3166_v49 = vsel %vm560_vm0, %v600_v27, %v601_v52  ;;  %v3169_v28 = vsel %vm560_vm0, 0.0, %v597_v29 }
  0x48   : > { %4334 = vst [vmem:[#allocation36_spill] sm:$0xff] %v3163_v63  ;;  %v3172_v22 = vsel %vm560_vm0, 0.0, %v600_v27  ;;  %1574 = vmatmul.bf16.vlgmr.msra.gmra.mxu1 %v1470_v59  ;;  %v1188_v46 = vadd.f32 %v1156_v3, %v1123_v53  ;;  %v3175_v50 = vsel %vm560_vm0, %v603_v54, %v604_v30  ;;  %v3178_v47 = vsel %vm560_vm0, 0.0, %v603_v54 }
  0x49   : > { %4335 = vst [vmem:[#allocation37_spill] sm:$0xff] %v3166_v49  ;;  %v1189_v62 = vadd.f32 %v1157_v61, %v1124_v48  ;;  %v706_v32 = vrot.slane %v514_v60, 1  ;;  %v707_v57 = vrot.slane %v515_v6, 1  ;;  %v709_v10 = vrot.slane %v3141_v38, 1 }
  0x4a   : > { %4336 = vst [vmem:[#allocation38_spill] sm:$0xff] %v3169_v28  ;;  %v710_v7 = vrot.slane %v3144_v51, 1  ;;  %v1253_v23 = vadd.f32 %v1221_v1, %v1188_v46  ;;  %v712_v27 = vrot.slane %v3147_v31, 1  ;;  %v713_v59 = vrot.slane %v3156_v5, 1 }
  0x4b   : > { %4337 = vst [vmem:[#allocation39_spill] sm:$0xff] %v3172_v22  ;;  %v1254_v29 = vadd.f32 %v1222_v56, %v1189_v62  ;;  %v3185_v48 = vsel %vm669_vm1, %v706_v32, %v707_v57  ;;  %v3191_v54 = vsel %vm669_vm1, %v707_v57, 0.0  ;;  %v806_v52 = vmul.f32 %v2780_v11, %v3169_v28 }
  0x4c   : > { %4338 = vst [vmem:[#allocation40_spill] sm:$0xff] %v3175_v50  ;;  %v3188_v53 = vsel %vm669_vm1, %v709_v10, %v710_v7  ;;  %v3194_v30 = vsel %vm669_vm1, %v710_v7, 0.0  ;;  %v1318_v3 = vadd.f32 %v1286_v0, %v1253_v23  ;;  %v3197_v1 = vsel %vm669_vm1, %v712_v27, %v713_v59 }
  0x4d   : > { %4339 = vst [vmem:[#allocation41_spill] sm:$0xff] %v3185_v48  ;;  %v1319_v61 = vadd.f32 %v1287_v33, %v1254_v29  ;;  %v3200_v56 = vsel %vm669_vm1, %v713_v59, 0.0  ;;  %v807_v46 = vmul.f32 %v2780_v11, %v3163_v63  ;;  %v839_v62 = vmul.f32 %v2782_v12, %v3172_v22 }
  0x4e   : > { %4340 = vst [vmem:[#allocation42_spill] sm:$0xff] %v3188_v53  ;;  %v840_v32 = vmul.f32 %v2782_v12, %v3166_v49  ;;  %v1354_v0 = vadd.f32 %v2987_v8, %v1318_v3  ;;  %v904_v57 = vmul.f32 %v2784_v13, %v3178_v47  ;;  %v905_v10 = vmul.f32 %v2784_v13, %v3175_v50 }
  0x4f   : > { %4341 = vst [vmem:[#allocation43_spill] sm:$0xff] %v3191_v54  ;;  %v1355_v33 = vadd.f32 %v2987_v8, %v1319_v61  ;;  %v871_v7 = vadd.f32 %v839_v62, %v806_v52  ;;  %v969_v29 = vmul.f32 %v2786_v14, %v514_v60  ;;  %v970_v27 = vmul.f32 %v2786_v14, %v515_v6 }
  0x50   : > { %4342 = vst [vmem:[#allocation44_spill] sm:$0xff] %v3194_v30  ;;  %v872_v23 = vadd.f32 %v840_v32, %v807_v46  ;;  %v2217_v59 = vand.u32 2147483647, %v1354_v0  ;;  %v2219_v63 = vcvt.f32.s32 %v1354_v0  ;;  %v2222_v28 = vand.u32 2147483648, %v1354_v0 }
  0x51   : > { %4343 = vst [vmem:[#allocation45_spill] sm:$0xff] %v3197_v1  ;;  %v2225_v49 = vand.u32 2147483647, %v1355_v33  ;;  %v2227_v22 = vcvt.f32.s32 %v1355_v33  ;;  %v2230_v3 = vand.u32 2147483648, %v1355_v33  ;;  %v936_v2 = vadd.f32 %v904_v57, %v871_v7 }
  0x52   : > { %v937_v61 = vadd.f32 %v905_v10, %v872_v23  ;;  %vm3218_vm6 = vcmp.lt.f32.partialorder %v2217_v59, 8388608.0  ;;  %v2220_v50 = vcvt.s32.f32 %v2219_v63  ;;  %v1034_v60 = vmul.f32 %v2795_v15, %v3141_v38 }
  0x53   : > { %vm3222_vm7 = vcmp.lt.f32.partialorder %v2225_v49, 8388608.0  ;;  %v2228_v6 = vcvt.s32.f32 %v2227_v22  ;;  %v1001_v46 = vadd.f32 %v969_v29, %v936_v2  ;;  %v1035_v32 = vmul.f32 %v2795_v15, %v3144_v51  ;;  %v3239_v22 = vld [vmem:[%s2793_s22 + $0x20] sm:$0xff]  ;;  %v3242_v29 = vld [vmem:[%s2793_s22 + $0x28] sm:$0xff] }
  0x54   : > { %v1002_v62 = vadd.f32 %v970_v27, %v937_v61  ;;  %v2221_v57 = vand.u32 2147483647, %v2220_v50  ;;  %v1099_v10 = vmul.f32 %v2797_v16, %v3147_v31  ;;  %v1100_v63 = vmul.f32 %v2797_v16, %v3156_v5 }
  0x55   : > { %v1164_v49 = vmul.f32 %v2799_v17, %v3185_v48  ;;  %v2229_v7 = vand.u32 2147483647, %v2228_v6  ;;  %v1066_v23 = vadd.f32 %v1034_v60, %v1001_v46  ;;  %v1165_v2 = vmul.f32 %v2799_v17, %v3191_v54 }
  0x56   : > { %v1067_v59 = vadd.f32 %v1035_v32, %v1002_v62  ;;  %v2223_v50 = vor.u32 %v2222_v28, %v2221_v57  ;;  %v1229_v27 = vmul.f32 %v2801_v18, %v3188_v53  ;;  %v1230_v61 = vmul.f32 %v2801_v18, %v3194_v30 }
  0x57   : > { %v1294_v48 = vmul.f32 %v2817_v25, %v3197_v1  ;;  %v2231_v6 = vor.u32 %v2230_v3, %v2229_v7  ;;  %v1131_v60 = vadd.f32 %v1099_v10, %v1066_v23  ;;  %v1295_v62 = vmul.f32 %v2817_v25, %v3200_v56 }
  0x58   : > { %v1132_v46 = vadd.f32 %v1100_v63, %v1067_v59  ;;  %v2224_v32 = vsel %vm3218_vm6, %v2223_v50, %v1354_v0  ;;  %v570_v28 = vrot.slane %v3239_v22, 7  ;;  %v571_v57 = vrot.slane %v3242_v29, 7 }
  0x59   : > { %v679_v54 = vrot.slane %v3239_v22, 1  ;;  %v2232_v30 = vsel %vm3222_vm7, %v2231_v6, %v1355_v33  ;;  %v1418_v53 = vmax.f32 %v2224_v32, 0.0  ;;  %v1196_v1 = vadd.f32 %v1164_v49, %v1131_v60 }
  0x5a   : > { %v1197_v3 = vadd.f32 %v1165_v2, %v1132_v46  ;;  %v1419_v10 = vmax.f32 %v2232_v30, 0.0  ;;  %v3260_v63 = vsel %vm560_vm0, %v570_v28, %v571_v57  ;;  %v3263_v7 = vsel %vm560_vm0, 0.0, %v570_v28 }
  0x5b   : > { %4348 = vst [vmem:[#allocation46_spill] sm:$0xff] %v3260_v63  ;;  %v680_v58 = vrot.slane %v3242_v29, 1  ;;  %v1450_v0 = vmin.f32 %v1418_v53, 255.0  ;;  %v1261_v23 = vadd.f32 %v1229_v27, %v1196_v1  ;;  %v784_v50 = vmul.f32 %v2780_v11, %v2834_v36 }
  0x5c   : > { %4349 = vst [vmem:[#allocation47_spill] sm:$0xff] %v3263_v7  ;;  %v1262_v59 = vadd.f32 %v1230_v61, %v1197_v3  ;;  %v1451_v52 = vmin.f32 %v1419_v10, 255.0  ;;  %v785_v49 = vmul.f32 %v2780_v11, %v2831_v35  ;;  %v817_v53 = vmul.f32 %v2782_v12, %v2837_v37 }
  0x5d   : > { %v3269_v33 = vsel %vm669_vm1, %v679_v54, %v680_v58  ;;  %v3272_v30 = vsel %vm669_vm1, %v680_v58, 0.0  ;;  %v1326_v2 = vadd.f32 %v1294_v48, %v1261_v23  ;;  %v818_v1 = vmul.f32 %v2782_v12, %v2845_v40 }
  0x5e   : > { %v1327_v6 = vadd.f32 %v1295_v62, %v1262_v59  ;;  %v1474_v27 = vpack.c.bf16 %v1451_v52, %v1450_v0  ;;  %v882_v36 = vmul.f32 %v2784_v13, %v3263_v7  ;;  %v883_v54 = vmul.f32 %v2784_v13, %v3260_v63 }
  0x5f   : > { %v947_v61 = vmul.f32 %v2786_v14, %v2804_v19  ;;  %v1362_v35 = vadd.f32 %v2987_v8, %v1326_v2  ;;  %v849_v60 = vadd.f32 %v817_v53, %v784_v50  ;;  %v850_v46 = vadd.f32 %v818_v1, %v785_v49  ;;  %v3309_v1 = vld [vmem:[%s2793_s22 + $0x60] sm:$0xff] }
  0x60   : > { %v1363_v48 = vadd.f32 %v2987_v8, %v1327_v6  ;;  %1594 = vmatmul.bf16.vlgmr.msra.gmra.mxu2 %v1474_v27  ;;  %v948_v62 = vmul.f32 %v2786_v14, %v2807_v20  ;;  %v1012_v32 = vmul.f32 %v2795_v15, %v2810_v21  ;;  %v1013_v28 = vmul.f32 %v2795_v15, %v2820_v26  ;;  %v3312_v27 = vld [vmem:[%s2793_s22 + $0x68] sm:$0xff] }
  0x61   : > { %v1077_v57 = vmul.f32 %v2797_v16, %v3239_v22  ;;  %v2281_v19 = vand.u32 2147483647, %v1362_v35  ;;  %v2283_v3 = vcvt.f32.s32 %v1362_v35  ;;  %v2286_v10 = vand.u32 2147483648, %v1362_v35  ;;  %4354 = vst [vmem:[#allocation48_spill] sm:$0xff] %v3309_v1 }
  0x62   : > { %v2289_v58 = vand.u32 2147483647, %v1363_v48  ;;  %v2291_v0 = vcvt.f32.s32 %v1363_v48  ;;  %v2294_v23 = vand.u32 2147483648, %v1363_v48  ;;  %v914_v59 = vadd.f32 %v882_v36, %v849_v60  ;;  %4355 = vst [vmem:[#allocation49_spill] sm:$0xff] %v3312_v27 }
  0x63   : > { %v915_v50 = vadd.f32 %v883_v54, %v850_v46  ;;  %vm3296_vm8 = vcmp.lt.f32.partialorder %v2281_v19, 8388608.0  ;;  %v2284_v21 = vcvt.s32.f32 %v2283_v3  ;;  %v1078_v52 = vmul.f32 %v2797_v16, %v3242_v29 }
  0x64   : > { %vm3300_vm9 = vcmp.lt.f32.partialorder %v2289_v58, 8388608.0  ;;  %v2292_v49 = vcvt.s32.f32 %v2291_v0  ;;  %v979_v2 = vadd.f32 %v947_v61, %v914_v59  ;;  %v1142_v53 = vmul.f32 %v2799_v17, %v2848_v41 }
  0x65   : > { %v980_v6 = vadd.f32 %v948_v62, %v915_v50  ;;  %v2285_v36 = vand.u32 2147483647, %v2284_v21  ;;  %v1143_v54 = vmul.f32 %v2799_v17, %v2854_v43  ;;  %v1207_v60 = vmul.f32 %v2801_v18, %v2851_v42 }
  0x66   : > { %v1208_v46 = vmul.f32 %v2801_v18, %v2857_v44  ;;  %v2293_v19 = vand.u32 2147483647, %v2292_v49  ;;  %v1044_v61 = vadd.f32 %v1012_v32, %v979_v2  ;;  %v1272_v41 = vmul.f32 %v2817_v25, %v3269_v33 }
  0x67   : > { %v1045_v62 = vadd.f32 %v1013_v28, %v980_v6  ;;  %v2287_v3 = vor.u32 %v2286_v10, %v2285_v36  ;;  %v1273_v58 = vmul.f32 %v2817_v25, %v3272_v30  ;;  %v582_v0 = vrot.slane %v3309_v1, 7 }
  0x68   : > { %v583_v43 = vrot.slane %v3312_v27, 7  ;;  %v2295_v59 = vor.u32 %v2294_v23, %v2293_v19  ;;  %v1109_v50 = vadd.f32 %v1077_v57, %v1044_v61  ;;  %v691_v42 = vrot.slane %v3309_v1, 1 }
  0x69   : > { %v1110_v21 = vadd.f32 %v1078_v52, %v1045_v62  ;;  %v2288_v32 = vsel %vm3296_vm8, %v2287_v3, %v1362_v35  ;;  %v3333_v10 = vsel %vm560_vm0, 0.0, %v582_v0  ;;  %v692_v49 = vrot.slane %v3312_v27, 1 }
  0x6a   : > { %v3330_v28 = vsel %vm560_vm0, %v582_v0, %v583_v43  ;;  %v2296_v2 = vsel %vm3300_vm9, %v2295_v59, %v1363_v48  ;;  %v1426_v6 = vmax.f32 %v2288_v32, 0.0  ;;  %v1174_v23 = vadd.f32 %v1142_v53, %v1109_v50  ;;  %v4358_v32 = vld [vmem:[#allocation8_spill] sm:$0xff] }
  0x6b   : > { %4356 = vst [vmem:[#allocation50_spill] sm:$0xff] %v3330_v28  ;;  %v1175_v57 = vadd.f32 %v1143_v54, %v1110_v21  ;;  %v1427_v52 = vmax.f32 %v2296_v2, 0.0  ;;  %v3339_v36 = vsel %vm669_vm1, %v691_v42, %v692_v49  ;;  %v3342_v35 = vsel %vm669_vm1, %v692_v49, 0.0 }
  0x6c   : > { %v792_v20 = vmul.f32 %v2780_v11, %v2932_v24  ;;  %v1458_v19 = vmin.f32 %v1426_v6, 255.0  ;;  %v1239_v61 = vadd.f32 %v1207_v60, %v1174_v23  ;;  %v793_v26 = vmul.f32 %v2780_v11, %v2926_v34  ;;  %v4357_v60 = vld [vmem:[#allocation7_spill] sm:$0xff]  ;;  %v4359_v23 = vld [vmem:[#allocation9_spill] sm:$0xff] }
  0x6d   : > { %v1240_v62 = vadd.f32 %v1208_v46, %v1175_v57  ;;  %v1459_v48 = vmin.f32 %v1427_v52, 255.0  ;;  %v825_v53 = vmul.f32 %v2782_v12, %v2935_v45  ;;  %v826_v42 = vmul.f32 %v2782_v12, %v2929_v39  ;;  %v4366_v34 = vld [vmem:[#allocation19_spill] sm:$0xff] }
  0x6e   : > { %v890_v54 = vmul.f32 %v2784_v13, %v3333_v10  ;;  %v1304_v3 = vadd.f32 %v1272_v41, %v1239_v61  ;;  %v891_v43 = vmul.f32 %v2784_v13, %v3330_v28  ;;  %v955_v46 = vmul.f32 %v2786_v14, %v4357_v60 }
  0x6f   : > { %v1305_v0 = vadd.f32 %v1273_v58, %v1240_v62  ;;  %v1478_v59 = vpack.c.bf16 %v1459_v48, %v1458_v19  ;;  %v857_v50 = vadd.f32 %v825_v53, %v792_v20  ;;  %v858_v21 = vadd.f32 %v826_v42, %v793_v26  ;;  %v4360_v58 = vld [vmem:[#allocation10_spill] sm:$0xff] }
  0x70   : > { %v956_v49 = vmul.f32 %v2786_v14, %v4358_v32  ;;  %v1340_v2 = vadd.f32 %v2987_v8, %v1304_v3  ;;  %v1020_v41 = vmul.f32 %v2795_v15, %v4359_v23  ;;  %v1021_v57 = vmul.f32 %v2795_v15, %v4360_v58 }
  0x71   : > { %v1341_v6 = vadd.f32 %v2987_v8, %v1305_v0  ;;  %1614 = vmatmul.bf16.vlgmr.msra.gmra.mxu3 %v1478_v59  ;;  %v922_v52 = vadd.f32 %v890_v54, %v857_v50  ;;  %v923_v61 = vadd.f32 %v891_v43, %v858_v21  ;;  %v1085_v20 = vmul.f32 %v2797_v16, %v3309_v1  ;;  %v4365_v50 = vld [vmem:[#allocation17_spill] sm:$0xff] }
  0x72   : > { %v1086_v19 = vmul.f32 %v2797_v16, %v3312_v27  ;;  %v2105_v62 = vand.u32 2147483647, %v1340_v2  ;;  %v2107_v26 = vcvt.f32.s32 %v1340_v2  ;;  %v2110_v48 = vand.u32 2147483648, %v1340_v2 }
  0x73   : > { %v2113_v53 = vand.u32 2147483647, %v1341_v6  ;;  %v2115_v42 = vcvt.f32.s32 %v1341_v6  ;;  %v2118_v3 = vand.u32 2147483648, %v1341_v6  ;;  %v987_v0 = vadd.f32 %v955_v46, %v922_v52  ;;  %v3383_v46 = vld [vmem:[%s2793_s22 + $0xa0] sm:$0xff] }
  0x74   : > { %v988_v60 = vadd.f32 %v956_v49, %v923_v61  ;;  %vm3370_vm10 = vcmp.lt.f32.partialorder %v2105_v62, 8388608.0  ;;  %v2108_v54 = vcvt.s32.f32 %v2107_v26  ;;  %v1150_v21 = vmul.f32 %v2799_v17, %v4365_v50  ;;  %4367 = vst [vmem:[#allocation7_spill] sm:$0xff] %v3383_v46  ;;  %v3386_v49 = vld [vmem:[%s2793_s22 + $0xa8] sm:$0xff]  ;;  %v4369_v61 = vld [vmem:[#allocation18_spill] sm:$0xff]  ;;  %v4370_v26 = vld [vmem:[#allocation20_spill] sm:$0xff] }
  0x75   : > { %vm3374_vm11 = vcmp.lt.f32.partialorder %v2113_v53, 8388608.0  ;;  %v2116_v32 = vcvt.s32.f32 %v2115_v42  ;;  %v1052_v23 = vadd.f32 %v1020_v41, %v987_v0  ;;  %v1151_v24 = vmul.f32 %v2799_v17, %v4366_v34  ;;  %4368 = vst [vmem:[#allocation8_spill] sm:$0xff] %v3386_v49 }
  0x76   : > { %v1053_v58 = vadd.f32 %v1021_v57, %v988_v60  ;;  %v2109_v52 = vand.u32 2147483647, %v2108_v54  ;;  %v1215_v62 = vmul.f32 %v2801_v18, %v4369_v61  ;;  %v1216_v53 = vmul.f32 %v2801_v18, %v4370_v26 }
  0x77   : > { %v1280_v50 = vmul.f32 %v2817_v25, %v3339_v36  ;;  %v2117_v42 = vand.u32 2147483647, %v2116_v32  ;;  %v1117_v41 = vadd.f32 %v1085_v20, %v1052_v23  ;;  %v1281_v0 = vmul.f32 %v2817_v25, %v3342_v35 }
  0x78   : > { %v1118_v57 = vadd.f32 %v1086_v19, %v1053_v58  ;;  %v2111_v60 = vor.u32 %v2110_v48, %v2109_v52  ;;  %v594_v34 = vrot.slane %v3383_v46, 7  ;;  %v595_v54 = vrot.slane %v3386_v49, 7 }
  0x79   : > { %v703_v27 = vrot.slane %v3383_v46, 1  ;;  %v2119_v61 = vor.u32 %v2118_v3, %v2117_v42  ;;  %v1182_v1 = vadd.f32 %v1150_v21, %v1117_v41  ;;  %v704_v26 = vrot.slane %v3386_v49, 1 }
  0x7a   : > { %v1183_v28 = vadd.f32 %v1151_v24, %v1118_v57  ;;  %v2112_v32 = vsel %vm3370_vm10, %v2111_v60, %v1340_v2  ;;  %v3403_v20 = vsel %vm560_vm0, %v594_v34, %v595_v54  ;;  %v3406_v19 = vsel %vm560_vm0, 0.0, %v594_v34  ;;  %v4377_v54 = vld [vmem:[#allocation22_spill] sm:$0xff] }
  0x7b   : > { %4371 = vst [vmem:[#allocation9_spill] sm:$0xff] %v3403_v20  ;;  %v800_v48 = vmul.f32 %v2780_v11, %v3058_v55  ;;  %v2120_v23 = vsel %vm3374_vm11, %v2119_v61, %v1341_v6  ;;  %v1404_v3 = vmax.f32 %v2112_v32, 0.0  ;;  %v1247_v21 = vadd.f32 %v1215_v62, %v1182_v1  ;;  %v4375_v61 = vld [vmem:[#allocation29_spill] sm:$0xff]  ;;  %v3455_v55 = vld [vmem:[%s2793_s22 + $0xe0] sm:$0xff] }
  0x7c   : > { %4372 = vst [vmem:[#allocation10_spill] sm:$0xff] %v3406_v19  ;;  %v1248_v24 = vadd.f32 %v1216_v53, %v1183_v28  ;;  %v1405_v58 = vmax.f32 %v2120_v23, 0.0  ;;  %v3413_v52 = vsel %vm669_vm1, %v703_v27, %v704_v26  ;;  %v3416_v2 = vsel %vm669_vm1, %v704_v26, 0.0  ;;  %v4378_v23 = vld [vmem:[#allocation23_spill] sm:$0xff] }
  0x7d   : > { %4373 = vst [vmem:[#allocation51_spill] sm:$0xff] %v3413_v52  ;;  %v801_v34 = vmul.f32 %v2780_v11, %v3048_v9  ;;  %v1436_v59 = vmin.f32 %v1404_v3, 255.0  ;;  %v1312_v42 = vadd.f32 %v1280_v50, %v1247_v21  ;;  %v833_v43 = vmul.f32 %v2782_v12, %v3066_v4  ;;  %v4376_v50 = vld [vmem:[#allocation21_spill] sm:$0xff] }
  0x7e   : > { %4374 = vst [vmem:[#allocation52_spill] sm:$0xff] %v3416_v2  ;;  %v1313_v41 = vadd.f32 %v1281_v0, %v1248_v24  ;;  %v1437_v6 = vmin.f32 %v1405_v58, 255.0  ;;  %v834_v1 = vmul.f32 %v2782_v12, %v4375_v61  ;;  %v898_v27 = vmul.f32 %v2784_v13, %v3406_v19 }
  0x7f   : > { %v899_v28 = vmul.f32 %v2784_v13, %v3403_v20  ;;  %v1348_v62 = vadd.f32 %v2987_v8, %v1312_v42  ;;  %v865_v53 = vadd.f32 %v833_v43, %v800_v48  ;;  %v963_v57 = vmul.f32 %v2786_v14, %v4376_v50 }
  0x80   : > { %v1349_v26 = vadd.f32 %v2987_v8, %v1313_v41  ;;  %v1467_v0 = vpack.c.bf16 %v1437_v6, %v1436_v59  ;;  %v866_v60 = vadd.f32 %v834_v1, %v801_v34  ;;  %v964_v32 = vmul.f32 %v2786_v14, %v4377_v54  ;;  %v4383_v6 = vld [vmem:[#allocation24_spill] sm:$0xff]  ;;  %v4389_v59 = vld [vmem:[#allocation37_spill] sm:$0xff] }
  0x81   : > { %v1028_v3 = vmul.f32 %v2795_v15, %v4378_v23  ;;  %v2169_v21 = vand.u32 2147483647, %v1348_v62  ;;  %v2171_v24 = vcvt.f32.s32 %v1348_v62  ;;  %v2174_v58 = vand.u32 2147483648, %v1348_v62 }
  0x82   : > { %v2177_v9 = vand.u32 2147483647, %v1349_v26  ;;  %1559 = vmatmul.bf16.gmra.mxu0 %v1467_v0  ;;  %v2179_v42 = vcvt.f32.s32 %v1349_v26  ;;  %v2182_v41 = vand.u32 2147483648, %v1349_v26  ;;  %v930_v48 = vadd.f32 %v898_v27, %v865_v53 }
  0x83   : > { %v931_v43 = vadd.f32 %v899_v28, %v866_v60  ;;  %vm3436_vm12 = vcmp.lt.f32.partialorder %v2169_v21, 8388608.0  ;;  %v2172_v34 = vcvt.s32.f32 %v2171_v24  ;;  %v1029_v1 = vmul.f32 %v2795_v15, %v4383_v6  ;;  %v4384_v60 = vld [vmem:[#allocation31_spill] sm:$0xff] }
  0x84   : > { %vm3440_vm13 = vcmp.lt.f32.partialorder %v2177_v9, 8388608.0  ;;  %v2180_v54 = vcvt.s32.f32 %v2179_v42  ;;  %v995_v0 = vadd.f32 %v963_v57, %v930_v48  ;;  %v1093_v27 = vmul.f32 %v2797_v16, %v3383_v46  ;;  %v4385_v9 = vld [vmem:[#allocation34_spill] sm:$0xff]  ;;  %v4386_v57 = vld [vmem:[#allocation32_spill] sm:$0xff]  ;;  %v3460_v48 = vld [vmem:[%s2793_s22 + $0xe8] sm:$0xff] }
  0x85   : > { %v996_v23 = vadd.f32 %v964_v32, %v931_v43  ;;  %v2173_v28 = vand.u32 2147483647, %v2172_v34  ;;  %v1094_v53 = vmul.f32 %v2797_v16, %v3386_v49  ;;  %v1158_v21 = vmul.f32 %v2799_v17, %v4384_v60  ;;  %v4387_v34 = vld [vmem:[#allocation35_spill] sm:$0xff] }
  0x86   : > { %v1159_v24 = vmul.f32 %v2799_v17, %v4385_v9  ;;  %v2181_v20 = vand.u32 2147483647, %v2180_v54  ;;  %v1060_v6 = vadd.f32 %v1028_v3, %v995_v0  ;;  %v1223_v32 = vmul.f32 %v2801_v18, %v4386_v57 }
  0x87   : > { %v1061_v42 = vadd.f32 %v1029_v1, %v996_v23  ;;  %v2175_v43 = vor.u32 %v2174_v58, %v2173_v28  ;;  %v1224_v49 = vmul.f32 %v2801_v18, %v4387_v34  ;;  %v1288_v60 = vmul.f32 %v2817_v25, %v3413_v52 }
  0x88   : > { %v1289_v9 = vmul.f32 %v2817_v25, %v3416_v2  ;;  %v2183_v46 = vor.u32 %v2182_v41, %v2181_v20  ;;  %v1125_v19 = vadd.f32 %v1093_v27, %v1060_v6  ;;  %v606_v3 = vrot.slane %v3455_v55, 7 }
  0x89   : > { %v1126_v54 = vadd.f32 %v1094_v53, %v1061_v42  ;;  %v2176_v1 = vsel %vm3436_vm12, %v2175_v43, %v1348_v62  ;;  %v607_v0 = vrot.slane %v3460_v48, 7  ;;  %v715_v58 = vrot.slane %v3455_v55, 1 }
  0x8a   : > { %v716_v23 = vrot.slane %v3460_v48, 1  ;;  %v2184_v28 = vsel %vm3440_vm13, %v2183_v46, %v1349_v26  ;;  %v1412_v52 = vmax.f32 %v2176_v1, 0.0  ;;  %v1190_v34 = vadd.f32 %v1158_v21, %v1125_v19  ;;  %v4388_v26 = vld [vmem:[#allocation39_spill] sm:$0xff] }
  0x8b   : > { %v1191_v2 = vadd.f32 %v1159_v24, %v1126_v54  ;;  %v1413_v20 = vmax.f32 %v2184_v28, 0.0  ;;  %v3477_v41 = vsel %vm560_vm0, %v606_v3, %v607_v0  ;;  %v3480_v27 = vsel %vm560_vm0, 0.0, %v606_v3  ;;  %v4390_v3 = vld [vmem:[#allocation40_spill] sm:$0xff] }
  0x8c   : > { %v3483_v62 = vsel %vm669_vm1, %v715_v58, %v716_v23  ;;  %v1444_v50 = vmin.f32 %v1412_v52, 255.0  ;;  %v1255_v53 = vadd.f32 %v1223_v32, %v1190_v34  ;;  %v3486_v42 = vsel %vm669_vm1, %v716_v23, 0.0 }
  0x8d   : > { %v1256_v6 = vadd.f32 %v1224_v49, %v1191_v2  ;;  %v1445_v46 = vmin.f32 %v1413_v20, 255.0  ;;  %v808_v19 = vmul.f32 %v2780_v11, %v4388_v26  ;;  %v809_v21 = vmul.f32 %v2780_v11, %v4389_v59 }
  0x8e   : > { %v841_v24 = vmul.f32 %v2782_v12, %v3178_v47  ;;  %v1320_v43 = vadd.f32 %v1288_v60, %v1255_v53  ;;  %v842_v52 = vmul.f32 %v2782_v12, %v4390_v3  ;;  %v906_v49 = vmul.f32 %v2784_v13, %v3480_v27 }
  0x8f   : > { %v1321_v54 = vadd.f32 %v1289_v9, %v1256_v6  ;;  %v1471_v2 = vpack.c.bf16 %v1445_v46, %v1444_v50  ;;  %v907_v34 = vmul.f32 %v2784_v13, %v3477_v41  ;;  %v971_v1 = vmul.f32 %v2786_v14, %v3141_v38 }
  0x90   : > { %v873_v32 = vadd.f32 %v841_v24, %v808_v19  ;;  %v1356_v0 = vadd.f32 %v2987_v8, %v1320_v43  ;;  %v874_v60 = vadd.f32 %v842_v52, %v809_v21  ;;  %v972_v9 = vmul.f32 %v2786_v14, %v3144_v51 }
  0x91   : > { %v1357_v58 = vadd.f32 %v2987_v8, %v1321_v54  ;;  %1579 = vmatmul.bf16.gmra.mxu1 %v1471_v2  ;;  %v1036_v28 = vmul.f32 %v2795_v15, %v3147_v31  ;;  %v1037_v20 = vmul.f32 %v2795_v15, %v3156_v5  ;;  %v1101_v50 = vmul.f32 %v2797_v16, %v3455_v55  ;;  %v4395_v2 = vld [vmem:[#allocation42_spill] sm:$0xff] }
  0x92   : > { %v938_v23 = vadd.f32 %v906_v49, %v873_v32  ;;  %v2233_v38 = vand.u32 2147483647, %v1356_v0  ;;  %v2235_v53 = vcvt.f32.s32 %v1356_v0  ;;  %v2238_v6 = vand.u32 2147483648, %v1356_v0 }
  0x93   : > { %v2241_v46 = vand.u32 2147483647, %v1357_v58  ;;  %v2243_v8 = vcvt.f32.s32 %v1357_v58  ;;  %v2246_v19 = vand.u32 2147483648, %v1357_v58  ;;  %v939_v21 = vadd.f32 %v907_v34, %v874_v60 }
  0x94   : > { %v1003_v24 = vadd.f32 %v971_v1, %v938_v23  ;;  %vm3512_vm14 = vcmp.lt.f32.partialorder %v2233_v38, 8388608.0  ;;  %v2236_v43 = vcvt.s32.f32 %v2235_v53  ;;  %v1102_v5 = vmul.f32 %v2797_v16, %v3460_v48  ;;  %v4396_v1 = vld [vmem:[#allocation44_spill] sm:$0xff]  ;;  %v4397_v23 = vld [vmem:[#allocation45_spill] sm:$0xff] }
  0x95   : > { %vm3516_vm15 = vcmp.lt.f32.partialorder %v2241_v46, 8388608.0  ;;  %v2244_v54 = vcvt.s32.f32 %v2243_v8  ;;  %v1004_v52 = vadd.f32 %v972_v9, %v939_v21  ;;  %v1166_v32 = vmul.f32 %v2799_v17, %v4395_v2 }
  0x96   : > { %v1068_v49 = vadd.f32 %v1036_v28, %v1003_v24  ;;  %v2237_v34 = vand.u32 2147483647, %v2236_v43  ;;  %v1167_v60 = vmul.f32 %v2799_v17, %v4396_v1  ;;  %v1231_v38 = vmul.f32 %v2801_v18, %v4397_v23 }
  0x97   : > { %v1232_v53 = vmul.f32 %v2801_v18, %v3200_v56  ;;  %v2245_v46 = vand.u32 2147483647, %v2244_v54  ;;  %v1069_v59 = vadd.f32 %v1037_v20, %v1004_v52  ;;  %v1296_v9 = vmul.f32 %v2817_v25, %v3483_v62  ;;  %v4398_v54 = vld [vmem:[#allocation12_spill] sm:$0xff]  ;;  %v4399_v52 = vld [vmem:[#allocation11_spill] sm:$0xff] }
  0x98   : > { %v1133_v26 = vadd.f32 %v1101_v50, %v1068_v49  ;;  %v2239_v28 = vor.u32 %v2238_v6, %v2237_v34  ;;  %v1297_v8 = vmul.f32 %v2817_v25, %v3486_v42  ;;  %v786_v21 = vmul.f32 %v2780_v11, %v2837_v37 }
  0x99   : > { %v787_v24 = vmul.f32 %v2780_v11, %v2845_v40  ;;  %v2247_v43 = vor.u32 %v2246_v19, %v2245_v46  ;;  %v1134_v1 = vadd.f32 %v1102_v5, %v1069_v59  ;;  %v819_v20 = vmul.f32 %v2782_v12, %v3263_v7 }
  0x9a   : > { %v1198_v2 = vadd.f32 %v1166_v32, %v1133_v26  ;;  %v2240_v50 = vsel %vm3512_vm14, %v2239_v28, %v1356_v0  ;;  %v820_v6 = vmul.f32 %v2782_v12, %v3260_v63  ;;  %v884_v37 = vmul.f32 %v2784_v13, %v4398_v54  ;;  %v2629_v0 = vld [vmem:[%s2793_s22 + $0x10] sm:$0xff]  ;;  %v2630_v54 = vld [vmem:[%s2793_s22 + $0x18] sm:$0xff] }
  0x9b   : > { %v885_v40 = vmul.f32 %v2784_v13, %v4399_v52  ;;  %v2248_v59 = vsel %vm3516_vm15, %v2247_v43, %v1357_v58  ;;  %v1420_v26 = vmax.f32 %v2240_v50, 0.0  ;;  %v1199_v19 = vadd.f32 %v1167_v60, %v1134_v1  ;;  %v3559_v60 = vld [vmem:[%s4194_s4] ss:$0 sm:$0xff] }
  0x9c   : > { %v1263_v5 = vadd.f32 %v1231_v38, %v1198_v2  ;;  %v1421_v49 = vmax.f32 %v2248_v59, 0.0  ;;  %v851_v32 = vadd.f32 %v819_v20, %v786_v21  ;;  %v852_v51 = vadd.f32 %v820_v6, %v787_v24 }
  0x9d   : > { %v949_v34 = vmul.f32 %v2629_v0, %v2786_v14  ;;  %v1452_v46 = vmin.f32 %v1420_v26, 255.0  ;;  %v1264_v28 = vadd.f32 %v1232_v53, %v1199_v19  ;;  %v950_v52 = vmul.f32 %v2630_v54, %v2786_v14 }
  0x9e   : > { %v1328_v63 = vadd.f32 %v1296_v9, %v1263_v5  ;;  %v1453_v7 = vmin.f32 %v1421_v49, 255.0  ;;  %v916_v31 = vadd.f32 %v884_v37, %v851_v32  ;;  %v917_v58 = vadd.f32 %v885_v40, %v852_v51  ;;  %v3565_v9 = vld [vmem:[%s2793_s22 + $0x30] sm:$0xff]  ;;  %v4400_v40 = vld [vmem:[#allocation6_spill] sm:$0xff] }
  0x9f   : > { %v1014_v2 = vmul.f32 %v2795_v15, %v3239_v22  ;;  %v1329_v1 = vadd.f32 %v1297_v8, %v1264_v28  ;;  %v1015_v53 = vmul.f32 %v2795_v15, %v3242_v29  ;;  %v1079_v21 = vmul.f32 %v3565_v9, %v2797_v16  ;;  %v3570_v22 = vld [vmem:[%s2793_s22 + $0x38] sm:$0xff] }
  0xa0   : > { %v1364_v38 = vadd.f32 %v3559_v60, %v1328_v63  ;;  %v1475_v24 = vpack.c.bf16 %v1453_v7, %v1452_v46  ;;  %v981_v43 = vadd.f32 %v949_v34, %v916_v31  ;;  %v982_v20 = vadd.f32 %v950_v52, %v917_v58  ;;  %v2635_v52 = vld [vmem:[%s2793_s22 + $0x58] sm:$0xff] }
  0xa1   : > { %v1080_v8 = vmul.f32 %v3570_v22, %v2797_v16  ;;  %v1365_v50 = vadd.f32 %v3559_v60, %v1329_v1  ;;  %v1144_v59 = vmul.f32 %v2799_v17, %v4400_v40  ;;  %v1145_v7 = vmul.f32 %v2799_v17, %v2857_v44  ;;  %v4411_v46 = vld [vmem:[#allocation49_spill] sm:$0xff] }
  0xa2   : > { %v2297_v6 = vand.u32 2147483647, %v1364_v38  ;;  %v2299_v63 = vcvt.f32.s32 %v1364_v38  ;;  %v2302_v54 = vand.u32 2147483648, %v1364_v38  ;;  %1599 = vmatmul.bf16.gmra.mxu2 %v1475_v24  ;;  %v1046_v29 = vadd.f32 %v1014_v2, %v981_v43  ;;  %v4405_v2 = vld [vmem:[#allocation15_spill] sm:$0xff] }
  0xa3   : > { %v1047_v37 = vadd.f32 %v1015_v53, %v982_v20  ;;  %v2305_v19 = vand.u32 2147483647, %v1365_v50  ;;  %v2307_v5 = vcvt.f32.s32 %v1365_v50  ;;  %v2310_v49 = vand.u32 2147483648, %v1365_v50  ;;  %v4406_v53 = vld [vmem:[#allocation16_spill] sm:$0xff] }
  0xa4   : > { %vm3579_vm2 = vcmp.lt.f32.partialorder %v2297_v6, 8388608.0  ;;  %v2300_v26 = vcvt.s32.f32 %v2299_v63  ;;  %v1111_v32 = vadd.f32 %v1079_v21, %v1046_v29  ;;  %v1209_v0 = vmul.f32 %v2801_v18, %v3269_v33 }
  0xa5   : > { %v1112_v51 = vadd.f32 %v1080_v8, %v1047_v37  ;;  %vm3585_vm3 = vcmp.lt.f32.partialorder %v2305_v19, 8388608.0  ;;  %v2308_v28 = vcvt.s32.f32 %v2307_v5  ;;  %v1210_v44 = vmul.f32 %v2801_v18, %v3272_v30  ;;  %v4407_v37 = vld [vmem:[#allocation50_spill] sm:$0xff] }
  0xa6   : > { %v2301_v34 = vand.u32 2147483647, %v2300_v26  ;;  %v1176_v31 = vadd.f32 %v1144_v59, %v1111_v32  ;;  %v1274_v1 = vmul.f32 %v2817_v25, %v4405_v2  ;;  %v1275_v21 = vmul.f32 %v2817_v25, %v4406_v53  ;;  %v4409_v26 = vld [vmem:[#allocation25_spill] sm:$0xff] }
  0xa7   : > { %v1177_v58 = vadd.f32 %v1145_v7, %v1112_v51  ;;  %v2309_v43 = vand.u32 2147483647, %v2308_v28  ;;  %v794_v20 = vmul.f32 %v2780_v11, %v2935_v45  ;;  %v795_v8 = vmul.f32 %v2780_v11, %v2929_v39  ;;  %v4408_v7 = vld [vmem:[#allocation27_spill] sm:$0xff]  ;;  %v2634_v28 = vld [vmem:[%s2793_s22 + $0x50] sm:$0xff] }
  0xa8   : > { %v2303_v24 = vor.u32 %v2302_v54, %v2301_v34  ;;  %v1241_v6 = vadd.f32 %v1209_v0, %v1176_v31  ;;  %v827_v29 = vmul.f32 %v2782_v12, %v3333_v10  ;;  %v828_v40 = vmul.f32 %v2782_v12, %v4407_v37 }
  0xa9   : > { %v1242_v63 = vadd.f32 %v1210_v44, %v1177_v58  ;;  %v2311_v59 = vor.u32 %v2310_v49, %v2309_v43  ;;  %v892_v45 = vmul.f32 %v2784_v13, %v4408_v7  ;;  %v893_v19 = vmul.f32 %v2784_v13, %v4409_v26 }
  0xaa   : > { %v2304_v54 = vsel %vm3579_vm2, %v2303_v24, %v1364_v38  ;;  %v1306_v5 = vadd.f32 %v1274_v1, %v1241_v6  ;;  %v859_v51 = vadd.f32 %v827_v29, %v794_v20  ;;  %v860_v34 = vadd.f32 %v828_v40, %v795_v8 }
  0xab   : > { %v1428_v39 = vmax.f32 %v2304_v54, 0.0  ;;  %v1307_v32 = vadd.f32 %v1275_v21, %v1242_v63  ;;  %v2312_v0 = vsel %vm3585_vm3, %v2311_v59, %v1365_v50  ;;  %v957_v44 = vmul.f32 %v2634_v28, %v2786_v14  ;;  %v4410_v21 = vld [vmem:[#allocation48_spill] sm:$0xff] }
  0xac   : > { %v958_v38 = vmul.f32 %v2635_v52, %v2786_v14  ;;  %v1429_v49 = vmax.f32 %v2312_v0, 0.0  ;;  %v1342_v58 = vadd.f32 %v3559_v60, %v1306_v5  ;;  %v924_v43 = vadd.f32 %v892_v45, %v859_v51  ;;  %v3630_v28 = vld [vmem:[%s2793_s22 + $0x70] sm:$0xff] }
  0xad   : > { %v1460_v31 = vmin.f32 %v1428_v39, 255.0  ;;  %v1343_v24 = vadd.f32 %v3559_v60, %v1307_v32  ;;  %v925_v1 = vadd.f32 %v893_v19, %v860_v34  ;;  %v1022_v20 = vmul.f32 %v2795_v15, %v4410_v21 }
  0xae   : > { %v1023_v50 = vmul.f32 %v2795_v15, %v4411_v46  ;;  %v1461_v8 = vmin.f32 %v1429_v49, 255.0  ;;  %v2121_v6 = vand.u32 2147483647, %v1342_v58  ;;  %v2123_v63 = vcvt.f32.s32 %v1342_v58 }
  0xaf   : > { %v2126_v29 = vand.u32 2147483648, %v1342_v58  ;;  %v2129_v40 = vand.u32 2147483647, %v1343_v24  ;;  %v2131_v54 = vcvt.f32.s32 %v1343_v24  ;;  %v2134_v59 = vand.u32 2147483648, %v1343_v24 }
  0xb0   : > { %v989_v39 = vadd.f32 %v957_v44, %v924_v43  ;;  %v1479_v5 = vpack.c.bf16 %v1461_v8, %v1460_v31  ;;  %vm3621_vm4 = vcmp.lt.f32.partialorder %v2121_v6, 8388608.0  ;;  %v2124_v19 = vcvt.s32.f32 %v2123_v63  ;;  %v3635_v31 = vld [vmem:[%s2793_s22 + $0x78] sm:$0xff]  ;;  %v4417_v8 = vld [vmem:[#allocation20_spill] sm:$0xff] }
  0xb1   : > { %v990_v32 = vadd.f32 %v958_v38, %v925_v1  ;;  %vm3625_vm5 = vcmp.lt.f32.partialorder %v2129_v40, 8388608.0  ;;  %v2132_v0 = vcvt.s32.f32 %v2131_v54  ;;  %v1087_v52 = vmul.f32 %v3630_v28, %v2797_v16  ;;  %v4416_v38 = vld [vmem:[#allocation18_spill] sm:$0xff] }
  0xb2   : > { %v1054_v34 = vadd.f32 %v1022_v20, %v989_v39  ;;  %1619 = vmatmul.bf16.gmra.mxu3 %v1479_v5  ;;  %v2125_v44 = vand.u32 2147483647, %v2124_v19  ;;  %v1088_v43 = vmul.f32 %v3635_v31, %v2797_v16  ;;  %v1152_v1 = vmul.f32 %v2799_v17, %v4416_v38  ;;  %v4418_v54 = vld [vmem:[#allocation30_spill] sm:$0xff] }
  0xb3   : > { %v1055_v49 = vadd.f32 %v1023_v50, %v990_v32  ;;  %v2133_v21 = vand.u32 2147483647, %v2132_v0  ;;  %v1153_v20 = vmul.f32 %v2799_v17, %v4417_v8  ;;  %v1217_v6 = vmul.f32 %v2801_v18, %v3339_v36  ;;  %v4419_v32 = vld [vmem:[#allocation33_spill] sm:$0xff]  ;;  %v4422_v8 = vld [vmem:[#allocation38_spill] sm:$0xff] }
  0xb4   : > { %v1119_v46 = vadd.f32 %v1087_v52, %v1054_v34  ;;  %v2127_v63 = vor.u32 %v2126_v29, %v2125_v44  ;;  %v1218_v50 = vmul.f32 %v2801_v18, %v3342_v35  ;;  %v1282_v39 = vmul.f32 %v2817_v25, %v4418_v54  ;;  %v4420_v44 = vld [vmem:[#allocation10_spill] sm:$0xff] }
  0xb5   : > { %v1120_v40 = vadd.f32 %v1088_v43, %v1055_v49  ;;  %v2135_v5 = vor.u32 %v2134_v59, %v2133_v21  ;;  %v1283_v0 = vmul.f32 %v2817_v25, %v4419_v32  ;;  %v802_v34 = vmul.f32 %v2780_v11, %v3066_v4  ;;  %v4421_v21 = vld [vmem:[#allocation9_spill] sm:$0xff] }
  0xb6   : > { %v1184_v19 = vadd.f32 %v1152_v1, %v1119_v46  ;;  %v2128_v52 = vsel %vm3621_vm4, %v2127_v63, %v1342_v58  ;;  %v803_v29 = vmul.f32 %v2780_v11, %v4375_v61  ;;  %v835_v49 = vmul.f32 %v2782_v12, %v4420_v44  ;;  %v4423_v44 = vld [vmem:[#allocation36_spill] sm:$0xff] }
  0xb7   : > { %v1185_v38 = vadd.f32 %v1153_v20, %v1120_v40  ;;  %v2136_v59 = vsel %vm3625_vm5, %v2135_v5, %v1343_v24  ;;  %v1406_v43 = vmax.f32 %v2128_v52, 0.0  ;;  %v836_v46 = vmul.f32 %v2782_v12, %v4421_v21 }
  0xb8   : > { %v1249_v1 = vadd.f32 %v1217_v6, %v1184_v19  ;;  %v1407_v4 = vmax.f32 %v2136_v59, 0.0  ;;  %v867_v58 = vadd.f32 %v835_v49, %v802_v34  ;;  %v900_v20 = vmul.f32 %v2784_v13, %v4422_v8  ;;  %v2638_v6 = vld [vmem:[%s2793_s22 + $0x90] sm:$0xff] }
  0xb9   : > { %v1250_v45 = vadd.f32 %v1218_v50, %v1185_v38  ;;  %v1438_v61 = vmin.f32 %v1406_v43, 255.0  ;;  %v868_v40 = vadd.f32 %v836_v46, %v803_v29  ;;  %v901_v51 = vmul.f32 %v2784_v13, %v4423_v44  ;;  %v2639_v50 = vld [vmem:[%s2793_s22 + $0x98] sm:$0xff]  ;;  %v4424_v38 = vld [vmem:[#allocation7_spill] sm:$0xff] }
  0xba   : > { %v1314_v63 = vadd.f32 %v1282_v39, %v1249_v1  ;;  %v1439_v32 = vmin.f32 %v1407_v4, 255.0  ;;  %v932_v5 = vadd.f32 %v900_v20, %v867_v58  ;;  %v965_v19 = vmul.f32 %v2638_v6, %v2786_v14  ;;  %v4425_v1 = vld [vmem:[#allocation8_spill] sm:$0xff]  ;;  %v4435_v44 = vld [vmem:[#allocation41_spill] sm:$0xff] }
  0xbb   : > { %v1315_v24 = vadd.f32 %v1283_v0, %v1250_v45  ;;  %v933_v59 = vadd.f32 %v901_v51, %v868_v40  ;;  %v966_v34 = vmul.f32 %v2639_v50, %v2786_v14  ;;  %v1030_v49 = vmul.f32 %v2795_v15, %v4424_v38  ;;  %v3691_v50 = vld [vmem:[%s2793_s22 + $0xb8] sm:$0xff] }
  0xbc   : > { %v1350_v52 = vadd.f32 %v3559_v60, %v1314_v63  ;;  %v1468_v39 = vpack.c.bf16 %v1439_v32, %v1438_v61  ;;  %v997_v43 = vadd.f32 %v965_v19, %v932_v5  ;;  %v1031_v0 = vmul.f32 %v2795_v15, %v4425_v1  ;;  %v3682_v5 = vld [vmem:[%s2793_s22 + $0xb0] sm:$0xff]  ;;  %4431 = vst [vmem:[#allocation21_spill] sm:$0xff] %v3691_v50  ;;  %v4432_v1 = vld [vmem:[#allocation35_spill] sm:$0xff] }
  0xbd   : > { %v1351_v29 = vadd.f32 %v3559_v60, %v1315_v24  ;;  %v998_v58 = vadd.f32 %v966_v34, %v933_v59  ;;  %4428 = vst [vmem:[#allocation29_spill] sm:$0xff] %v3682_v5  ;;  %v1095_v6 = vmul.f32 %v3682_v5, %v2797_v16  ;;  %v1096_v34 = vmul.f32 %v3691_v50, %v2797_v16  ;;  %v4434_v5 = vld [vmem:[#allocation52_spill] sm:$0xff] }
  0xbe   : > { %v2185_v46 = vand.u32 2147483647, %v1350_v52  ;;  %v2187_v4 = vcvt.f32.s32 %v1350_v52  ;;  %v2190_v45 = vand.u32 2147483648, %v1350_v52  ;;  %1564 = vmatmul.bf16.gmra.mxu0 %v1468_v39  ;;  %v1062_v51 = vadd.f32 %v1030_v49, %v997_v43  ;;  %v3698_v49 = vld [vmem:[%s2793_s22 + $0xf0] sm:$0xff] }
  0xbf   : > { %v2193_v20 = vand.u32 2147483647, %v1351_v29  ;;  %v2195_v63 = vcvt.f32.s32 %v1351_v29  ;;  %v2198_v40 = vand.u32 2147483648, %v1351_v29  ;;  %v1063_v24 = vadd.f32 %v1031_v0, %v998_v58  ;;  %v3705_v58 = vld [vmem:[%s2793_s22 + $0xf8] sm:$0xff] }
  0xc0   : > { %vm3677_vm6 = vcmp.lt.f32.partialorder %v2185_v46, 8388608.0  ;;  %v2188_v61 = vcvt.s32.f32 %v2187_v4  ;;  %v1160_v38 = vmul.f32 %v2799_v17, %v4386_v57  ;;  %v1127_v43 = vadd.f32 %v1095_v6, %v1062_v51  ;;  %v4433_v46 = vld [vmem:[#allocation51_spill] sm:$0xff] }
  0xc1   : > { %vm3686_vm7 = vcmp.lt.f32.partialorder %v2193_v20, 8388608.0  ;;  %v2196_v59 = vcvt.s32.f32 %v2195_v63  ;;  %v1161_v0 = vmul.f32 %v2799_v17, %v4432_v1  ;;  %v1225_v4 = vmul.f32 %v2801_v18, %v4433_v46 }
  0xc2   : > { %v2189_v39 = vand.u32 2147483647, %v2188_v61  ;;  %v1128_v63 = vadd.f32 %v1096_v34, %v1063_v24  ;;  %v1226_v50 = vmul.f32 %v2801_v18, %v4434_v5  ;;  %v1290_v57 = vmul.f32 %v2817_v25, %v4435_v44  ;;  %v4436_v61 = vld [vmem:[#allocation43_spill] sm:$0xff] }
  0xc3   : > { %v2197_v20 = vand.u32 2147483647, %v2196_v59  ;;  %v1192_v21 = vadd.f32 %v1160_v38, %v1127_v43  ;;  %v1291_v51 = vmul.f32 %v2817_v25, %v4436_v61  ;;  %v609_v6 = vrot.slane %v3698_v49, 7 }
  0xc4   : > { %v2191_v8 = vor.u32 %v2190_v45, %v2189_v39  ;;  %v1193_v54 = vadd.f32 %v1161_v0, %v1128_v63  ;;  %v610_v46 = vrot.slane %v3705_v58, 7  ;;  %v718_v59 = vrot.slane %v3698_v49, 1 }
  0xc5   : > { %v2199_v1 = vor.u32 %v2198_v40, %v2197_v20  ;;  %v1257_v34 = vadd.f32 %v1225_v4, %v1192_v21  ;;  %v3719_v5 = vsel %vm560_vm0, 0.0, %v609_v6  ;;  %v719_v45 = vrot.slane %v3705_v58, 1 }
  0xc6   : > { %v2192_v24 = vsel %vm3677_vm6, %v2191_v8, %v1350_v52  ;;  %4437 = vst [vmem:[#allocation22_spill] sm:$0xff] %v3719_v5  ;;  %v1258_v43 = vadd.f32 %v1226_v50, %v1193_v54  ;;  %v3725_v40 = vsel %vm560_vm0, %v609_v6, %v610_v46  ;;  %v810_v19 = vmul.f32 %v2780_v11, %v3178_v47 }
  0xc7   : > { %v2200_v38 = vsel %vm3686_vm7, %v2199_v1, %v1351_v29  ;;  %v1414_v39 = vmax.f32 %v2192_v24, 0.0  ;;  %4438 = vst [vmem:[#allocation23_spill] sm:$0xff] %v3725_v40  ;;  %v1322_v20 = vadd.f32 %v1290_v57, %v1257_v34  ;;  %v3728_v32 = vsel %vm669_vm1, %v718_v59, %v719_v45 }
  0xc8   : > { %v1415_v0 = vmax.f32 %v2200_v38, 0.0  ;;  %v3731_v21 = vsel %vm669_vm1, %v719_v45, 0.0  ;;  %v1323_v52 = vadd.f32 %v1291_v51, %v1258_v43  ;;  %v811_v54 = vmul.f32 %v2780_v11, %v4390_v3  ;;  %v2642_v51 = vld [vmem:[%s2793_s22 + $0xd0] sm:$0xff] }
  0xc9   : > { %v1446_v8 = vmin.f32 %v1414_v39, 255.0  ;;  %v1358_v50 = vadd.f32 %v3559_v60, %v1322_v20  ;;  %v843_v46 = vmul.f32 %v2782_v12, %v3480_v27  ;;  %v844_v4 = vmul.f32 %v2782_v12, %v3477_v41 }
  0xca   : > { %v1447_v29 = vmin.f32 %v1415_v0, 255.0  ;;  %v1359_v63 = vadd.f32 %v3559_v60, %v1323_v52  ;;  %v908_v57 = vmul.f32 %v2784_v13, %v3719_v5  ;;  %v909_v47 = vmul.f32 %v2784_v13, %v3725_v40  ;;  %v2643_v52 = vld [vmem:[%s2793_s22 + $0xd8] sm:$0xff] }
  0xcb   : > { %v973_v3 = vmul.f32 %v2642_v51, %v2786_v14  ;;  %v2249_v1 = vand.u32 2147483647, %v1358_v50  ;;  %v2251_v59 = vcvt.f32.s32 %v1358_v50  ;;  %v2254_v24 = vand.u32 2147483648, %v1358_v50  ;;  %v4448_v51 = vld [vmem:[#allocation13_spill] sm:$0xff] }
  0xcc   : > { %v1472_v6 = vpack.c.bf16 %v1447_v29, %v1446_v8  ;;  %v2257_v34 = vand.u32 2147483647, %v1359_v63  ;;  %v2259_v45 = vcvt.f32.s32 %v1359_v63  ;;  %v2262_v38 = vand.u32 2147483648, %v1359_v63 }
  0xcd   : > { %v875_v39 = vadd.f32 %v843_v46, %v810_v19  ;;  %vm3749_vm0 = vcmp.lt.f32.partialorder %v2249_v1, 8388608.0  ;;  %v2252_v0 = vcvt.s32.f32 %v2251_v59  ;;  %v876_v20 = vadd.f32 %v844_v4, %v811_v54 }
  0xce   : > { %1584 = vmatmul.bf16.gmra.mxu1 %v1472_v6  ;;  %v974_v40 = vmul.f32 %v2643_v52, %v2786_v14  ;;  %vm3755_vm1 = vcmp.lt.f32.partialorder %v2257_v34, 8388608.0  ;;  %v2260_v8 = vcvt.s32.f32 %v2259_v45  ;;  %v1038_v5 = vmul.f32 %v2795_v15, %v3455_v55 }
  0xcf   : > { %v940_v29 = vadd.f32 %v908_v57, %v875_v39  ;;  %v2253_v19 = vand.u32 2147483647, %v2252_v0  ;;  %v941_v46 = vadd.f32 %v909_v47, %v876_v20  ;;  %v1039_v6 = vmul.f32 %v2795_v15, %v3460_v48 }
  0xd0   : > { %v1103_v54 = vmul.f32 %v2797_v16, %v3698_v49  ;;  %v2261_v4 = vand.u32 2147483647, %v2260_v8  ;;  %v1104_v59 = vmul.f32 %v2797_v16, %v3705_v58  ;;  %v1168_v34 = vmul.f32 %v2799_v17, %v4397_v23  ;;  %v4444_v8 = vld [vmem:[#allocation46_spill] sm:$0xff] }
  0xd1   : > { %v1005_v1 = vadd.f32 %v973_v3, %v940_v29  ;;  %v2255_v57 = vor.u32 %v2254_v24, %v2253_v19  ;;  %v1006_v45 = vadd.f32 %v974_v40, %v941_v46  ;;  %v1169_v55 = vmul.f32 %v2799_v17, %v3200_v56  ;;  %v4443_v24 = vld [vmem:[#allocation47_spill] sm:$0xff] }
  0xd2   : > { %v1233_v47 = vmul.f32 %v2801_v18, %v3483_v62  ;;  %v2263_v48 = vor.u32 %v2262_v38, %v2261_v4  ;;  %v1234_v0 = vmul.f32 %v2801_v18, %v3486_v42  ;;  %v1298_v3 = vmul.f32 %v2817_v25, %v3728_v32 }
  0xd3   : > { %v1070_v39 = vadd.f32 %v1038_v5, %v1005_v1  ;;  %v2256_v20 = vsel %vm3749_vm0, %v2255_v57, %v1358_v50  ;;  %v1071_v23 = vadd.f32 %v1039_v6, %v1006_v45  ;;  %v1299_v40 = vmul.f32 %v2817_v25, %v3731_v21  ;;  %v4445_v50 = vld [vmem:[#allocation12_spill] sm:$0xff]  ;;  %v4446_v6 = vld [vmem:[#allocation11_spill] sm:$0xff]  ;;  %v4447_v45 = vld [vmem:[#allocation14_spill] sm:$0xff] }
  0xd4   : > { %v788_v56 = vmul.f32 %v2780_v11, %v4443_v24  ;;  %v2264_v38 = vsel %vm3755_vm1, %v2263_v48, %v1359_v63  ;;  %v1422_v5 = vmax.f32 %v2256_v20, 0.0  ;;  %v789_v29 = vmul.f32 %v2780_v11, %v4444_v8  ;;  %v2644_v24 = vld [vmem:[%s2793_s22 + $0x20] sm:$0xff]  ;;  %v2645_v8 = vld [vmem:[%s2793_s22 + $0x28] sm:$0xff] }
  0xd5   : > { %v1135_v52 = vadd.f32 %v1103_v54, %v1070_v39  ;;  %v1423_v19 = vmax.f32 %v2264_v38, 0.0  ;;  %v1136_v43 = vadd.f32 %v1104_v59, %v1071_v23  ;;  %v821_v46 = vmul.f32 %v2782_v12, %v4445_v50 }
  0xd6   : > { %v822_v4 = vmul.f32 %v2782_v12, %v4446_v6  ;;  %v1454_v1 = vmin.f32 %v1422_v5, 255.0  ;;  %v886_v63 = vmul.f32 %v2784_v13, %v4447_v45  ;;  %v887_v54 = vmul.f32 %v2784_v13, %v4448_v51 }
  0xd7   : > { %v1200_v57 = vadd.f32 %v1168_v34, %v1135_v52  ;;  %v1455_v48 = vmin.f32 %v1423_v19, 255.0  ;;  %v1201_v39 = vadd.f32 %v1169_v55, %v1136_v43  ;;  %v853_v20 = vadd.f32 %v821_v46, %v788_v56  ;;  %v2646_v56 = vld [vmem:[%s2793_s22 + $0x40] sm:$0xff] }
  0xd8   : > { %v854_v59 = vadd.f32 %v822_v4, %v789_v29  ;;  %v951_v38 = vmul.f32 %v2644_v24, %v2786_v14  ;;  %v952_v5 = vmul.f32 %v2645_v8, %v2786_v14  ;;  %v1016_v34 = vmul.f32 %v3565_v9, %v2795_v15  ;;  %v2647_v29 = vld [vmem:[%s2793_s22 + $0x48] sm:$0xff] }
  0xd9   : > { %v1265_v23 = vadd.f32 %v1233_v47, %v1200_v57  ;;  %v1476_v52 = vpack.c.bf16 %v1455_v48, %v1454_v1  ;;  %v1266_v50 = vadd.f32 %v1234_v0, %v1201_v39  ;;  %v918_v6 = vadd.f32 %v886_v63, %v853_v20 }
  0xda   : > { %v919_v45 = vadd.f32 %v887_v54, %v854_v59  ;;  %v1017_v55 = vmul.f32 %v3570_v22, %v2795_v15  ;;  %v1081_v47 = vmul.f32 %v2646_v56, %v2797_v16  ;;  %v1082_v43 = vmul.f32 %v2647_v29, %v2797_v16  ;;  %v4449_v54 = vld [vmem:[#allocation17_spill] sm:$0xff]  ;;  %v4450_v59 = vld [vmem:[#allocation19_spill] sm:$0xff] }
  0xdb   : > { %v1330_v19 = vadd.f32 %v1298_v3, %v1265_v23  ;;  %1604 = vmatmul.bf16.gmra.mxu2 %v1476_v52  ;;  %v1331_v46 = vadd.f32 %v1299_v40, %v1266_v50  ;;  %v983_v4 = vadd.f32 %v951_v38, %v918_v6  ;;  %v1146_v9 = vmul.f32 %v2799_v17, %v3269_v33 }
  0xdc   : > { %v984_v57 = vadd.f32 %v952_v5, %v919_v45  ;;  %v1147_v3 = vmul.f32 %v2799_v17, %v3272_v30  ;;  %v1211_v22 = vmul.f32 %v2801_v18, %v4405_v2  ;;  %v1212_v1 = vmul.f32 %v2801_v18, %v4406_v53 }
  0xdd   : > { %v1366_v0 = vadd.f32 %v3559_v60, %v1330_v19  ;;  %v1367_v63 = vadd.f32 %v3559_v60, %v1331_v46  ;;  %v1048_v51 = vadd.f32 %v1016_v34, %v983_v4  ;;  %v1276_v48 = vmul.f32 %v2817_v25, %v4449_v54  ;;  %v4456_v4 = vld [vmem:[#allocation26_spill] sm:$0xff] }
  0xde   : > { %v1049_v40 = vadd.f32 %v1017_v55, %v984_v57  ;;  %v1277_v23 = vmul.f32 %v2817_v25, %v4450_v59  ;;  %v796_v34 = vmul.f32 %v2780_v11, %v3333_v10  ;;  %v797_v45 = vmul.f32 %v2780_v11, %v4407_v37 }
  0xdf   : > { %v2313_v39 = vand.u32 2147483647, %v1366_v0  ;;  %v2315_v33 = vcvt.f32.s32 %v1366_v0  ;;  %v2318_v20 = vand.u32 2147483648, %v1366_v0  ;;  %v2321_v30 = vand.u32 2147483647, %v1367_v63 }
  0xe0   : > { %v2323_v24 = vcvt.f32.s32 %v1367_v63  ;;  %v2326_v38 = vand.u32 2147483648, %v1367_v63  ;;  %v1113_v2 = vadd.f32 %v1081_v47, %v1048_v51  ;;  %v1114_v5 = vadd.f32 %v1082_v43, %v1049_v40  ;;  %v4455_v43 = vld [vmem:[#allocation28_spill] sm:$0xff] }
  0xe1   : > { %vm3821_vm8 = vcmp.lt.f32.partialorder %v2313_v39, 8388608.0  ;;  %v2316_v53 = vcvt.s32.f32 %v2315_v33  ;;  %vm3827_vm9 = vcmp.lt.f32.partialorder %v2321_v30, 8388608.0  ;;  %v829_v56 = vmul.f32 %v2782_v12, %v4408_v7  ;;  %v2648_v39 = vld [vmem:[%s2793_s22 + $0x60] sm:$0xff]  ;;  %v2649_v33 = vld [vmem:[%s2793_s22 + $0x68] sm:$0xff] }
  0xe2   : > { %v2324_v50 = vcvt.s32.f32 %v2323_v24  ;;  %v1178_v6 = vadd.f32 %v1146_v9, %v1113_v2  ;;  %v1179_v55 = vadd.f32 %v1147_v3, %v1114_v5  ;;  %v830_v47 = vmul.f32 %v2782_v12, %v4409_v26 }
  0xe3   : > { %v2317_v19 = vand.u32 2147483647, %v2316_v53  ;;  %v894_v46 = vmul.f32 %v2784_v13, %v4455_v43  ;;  %v895_v57 = vmul.f32 %v2784_v13, %v4456_v4  ;;  %v861_v37 = vadd.f32 %v829_v56, %v796_v34  ;;  %v2650_v43 = vld [vmem:[%s2793_s22 + $0x80] sm:$0xff] }
  0xe4   : > { %v2325_v10 = vand.u32 2147483647, %v2324_v50  ;;  %v1243_v29 = vadd.f32 %v1211_v22, %v1178_v6  ;;  %v1244_v51 = vadd.f32 %v1212_v1, %v1179_v55  ;;  %v862_v40 = vadd.f32 %v830_v47, %v797_v45 }
  0xe5   : > { %v2319_v9 = vor.u32 %v2318_v20, %v2317_v19  ;;  %v959_v7 = vmul.f32 %v2648_v39, %v2786_v14  ;;  %v960_v26 = vmul.f32 %v2649_v33, %v2786_v14  ;;  %v926_v30 = vadd.f32 %v894_v46, %v861_v37 }
  0xe6   : > { %v2327_v54 = vor.u32 %v2326_v38, %v2325_v10  ;;  %v1308_v3 = vadd.f32 %v1276_v48, %v1243_v29  ;;  %v1309_v59 = vadd.f32 %v1277_v23, %v1244_v51  ;;  %v927_v24 = vadd.f32 %v895_v57, %v862_v40 }
  0xe7   : > { %v2320_v22 = vsel %vm3821_vm8, %v2319_v9, %v1366_v0  ;;  %v1024_v48 = vmul.f32 %v3630_v28, %v2795_v15  ;;  %v991_v5 = vadd.f32 %v959_v7, %v926_v30  ;;  %v1025_v55 = vmul.f32 %v3635_v31, %v2795_v15  ;;  %v2651_v9 = vld [vmem:[%s2793_s22 + $0x88] sm:$0xff] }
  0xe8   : > { %v2328_v20 = vsel %vm3827_vm9, %v2327_v54, %v1367_v63  ;;  %v1430_v1 = vmax.f32 %v2320_v22, 0.0  ;;  %v1344_v2 = vadd.f32 %v3559_v60, %v1308_v3  ;;  %v1345_v53 = vadd.f32 %v3559_v60, %v1309_v59  ;;  %v4461_v3 = vld [vmem:[#allocation30_spill] sm:$0xff]  ;;  %v4463_v59 = vld [vmem:[#allocation31_spill] sm:$0xff] }
  0xe9   : > { %v1431_v38 = vmax.f32 %v2328_v20, 0.0  ;;  %v992_v34 = vadd.f32 %v960_v26, %v927_v24  ;;  %v1056_v56 = vadd.f32 %v1024_v48, %v991_v5  ;;  %v1089_v46 = vmul.f32 %v2650_v43, %v2797_v16  ;;  %v4462_v26 = vld [vmem:[#allocation33_spill] sm:$0xff]  ;;  %v4465_v48 = vld [vmem:[#allocation10_spill] sm:$0xff] }
  0xea   : > { %v1462_v8 = vmin.f32 %v1430_v1, 255.0  ;;  %v2137_v0 = vand.u32 2147483647, %v1344_v2  ;;  %v2139_v23 = vcvt.f32.s32 %v1344_v2  ;;  %v2142_v50 = vand.u32 2147483648, %v1344_v2 }
  0xeb   : > { %v1463_v6 = vmin.f32 %v1431_v38, 255.0  ;;  %v2145_v52 = vand.u32 2147483647, %v1345_v53  ;;  %v2147_v63 = vcvt.f32.s32 %v1345_v53  ;;  %v2150_v45 = vand.u32 2147483648, %v1345_v53 }
  0xec   : > { %vm3853_vm10 = vcmp.lt.f32.partialorder %v2137_v0, 8388608.0  ;;  %v2140_v28 = vcvt.s32.f32 %v2139_v23  ;;  %v1057_v57 = vadd.f32 %v1025_v55, %v992_v34  ;;  %v1090_v51 = vmul.f32 %v2651_v9, %v2797_v16  ;;  %v4466_v34 = vld [vmem:[#allocation9_spill] sm:$0xff]  ;;  %v4467_v0 = vld [vmem:[#allocation38_spill] sm:$0xff]  ;;  %v4469_v55 = vld [vmem:[#allocation39_spill] sm:$0xff] }
  0xed   : > { %v1480_v47 = vpack.c.bf16 %v1463_v6, %v1462_v8  ;;  %vm3859_vm11 = vcmp.lt.f32.partialorder %v2145_v52, 8388608.0  ;;  %v2148_v29 = vcvt.s32.f32 %v2147_v63  ;;  %v1154_v37 = vmul.f32 %v2799_v17, %v3339_v36  ;;  %v4464_v36 = vld [vmem:[#allocation34_spill] sm:$0xff]  ;;  %v4468_v63 = vld [vmem:[#allocation36_spill] sm:$0xff] }
  0xee   : > { %v2141_v4 = vand.u32 2147483647, %v2140_v28  ;;  %v1121_v40 = vadd.f32 %v1089_v46, %v1056_v56  ;;  %v1155_v54 = vmul.f32 %v2799_v17, %v3342_v35  ;;  %v1219_v39 = vmul.f32 %v2801_v18, %v4461_v3  ;;  %v4470_v46 = vld [vmem:[#allocation37_spill] sm:$0xff]  ;;  %v2652_v9 = vld [vmem:[%s2793_s22 + $0xa0] sm:$0xff] }
  0xef   : > { %1624 = vmatmul.bf16.gmra.mxu3 %v1480_v47  ;;  %v2149_v31 = vand.u32 2147483647, %v2148_v29  ;;  %v1122_v33 = vadd.f32 %v1090_v51, %v1057_v57  ;;  %v1220_v22 = vmul.f32 %v2801_v18, %v4462_v26  ;;  %v1284_v30 = vmul.f32 %v2817_v25, %v4463_v59  ;;  %v4471_v3 = vld [vmem:[#allocation29_spill] sm:$0xff] }
  0xf0   : > { %v2143_v7 = vor.u32 %v2142_v50, %v2141_v4  ;;  %v1186_v20 = vadd.f32 %v1154_v37, %v1121_v40  ;;  %v1285_v1 = vmul.f32 %v2817_v25, %v4464_v36  ;;  %v804_v38 = vmul.f32 %v2780_v11, %v4465_v48  ;;  %v2653_v40 = vld [vmem:[%s2793_s22 + $0xa8] sm:$0xff] }
  0xf1   : > { %v2151_v24 = vor.u32 %v2150_v45, %v2149_v31  ;;  %v1187_v5 = vadd.f32 %v1155_v54, %v1122_v33  ;;  %v805_v8 = vmul.f32 %v2780_v11, %v4466_v34  ;;  %v837_v23 = vmul.f32 %v2782_v12, %v4467_v0  ;;  %v2654_v0 = vld [vmem:[%s2793_s22 + $0xc0] sm:$0xff] }
  0xf2   : > { %v2144_v35 = vsel %vm3853_vm10, %v2143_v7, %v1344_v2  ;;  %v1251_v52 = vadd.f32 %v1219_v39, %v1186_v20  ;;  %v838_v45 = vmul.f32 %v2782_v12, %v4468_v63  ;;  %v902_v56 = vmul.f32 %v2784_v13, %v4469_v55  ;;  %v4478_v55 = vld [vmem:[#allocation52_spill] sm:$0xff] }
  0xf3   : > { %v2152_v50 = vsel %vm3859_vm11, %v2151_v24, %v1345_v53  ;;  %v1408_v6 = vmax.f32 %v2144_v35, 0.0  ;;  %v1252_v19 = vadd.f32 %v1220_v22, %v1187_v5  ;;  %v869_v2 = vadd.f32 %v837_v23, %v804_v38  ;;  %v4472_v22 = vld [vmem:[#allocation21_spill] sm:$0xff] }
  0xf4   : > { %v1409_v28 = vmax.f32 %v2152_v50, 0.0  ;;  %v1316_v29 = vadd.f32 %v1284_v30, %v1251_v52  ;;  %v870_v43 = vadd.f32 %v838_v45, %v805_v8  ;;  %v903_v10 = vmul.f32 %v2784_v13, %v4470_v46  ;;  %v2655_v52 = vld [vmem:[%s2793_s22 + $0xc8] sm:$0xff] }
  0xf5   : > { %v1440_v47 = vmin.f32 %v1408_v6, 255.0  ;;  %v1317_v53 = vadd.f32 %v1285_v1, %v1252_v19  ;;  %v934_v57 = vadd.f32 %v902_v56, %v869_v2  ;;  %v967_v51 = vmul.f32 %v2652_v9, %v2786_v14  ;;  %v4477_v45 = vld [vmem:[#allocation51_spill] sm:$0xff]  ;;  %v4480_v9 = vld [vmem:[#allocation44_spill] sm:$0xff] }
  0xf6   : > { %v1441_v4 = vmin.f32 %v1409_v28, 255.0  ;;  %v1352_v37 = vadd.f32 %v3559_v60, %v1316_v29  ;;  %v935_v31 = vadd.f32 %v903_v10, %v870_v43  ;;  %v968_v54 = vmul.f32 %v2653_v40, %v2786_v14  ;;  %v4479_v10 = vld [vmem:[#allocation42_spill] sm:$0xff] }
  0xf7   : > { %v1032_v39 = vmul.f32 %v4471_v3, %v2795_v15  ;;  %v1353_v33 = vadd.f32 %v3559_v60, %v1317_v53  ;;  %v999_v26 = vadd.f32 %v967_v51, %v934_v57  ;;  %v1033_v59 = vmul.f32 %v4472_v22, %v2795_v15  ;;  %v4481_v3 = vld [vmem:[#allocation22_spill] sm:$0xff] }
  0xf8   : > { %v1469_v7 = vpack.c.bf16 %v1441_v4, %v1440_v47  ;;  %v2201_v30 = vand.u32 2147483647, %v1352_v37  ;;  %v2203_v24 = vcvt.f32.s32 %v1352_v37  ;;  %v2206_v20 = vand.u32 2147483648, %v1352_v37 }
  0xf9   : > { %v1000_v36 = vadd.f32 %v968_v54, %v935_v31  ;;  %v2209_v1 = vand.u32 2147483647, %v1353_v33  ;;  %v2211_v48 = vcvt.f32.s32 %v1353_v33  ;;  %v2214_v38 = vand.u32 2147483648, %v1353_v33 }
  0xfa   : > { %1569 = vmatmul.bf16.gmra.mxu0 %v1469_v7  ;;  %v1064_v35 = vadd.f32 %v1032_v39, %v999_v26  ;;  %vm3905_vm12 = vcmp.lt.f32.partialorder %v2201_v30, 8388608.0  ;;  %v2204_v34 = vcvt.s32.f32 %v2203_v24  ;;  %v1097_v23 = vmul.f32 %v2654_v0, %v2797_v16  ;;  %v4482_v26 = vld [vmem:[#allocation23_spill] sm:$0xff] }
  0xfb   : > { %v1065_v8 = vadd.f32 %v1033_v59, %v1000_v36  ;;  %vm3911_vm13 = vcmp.lt.f32.partialorder %v2209_v1, 8388608.0  ;;  %v2212_v6 = vcvt.s32.f32 %v2211_v48  ;;  %v1098_v63 = vmul.f32 %v2655_v52, %v2797_v16  ;;  %v4483_v59 = vld [vmem:[#allocation4_spill] sm:$0xff]  ;;  %v4484_v48 = vld [vmem:[#allocation2_spill] sm:$0xff] }
  0xfc   : > { %v1162_v28 = vmul.f32 %v2799_v17, %v4477_v45  ;;  %v2205_v19 = vand.u32 2147483647, %v2204_v34  ;;  %v1129_v2 = vadd.f32 %v1097_v23, %v1064_v35  ;;  %v1163_v56 = vmul.f32 %v2799_v17, %v4478_v55  ;;  %v2657_v23 = vld [vmem:[%s2793_s22 + $0xe8] sm:$0xff] }
  0xfd   : > { %v1227_v47 = vmul.f32 %v2801_v18, %v4435_v44  ;;  %v2213_v29 = vand.u32 2147483647, %v2212_v6  ;;  %v1130_v43 = vadd.f32 %v1098_v63, %v1065_v8  ;;  %v1228_v46 = vmul.f32 %v2801_v18, %v4436_v61 }
  0xfe   : > { %v1292_v4 = vmul.f32 %v2817_v25, %v4479_v10  ;;  %v2207_v53 = vor.u32 %v2206_v20, %v2205_v19  ;;  %v1194_v57 = vadd.f32 %v1162_v28, %v1129_v2  ;;  %v1293_v51 = vmul.f32 %v2817_v25, %v4480_v9 }
  0xff   : > { %v812_v31 = vmul.f32 %v2780_v11, %v3480_v27  ;;  %v2215_v40 = vor.u32 %v2214_v38, %v2213_v29  ;;  %v1195_v54 = vadd.f32 %v1163_v56, %v1130_v43  ;;  %v813_v44 = vmul.f32 %v2780_v11, %v3477_v41 }
 0x100   : > { %v845_v39 = vmul.f32 %v2782_v12, %v4481_v3  ;;  %v2208_v61 = vsel %vm3905_vm12, %v2207_v53, %v1352_v37  ;;  %v1259_v7 = vadd.f32 %v1227_v47, %v1194_v57  ;;  %v846_v22 = vmul.f32 %v2782_v12, %v4482_v26  ;;  %v2656_v12 = vld [vmem:[%s2793_s22 + $0xe0] sm:$0xff]  ;;  %v1555_v53 = vpop.f32.mrf.mxu0 }
 0x101   : > { %v910_v30 = vmul.f32 %v2784_v13, %v4483_v59  ;;  %v2216_v27 = vsel %vm3911_vm13, %v2215_v40, %v1353_v33  ;;  %v1416_v24 = vmax.f32 %v2208_v61, 0.0  ;;  %v1260_v11 = vadd.f32 %v1228_v46, %v1195_v54  ;;  %v1575_v40 = vpop.f32.mrf.mxu1  ;;  %v4489_v61 = vld [vmem:[#allocation3_spill] sm:$0xff]  ;;  %v4490_v59 = vld [vmem:[#allocation5_spill] sm:$0xff] }
 0x102   : > { %v877_v41 = vadd.f32 %v845_v39, %v812_v31  ;;  %v1417_v20 = vmax.f32 %v2216_v27, 0.0  ;;  %v1324_v36 = vadd.f32 %v1292_v4, %v1259_v7  ;;  %v878_v1 = vadd.f32 %v846_v22, %v813_v44  ;;  %v3974_v31 = vld [vmem:[%s4197_s7] ss:$0 sm:$0xff]  ;;  %v1595_v39 = vpop.f32.mrf.mxu2 }
 0x103   : > { %v911_v37 = vmul.f32 %v2784_v13, %v4484_v48  ;;  %v1448_v38 = vmin.f32 %v1416_v24, 255.0  ;;  %v1325_v35 = vadd.f32 %v1293_v51, %v1260_v11  ;;  %v975_v34 = vmul.f32 %v2656_v12, %v2786_v14 }
 0x104   : > { %v942_v5 = vadd.f32 %v910_v30, %v877_v41  ;;  %v1449_v8 = vmin.f32 %v1417_v20, 255.0  ;;  %v1360_v0 = vadd.f32 %v3559_v60, %v1324_v36  ;;  %v976_v50 = vmul.f32 %v2657_v23, %v2786_v14  ;;  %v1615_v41 = vpop.f32.mrf.mxu3 }
 0x105   : > { %v943_v33 = vadd.f32 %v911_v37, %v878_v1  ;;  %v1361_v6 = vadd.f32 %v3559_v60, %v1325_v35  ;;  %v1040_v63 = vmul.f32 %v2795_v15, %v3698_v49  ;;  %v1041_v13 = vmul.f32 %v2795_v15, %v3705_v58  ;;  %v3959_v49 = vld [vmem:[%s4196_s6] ss:$0 sm:$0xff] }
 0x106   : > { %v1007_v52 = vadd.f32 %v975_v34, %v942_v5  ;;  %v1473_v45 = vpack.c.bf16 %v1449_v8, %v1448_v38  ;;  %v2265_v28 = vand.u32 2147483647, %v1360_v0  ;;  %v2267_v19 = vcvt.f32.s32 %v1360_v0 }
 0x107   : > { %v2270_v2 = vand.u32 2147483648, %v1360_v0  ;;  %v2273_v55 = vand.u32 2147483647, %v1361_v6  ;;  %v2275_v56 = vcvt.f32.s32 %v1361_v6  ;;  %v1008_v47 = vadd.f32 %v976_v50, %v943_v33 }
 0x108   : > { %1589 = vmatmul.bf16.gmra.mxu1 %v1473_v45  ;;  %v2268_v29 = vcvt.s32.f32 %v2267_v19  ;;  %v2278_v43 = vand.u32 2147483648, %v1361_v6  ;;  %v1072_v14 = vadd.f32 %v1040_v63, %v1007_v52  ;;  %v1105_v46 = vmul.f32 0.0, %v2797_v16 }
 0x109   : > { %vm3961_vm14 = vcmp.lt.f32.partialorder %v2265_v28, 8388608.0  ;;  %v2276_v58 = vcvt.s32.f32 %v2275_v56  ;;  %v1073_v10 = vadd.f32 %v1041_v13, %v1008_v47  ;;  %v1170_v4 = vmul.f32 %v2799_v17, %v3483_v62 }
 0x10a   : > { %v2269_v57 = vand.u32 2147483647, %v2268_v29  ;;  %v1137_v9 = vadd.f32 %v1105_v46, %v1072_v14  ;;  %v1171_v16 = vmul.f32 %v2799_v17, %v3486_v42  ;;  %v1235_v51 = vmul.f32 %v2801_v18, %v3728_v32 }
 0x10b   : > { %vm3976_vm15 = vcmp.lt.f32.partialorder %v2273_v55, 8388608.0  ;;  %v2277_v62 = vand.u32 2147483647, %v2276_v58  ;;  %v1138_v44 = vadd.f32 %v1105_v46, %v1073_v10  ;;  %v1236_v3 = vmul.f32 %v2801_v18, %v3731_v21 }
 0x10c   : > { %v2271_v17 = vor.u32 %v2270_v2, %v2269_v57  ;;  %v1202_v42 = vadd.f32 %v1170_v4, %v1137_v9  ;;  %v1300_v32 = vmul.f32 %v2817_v25, %v4489_v61  ;;  %v1639_v7 = vmul.f32 %v3959_v49, %v1555_v53 }
 0x10d   : > { %v2279_v26 = vor.u32 %v2278_v43, %v2277_v62  ;;  %v1203_v22 = vadd.f32 %v1171_v16, %v1138_v44  ;;  %v1301_v30 = vmul.f32 %v2817_v25, %v4490_v59  ;;  %v1647_v27 = vmul.f32 %v3959_v49, %v1575_v40 }
 0x10e   : > { %v2272_v24 = vsel %vm3961_vm14, %v2271_v17, %v1360_v0  ;;  %v1267_v11 = vadd.f32 %v1235_v51, %v1202_v42  ;;  %v1675_v18 = vadd.f32 %v3974_v31, %v1639_v7  ;;  %v1655_v21 = vmul.f32 %v3959_v49, %v1595_v39  ;;  %v1557_v42 = vpop.f32.mrf.mxu0 }
 0x10f   : > { %v2280_v20 = vsel %vm3976_vm15, %v2279_v26, %v1361_v6  ;;  %v1424_v36 = vmax.f32 %v2272_v24, 0.0  ;;  %v1268_v1 = vadd.f32 %v1236_v3, %v1203_v22  ;;  %v1683_v48 = vadd.f32 %v3974_v31, %v1647_v27  ;;  %v1577_v22 = vpop.f32.mrf.mxu1 }
 0x110   : > { %v1425_v37 = vmax.f32 %v2280_v20, 0.0  ;;  %v1332_v25 = vadd.f32 %v1300_v32, %v1267_v11  ;;  %v2345_v38 = vand.u32 2147483647, %v1675_v18  ;;  %v2347_v35 = vcvt.f32.s32 %v1675_v18  ;;  %v1597_v20 = vpop.f32.mrf.mxu2 }
 0x111   : > { %v1456_v5 = vmin.f32 %v1424_v36, 255.0  ;;  %v1333_v12 = vadd.f32 %v1301_v30, %v1268_v1  ;;  %v2409_v34 = vand.u32 2147483647, %v1683_v48  ;;  %v1663_v8 = vmul.f32 %v3959_v49, %v1615_v41 }
 0x112   : > { %v1457_v0 = vmin.f32 %v1425_v37, 255.0  ;;  %v1368_v33 = vadd.f32 %v3559_v60, %v1332_v25  ;;  %v2348_v23 = vcvt.s32.f32 %v2347_v35  ;;  %v2350_v50 = vand.u32 2147483648, %v1675_v18  ;;  %v1617_v25 = vpop.f32.mrf.mxu3 }
 0x113   : > { %v1369_v6 = vadd.f32 %v3559_v60, %v1333_v12  ;;  %vm3998_vm2 = vcmp.lt.f32.partialorder %v2345_v38, 8388608.0  ;;  %vm4002_vm3 = vcmp.lt.f32.partialorder %v2409_v34, 8388608.0  ;;  %v2411_v13 = vcvt.f32.s32 %v1683_v48 }
 0x114   : > { %v1477_v45 = vpack.c.bf16 %v1457_v0, %v1456_v5  ;;  %v2329_v28 = vand.u32 2147483647, %v1368_v33  ;;  %v2331_v19 = vcvt.f32.s32 %v1368_v33  ;;  %v2414_v2 = vand.u32 2147483648, %v1683_v48 }
 0x115   : > { %v2334_v55 = vand.u32 2147483648, %v1368_v33  ;;  %v2337_v56 = vand.u32 2147483647, %v1369_v6  ;;  %v2339_v47 = vcvt.f32.s32 %v1369_v6  ;;  %v2349_v29 = vand.u32 2147483647, %v2348_v23 }
 0x116   : > { %1609 = vmatmul.bf16.gmra.mxu2 %v1477_v45  ;;  %v2332_v43 = vcvt.s32.f32 %v2331_v19  ;;  %v2342_v60 = vand.u32 2147483648, %v1369_v6  ;;  %v2412_v14 = vcvt.s32.f32 %v2411_v13  ;;  %v1691_v46 = vadd.f32 %v3974_v31, %v1655_v21 }
 0x117   : > { %vm4007_vm4 = vcmp.lt.f32.partialorder %v2329_v28, 8388608.0  ;;  %v2340_v58 = vcvt.s32.f32 %v2339_v47  ;;  %v2351_v10 = vor.u32 %v2350_v50, %v2349_v29  ;;  %v1699_v4 = vadd.f32 %v3974_v31, %v1663_v8 }
 0x118   : > { %v2333_v53 = vand.u32 2147483647, %v2332_v43  ;;  %v2413_v57 = vand.u32 2147483647, %v2412_v14  ;;  %v2473_v9 = vand.u32 2147483647, %v1691_v46  ;;  %v2475_v16 = vcvt.f32.s32 %v1691_v46 }
 0x119   : > { %vm4012_vm5 = vcmp.lt.f32.partialorder %v2337_v56, 8388608.0  ;;  %v2341_v40 = vand.u32 2147483647, %v2340_v58  ;;  %v2352_v54 = vsel %vm3998_vm2, %v2351_v10, %v1675_v18  ;;  %v2478_v62 = vand.u32 2147483648, %v1691_v46  ;;  %v1580_v10 = vpop.f32.mrf.mxu1 }
 0x11a   : > { %v2335_v44 = vor.u32 %v2334_v55, %v2333_v53  ;;  %v1739_v3 = vmax.f32 %v2352_v54, 0.0  ;;  %v2415_v39 = vor.u32 %v2414_v2, %v2413_v57  ;;  %v2537_v17 = vand.u32 2147483647, %v1699_v4 }
 0x11b   : > { %v2343_v61 = vor.u32 %v2342_v60, %v2341_v40  ;;  %vm4018_vm6 = vcmp.lt.f32.partialorder %v2473_v9, 8388608.0  ;;  %v2476_v7 = vcvt.s32.f32 %v2475_v16  ;;  %v2539_v26 = vcvt.f32.s32 %v1699_v4  ;;  %v1560_v60 = vpop.f32.mrf.mxu0 }
 0x11c   : > { %v2336_v59 = vsel %vm4007_vm4, %v2335_v44, %v1368_v33  ;;  %v1771_v30 = vmin.f32 %v1739_v3, 255.0  ;;  %v2416_v27 = vsel %vm4002_vm3, %v2415_v39, %v1683_v48  ;;  %v2542_v24 = vand.u32 2147483648, %v1699_v4 }
 0x11d   : > { %v2344_v11 = vsel %vm4012_vm5, %v2343_v61, %v1369_v6  ;;  %v1432_v18 = vmax.f32 %v2336_v59, 0.0  ;;  %v1747_v21 = vmax.f32 %v2416_v27, 0.0  ;;  %v2477_v41 = vand.u32 2147483647, %v2476_v7 }
 0x11e   : > { %v1433_v36 = vmax.f32 %v2344_v11, 0.0  ;;  %v1803_v1 = vmul.f32 0.023529412, %v1771_v30  ;;  %v2540_v37 = vcvt.s32.f32 %v2539_v26  ;;  %v1640_v48 = vmul.f32 %v3959_v49, %v1557_v42 }
 0x11f   : > { %v1464_v38 = vmin.f32 %v1432_v18, 255.0  ;;  %v1779_v35 = vmin.f32 %v1747_v21, 255.0  ;;  %v2479_v5 = vor.u32 %v2478_v62, %v2477_v41  ;;  %v1648_v12 = vmul.f32 %v3959_v49, %v1577_v22 }
 0x120   : > { %v1465_v34 = vmin.f32 %v1433_v36, 255.0  ;;  %1835 = vst [vmem:[%s4033_s0] sm:$0xff] %v1803_v1  ;;  %v2541_v8 = vand.u32 2147483647, %v2540_v37  ;;  %v1676_v0 = vadd.f32 %v3974_v31, %v1640_v48  ;;  %v1656_v33 = vmul.f32 %v3959_v49, %v1597_v20 }
 0x121   : > { %v1811_v23 = vmul.f32 0.023529412, %v1779_v35  ;;  %v2480_v50 = vsel %vm4018_vm6, %v2479_v5, %v1691_v46  ;;  %v1684_v6 = vadd.f32 %v3974_v31, %v1648_v12  ;;  %v1664_v52 = vmul.f32 %v3959_v49, %v1617_v25 }
 0x122   : > { %v1481_v63 = vpack.c.bf16 %v1465_v34, %v1464_v38  ;;  %v1755_v13 = vmax.f32 %v2480_v50, 0.0  ;;  %v2543_v45 = vor.u32 %v2542_v24, %v2541_v8  ;;  %v2353_v28 = vand.u32 2147483647, %v1676_v0 }
 0x123   : > { %1843 = vst [vmem:[%s4033_s0 + $0x40] sm:$0xff] %v1811_v23  ;;  %vm2538_vm7 = vcmp.lt.f32.partialorder %v2537_v17, 8388608.0  ;;  %v2355_v19 = vcvt.f32.s32 %v1676_v0  ;;  %v2417_v2 = vand.u32 2147483647, %v1684_v6  ;;  %v2419_v55 = vcvt.f32.s32 %v1684_v6  ;;  %v1562_v23 = vpop.f32.mrf.mxu0 }
 0x124   : > { %1629 = vmatmul.bf16.gmra.mxu3 %v1481_v63  ;;  %v1787_v56 = vmin.f32 %v1755_v13, 255.0  ;;  %v2544_v47 = vsel %vm2538_vm7, %v2543_v45, %v1699_v4  ;;  %vm4045_vm0 = vcmp.lt.f32.partialorder %v2353_v28, 8388608.0  ;;  %v2358_v43 = vand.u32 2147483648, %v1676_v0  ;;  %v1582_v13 = vpop.f32.mrf.mxu1 }
 0x125   : > { %v1763_v14 = vmax.f32 %v2544_v47, 0.0  ;;  %v2356_v46 = vcvt.s32.f32 %v2355_v19  ;;  %v2420_v15 = vcvt.s32.f32 %v2419_v55  ;;  %v2422_v58 = vand.u32 2147483648, %v1684_v6  ;;  %v1600_v18 = vpop.f32.mrf.mxu2 }
 0x126   : > { %v1819_v53 = vmul.f32 0.023529412, %v1787_v56  ;;  %vm4049_vm1 = vcmp.lt.f32.partialorder %v2417_v2, 8388608.0  ;;  %v1692_v9 = vadd.f32 %v3974_v31, %v1656_v33  ;;  %v1700_v4 = vadd.f32 %v3974_v31, %v1664_v52 }
 0x127   : > { %v1795_v16 = vmin.f32 %v1763_v14, 255.0  ;;  %v2357_v51 = vand.u32 2147483647, %v2356_v46  ;;  %v2421_v40 = vand.u32 2147483647, %v2420_v15  ;;  %v1641_v54 = vmul.f32 %v3959_v49, %v1560_v60 }
 0x128   : > { %1851 = vst [vmem:[%s4033_s0 + $0x80] sm:$0xff] %v1819_v53  ;;  %v2481_v62 = vand.u32 2147483647, %v1692_v9  ;;  %v2483_v44 = vcvt.f32.s32 %v1692_v9  ;;  %v2545_v3 = vand.u32 2147483647, %v1700_v4  ;;  %v1649_v39 = vmul.f32 %v3959_v49, %v1580_v10 }
 0x129   : > { %v1827_v17 = vmul.f32 0.023529412, %v1795_v16  ;;  %v2359_v42 = vor.u32 %v2358_v43, %v2357_v51  ;;  %v2423_v61 = vor.u32 %v2422_v58, %v2421_v40  ;;  %v2547_v32 = vcvt.f32.s32 %v1700_v4 }
 0x12a   : > { %vm4058_vm8 = vcmp.lt.f32.partialorder %v2481_v62, 8388608.0  ;;  %v2484_v26 = vcvt.s32.f32 %v2483_v44  ;;  %v2486_v22 = vand.u32 2147483648, %v1692_v9  ;;  %vm4062_vm9 = vcmp.lt.f32.partialorder %v2545_v3, 8388608.0 }
 0x12b   : > { %1859 = vst [vmem:[%s4033_s0 + $0xc0] sm:$0xff] %v1827_v17  ;;  %v2360_v30 = vsel %vm4045_vm0, %v2359_v42, %v1676_v0  ;;  %v2424_v27 = vsel %vm4049_vm1, %v2423_v61, %v1684_v6  ;;  %v2548_v24 = vcvt.s32.f32 %v2547_v32  ;;  %v1677_v11 = vadd.f32 %v3974_v31, %v1641_v54 }
 0x12c   : > { %v1740_v21 = vmax.f32 %v2360_v30, 0.0  ;;  %v1748_v41 = vmax.f32 %v2424_v27, 0.0  ;;  %v2485_v20 = vand.u32 2147483647, %v2484_v26  ;;  %v1685_v36 = vadd.f32 %v3974_v31, %v1649_v39 }
 0x12d   : > { %v2549_v1 = vand.u32 2147483647, %v2548_v24  ;;  %v2550_v37 = vand.u32 2147483648, %v1700_v4  ;;  %v2361_v48 = vand.u32 2147483647, %v1677_v11  ;;  %v2363_v25 = vcvt.f32.s32 %v1677_v11  ;;  %v1602_v40 = vpop.f32.mrf.mxu2 }
 0x12e   : > { %v1772_v38 = vmin.f32 %v1740_v21, 255.0  ;;  %v1780_v35 = vmin.f32 %v1748_v41, 255.0  ;;  %v2487_v5 = vor.u32 %v2486_v22, %v2485_v20  ;;  %v2366_v12 = vand.u32 2147483648, %v1677_v11 }
 0x12f   : > { %v2551_v34 = vor.u32 %v2550_v37, %v2549_v1  ;;  %v2364_v8 = vcvt.s32.f32 %v2363_v25  ;;  %v2425_v0 = vand.u32 2147483647, %v1685_v36  ;;  %v2427_v33 = vcvt.f32.s32 %v1685_v36 }
 0x130   : > { %v1804_v50 = vmul.f32 0.023529412, %v1772_v38  ;;  %v1812_v6 = vmul.f32 0.023529412, %v1780_v35  ;;  %v2488_v52 = vsel %vm4058_vm8, %v2487_v5, %v1692_v9  ;;  %vm4075_vm10 = vcmp.lt.f32.partialorder %v2361_v48, 8388608.0 }
 0x131   : > { %v1756_v45 = vmax.f32 %v2488_v52, 0.0  ;;  %v2552_v28 = vsel %vm4062_vm9, %v2551_v34, %v1700_v4  ;;  %v2365_v19 = vand.u32 2147483647, %v2364_v8  ;;  %v2428_v2 = vcvt.s32.f32 %v2427_v33 }
 0x132   : > { %1836 = vst [vmem:[%s4033_s0 + $0x8] sm:$0xff] %v1804_v50  ;;  %v1764_v55 = vmax.f32 %v2552_v28, 0.0  ;;  %v2430_v56 = vand.u32 2147483648, %v1685_v36  ;;  %v1657_v47 = vmul.f32 %v3959_v49, %v1600_v18  ;;  %v1642_v29 = vmul.f32 %v3959_v49, %v1562_v23 }
 0x133   : > { %1844 = vst [vmem:[%s4033_s0 + $0x48] sm:$0xff] %v1812_v6  ;;  %v1788_v43 = vmin.f32 %v1756_v45, 255.0  ;;  %v2367_v60 = vor.u32 %v2366_v12, %v2365_v19  ;;  %v2429_v14 = vand.u32 2147483647, %v2428_v2  ;;  %v1650_v46 = vmul.f32 %v3959_v49, %v1582_v13 }
 0x134   : > { %v1796_v15 = vmin.f32 %v1764_v55, 255.0  ;;  %vm4086_vm11 = vcmp.lt.f32.partialorder %v2425_v0, 8388608.0  ;;  %v1693_v10 = vadd.f32 %v3974_v31, %v1657_v47  ;;  %v1678_v53 = vadd.f32 %v3974_v31, %v1642_v29 }
 0x135   : > { %v1820_v57 = vmul.f32 0.023529412, %v1788_v43  ;;  %v2368_v9 = vsel %vm4075_vm10, %v2367_v60, %v1677_v11  ;;  %v2431_v4 = vor.u32 %v2430_v56, %v2429_v14  ;;  %v1620_v16 = vpop.f32.mrf.mxu3  ;;  %v1686_v51 = vadd.f32 %v3974_v31, %v1650_v46 }
 0x136   : > { %v1828_v54 = vmul.f32 0.023529412, %v1796_v15  ;;  %v1741_v62 = vmax.f32 %v2368_v9, 0.0  ;;  %v2489_v44 = vand.u32 2147483647, %v1693_v10  ;;  %v2491_v3 = vcvt.f32.s32 %v1693_v10 }
 0x137   : > { %1852 = vst [vmem:[%s4033_s0 + $0x88] sm:$0xff] %v1820_v57  ;;  %v2432_v39 = vsel %vm4086_vm11, %v2431_v4, %v1685_v36  ;;  %v1665_v17 = vmul.f32 %v3959_v49, %v1620_v16  ;;  %v2369_v42 = vand.u32 2147483647, %v1678_v53  ;;  %v1658_v26 = vmul.f32 %v3959_v49, %v1602_v40 }
 0x138   : > { %1860 = vst [vmem:[%s4033_s0 + $0xc8] sm:$0xff] %v1828_v54  ;;  %v1773_v61 = vmin.f32 %v1741_v62, 255.0  ;;  %v1749_v32 = vmax.f32 %v2432_v39, 0.0  ;;  %v2492_v7 = vcvt.s32.f32 %v2491_v3  ;;  %vm4101_vm12 = vcmp.lt.f32.partialorder %v2489_v44, 8388608.0 }
 0x139   : > { %v2494_v59 = vand.u32 2147483648, %v1693_v10  ;;  %v1701_v30 = vadd.f32 %v3974_v31, %v1665_v17  ;;  %v2371_v27 = vcvt.f32.s32 %v1678_v53  ;;  %v2435_v21 = vcvt.f32.s32 %v1686_v51 }
 0x13a   : > { %v1805_v24 = vmul.f32 0.023529412, %v1773_v61  ;;  %v1781_v11 = vmin.f32 %v1749_v32, 255.0  ;;  %v2493_v18 = vand.u32 2147483647, %v2492_v7  ;;  %vm4106_vm13 = vcmp.lt.f32.partialorder %v2369_v42, 8388608.0 }
 0x13b   : > { %v2553_v41 = vand.u32 2147483647, %v1701_v30  ;;  %v2555_v20 = vcvt.f32.s32 %v1701_v30  ;;  %v2372_v1 = vcvt.s32.f32 %v2371_v27  ;;  %v2433_v25 = vand.u32 2147483647, %v1686_v51  ;;  %v1565_v46 = vpop.f32.mrf.mxu0 }
 0x13c   : > { %1837 = vst [vmem:[%s4033_s0 + $0x10] sm:$0xff] %v1805_v24  ;;  %v1813_v37 = vmul.f32 0.023529412, %v1781_v11  ;;  %v2495_v48 = vor.u32 %v2494_v59, %v2493_v18  ;;  %v2436_v38 = vcvt.s32.f32 %v2435_v21  ;;  %v2558_v5 = vand.u32 2147483648, %v1701_v30 }
 0x13d   : > { %v2556_v35 = vcvt.s32.f32 %v2555_v20  ;;  %v2373_v12 = vand.u32 2147483647, %v2372_v1  ;;  %v2374_v34 = vand.u32 2147483648, %v1678_v53  ;;  %v1622_v8 = vpop.f32.mrf.mxu3  ;;  %v2438_v23 = vand.u32 2147483648, %v1686_v51 }
 0x13e   : > { %1845 = vst [vmem:[%s4033_s0 + $0x50] sm:$0xff] %v1813_v37  ;;  %v2496_v0 = vsel %vm4101_vm12, %v2495_v48, %v1693_v10  ;;  %v2437_v33 = vand.u32 2147483647, %v2436_v38  ;;  %v1694_v50 = vadd.f32 %v3974_v31, %v1658_v26  ;;  %v1666_v13 = vmul.f32 %v3959_v49, %v1622_v8 }
 0x13f   : > { %v1757_v6 = vmax.f32 %v2496_v0, 0.0  ;;  %v2557_v52 = vand.u32 2147483647, %v2556_v35  ;;  %v2375_v63 = vor.u32 %v2374_v34, %v2373_v12  ;;  %vm4116_vm14 = vcmp.lt.f32.partialorder %v2553_v41, 8388608.0 }
 0x140   : > { %vm2434_vm15 = vcmp.lt.f32.partialorder %v2433_v25, 8388608.0  ;;  %v2439_v28 = vor.u32 %v2438_v23, %v2437_v33  ;;  %v2499_v19 = vcvt.f32.s32 %v1694_v50  ;;  %v1702_v47 = vadd.f32 %v3974_v31, %v1666_v13 }
 0x141   : > { %v1789_v2 = vmin.f32 %v1757_v6, 255.0  ;;  %v2559_v55 = vor.u32 %v2558_v5, %v2557_v52  ;;  %v2376_v56 = vsel %vm4106_vm13, %v2375_v63, %v1678_v53  ;;  %v2497_v60 = vand.u32 2147483647, %v1694_v50 }
 0x142   : > { %v1742_v29 = vmax.f32 %v2376_v56, 0.0  ;;  %v2440_v43 = vsel %vm2434_vm15, %v2439_v28, %v1686_v51  ;;  %v2500_v14 = vcvt.s32.f32 %v2499_v19  ;;  %v2502_v57 = vand.u32 2147483648, %v1694_v50 }
 0x143   : > { %v1821_v15 = vmul.f32 0.023529412, %v1789_v2  ;;  %v2560_v58 = vsel %vm4116_vm14, %v2559_v55, %v1701_v30  ;;  %v1750_v10 = vmax.f32 %v2440_v43, 0.0  ;;  %v2563_v40 = vcvt.f32.s32 %v1702_v47 }
 0x144   : > { %v1765_v9 = vmax.f32 %v2560_v58, 0.0  ;;  %v1774_v4 = vmin.f32 %v1742_v29, 255.0  ;;  %v2501_v16 = vand.u32 2147483647, %v2500_v14  ;;  %v2561_v54 = vand.u32 2147483647, %v1702_v47  ;;  %v1567_v29 = vpop.f32.mrf.mxu0 }
 0x145   : > { %1853 = vst [vmem:[%s4033_s0 + $0x90] sm:$0xff] %v1821_v15  ;;  %v1782_v53 = vmin.f32 %v1750_v10, 255.0  ;;  %v1643_v51 = vmul.f32 %v3959_v49, %v1565_v46  ;;  %v2564_v39 = vcvt.s32.f32 %v2563_v40  ;;  %vm2498_vm2 = vcmp.lt.f32.partialorder %v2497_v60, 8388608.0 }
 0x146   : > { %v1797_v62 = vmin.f32 %v1765_v9, 255.0  ;;  %v1806_v44 = vmul.f32 0.023529412, %v1774_v4  ;;  %v2503_v3 = vor.u32 %v2502_v57, %v2501_v16  ;;  %v2566_v26 = vand.u32 2147483648, %v1702_v47 }
 0x147   : > { %v1814_v17 = vmul.f32 0.023529412, %v1782_v53  ;;  %v1679_v42 = vadd.f32 %v3974_v31, %v1643_v51  ;;  %v2565_v7 = vand.u32 2147483647, %v2564_v39  ;;  %vm2562_vm3 = vcmp.lt.f32.partialorder %v2561_v54, 8388608.0 }
 0x148   : > { %v1829_v61 = vmul.f32 0.023529412, %v1797_v62  ;;  %1838 = vst [vmem:[%s4033_s0 + $0x18] sm:$0xff] %v1806_v44  ;;  %v2504_v32 = vsel %vm2498_vm2, %v2503_v3, %v1694_v50  ;;  %v1644_v14 = vmul.f32 %v3959_v49, %v1567_v29 }
 0x149   : > { %1846 = vst [vmem:[%s4033_s0 + $0x58] sm:$0xff] %v1814_v17  ;;  %v1758_v22 = vmax.f32 %v2504_v32, 0.0  ;;  %v2379_v59 = vcvt.f32.s32 %v1679_v42  ;;  %v2567_v30 = vor.u32 %v2566_v26, %v2565_v7  ;;  %v2377_v27 = vand.u32 2147483647, %v1679_v42 }
 0x14a   : > { %1861 = vst [vmem:[%s4033_s0 + $0xd0] sm:$0xff] %v1829_v61  ;;  %v2382_v21 = vand.u32 2147483648, %v1679_v42  ;;  %v1680_v9 = vadd.f32 %v3974_v31, %v1644_v14 }
 0x14b   : > { %v1585_v24 = vpop.f32.mrf.mxu1  ;;  %v1790_v11 = vmin.f32 %v1758_v22, 255.0  ;;  %v2380_v18 = vcvt.s32.f32 %v2379_v59  ;;  %v2568_v20 = vsel %vm2562_vm3, %v2567_v30, %v1702_v47  ;;  %vm2378_vm4 = vcmp.lt.f32.partialorder %v2377_v27, 8388608.0 }
 0x14c   : > { %v1651_v41 = vmul.f32 %v3959_v49, %v1585_v24  ;;  %v1766_v1 = vmax.f32 %v2568_v20, 0.0  ;;  %v2387_v53 = vcvt.f32.s32 %v1680_v9  ;;  %v2385_v3 = vand.u32 2147483647, %v1680_v9 }
 0x14d   : > { %v1822_v36 = vmul.f32 0.023529412, %v1790_v11  ;;  %v2381_v37 = vand.u32 2147483647, %v2380_v18  ;;  %v2390_v32 = vand.u32 2147483648, %v1680_v9 }
 0x14e   : > { %v1687_v48 = vadd.f32 %v3974_v31, %v1651_v41  ;;  %v1798_v25 = vmin.f32 %v1766_v1, 255.0  ;;  %v2388_v44 = vcvt.s32.f32 %v2387_v53  ;;  %vm2386_vm7 = vcmp.lt.f32.partialorder %v2385_v3, 8388608.0 }
 0x14f   : > { %1854 = vst [vmem:[%s4033_s0 + $0x98] sm:$0xff] %v1822_v36  ;;  %v2383_v38 = vor.u32 %v2382_v21, %v2381_v37 }
 0x150   : > { %v2443_v35 = vcvt.f32.s32 %v1687_v48  ;;  %v2441_v5 = vand.u32 2147483647, %v1687_v48  ;;  %v1830_v12 = vmul.f32 0.023529412, %v1798_v25  ;;  %v2446_v0 = vand.u32 2147483648, %v1687_v48 }
 0x151   : > { %v2384_v34 = vsel %vm2378_vm4, %v2383_v38, %v1679_v42  ;;  %v2389_v61 = vand.u32 2147483647, %v2388_v44 }
 0x152   : > { %v2444_v8 = vcvt.s32.f32 %v2443_v35  ;;  %v1743_v33 = vmax.f32 %v2384_v34, 0.0  ;;  %1862 = vst [vmem:[%s4033_s0 + $0xd8] sm:$0xff] %v1830_v12  ;;  %vm2442_vm5 = vcmp.lt.f32.partialorder %v2441_v5, 8388608.0 }
 0x153   : > { %v1587_v43 = vpop.f32.mrf.mxu1  ;;  %v2391_v27 = vor.u32 %v2390_v32, %v2389_v61 }
 0x154   : > { %v2445_v23 = vand.u32 2147483647, %v2444_v8  ;;  %v1775_v50 = vmin.f32 %v1743_v33, 255.0  ;;  %v1652_v46 = vmul.f32 %v3959_v49, %v1587_v43 }
 0x155   : > { %v2392_v36 = vsel %vm2386_vm7, %v2391_v27, %v1680_v9 }
 0x156   : > { %v2447_v6 = vor.u32 %v2446_v0, %v2445_v23  ;;  %v1807_v52 = vmul.f32 0.023529412, %v1775_v50  ;;  %v1688_v4 = vadd.f32 %v3974_v31, %v1652_v46  ;;  %v1744_v1 = vmax.f32 %v2392_v36, 0.0 }
 0x158   : > { %v2448_v63 = vsel %vm2442_vm5, %v2447_v6, %v1687_v48  ;;  %1839 = vst [vmem:[%s4033_s0 + $0x20] sm:$0xff] %v1807_v52  ;;  %v2451_v51 = vcvt.f32.s32 %v1688_v4  ;;  %v2449_v7 = vand.u32 2147483647, %v1688_v4  ;;  %v2454_v22 = vand.u32 2147483648, %v1688_v4 }
 0x159   : > { %v1751_v13 = vmax.f32 %v2448_v63, 0.0  ;;  %v1776_v35 = vmin.f32 %v1744_v1, 255.0 }
 0x15a   : > { %v2452_v39 = vcvt.s32.f32 %v2451_v51  ;;  %vm2450_vm0 = vcmp.lt.f32.partialorder %v2449_v7, 8388608.0 }
 0x15b   : > { %v1783_v45 = vmin.f32 %v1751_v13, 255.0  ;;  %v1808_v0 = vmul.f32 0.023529412, %v1776_v35 }
 0x15c   : > { %v2453_v26 = vand.u32 2147483647, %v2452_v39 }
 0x15d   : > { %v1815_v28 = vmul.f32 0.023529412, %v1783_v45  ;;  %1840 = vst [vmem:[%s4033_s0 + $0x28] sm:$0xff] %v1808_v0 }
 0x15e   : > { %v1605_v19 = vpop.f32.mrf.mxu2  ;;  %v2455_v18 = vor.u32 %v2454_v22, %v2453_v26 }
 0x15f   : > { %1847 = vst [vmem:[%s4033_s0 + $0x60] sm:$0xff] %v1815_v28  ;;  %v1659_v2 = vmul.f32 %v3959_v49, %v1605_v19 }
 0x160   : > { %v2456_v37 = vsel %vm2450_vm0, %v2455_v18, %v1688_v4 }
 0x161   : > { %v1695_v55 = vadd.f32 %v3974_v31, %v1659_v2  ;;  %v1752_v38 = vmax.f32 %v2456_v37, 0.0 }
 0x163   : > { %v2507_v56 = vcvt.f32.s32 %v1695_v55  ;;  %v2505_v60 = vand.u32 2147483647, %v1695_v55  ;;  %v2510_v10 = vand.u32 2147483648, %v1695_v55  ;;  %v1784_v34 = vmin.f32 %v1752_v38, 255.0 }
 0x165   : > { %v2508_v47 = vcvt.s32.f32 %v2507_v56  ;;  %vm2506_vm6 = vcmp.lt.f32.partialorder %v2505_v60, 8388608.0  ;;  %v1816_v6 = vmul.f32 0.023529412, %v1784_v34 }
 0x166   : > { %v1607_v15 = vpop.f32.mrf.mxu2 }
 0x167   : > { %v2509_v58 = vand.u32 2147483647, %v2508_v47  ;;  %v1660_v57 = vmul.f32 %v3959_v49, %v1607_v15  ;;  %1848 = vst [vmem:[%s4033_s0 + $0x68] sm:$0xff] %v1816_v6 }
 0x169   : > { %v2511_v16 = vor.u32 %v2510_v10, %v2509_v58  ;;  %v1696_v40 = vadd.f32 %v3974_v31, %v1660_v57 }
 0x16b   : > { %v2512_v54 = vsel %vm2506_vm6, %v2511_v16, %v1695_v55  ;;  %v2515_v17 = vcvt.f32.s32 %v1696_v40  ;;  %v2513_v24 = vand.u32 2147483647, %v1696_v40  ;;  %v2518_v41 = vand.u32 2147483648, %v1696_v40 }
 0x16c   : > { %v1759_v62 = vmax.f32 %v2512_v54, 0.0 }
 0x16d   : > { %v2516_v59 = vcvt.s32.f32 %v2515_v17  ;;  %vm2514_vm1 = vcmp.lt.f32.partialorder %v2513_v24, 8388608.0 }
 0x16e   : > { %v1791_v42 = vmin.f32 %v1759_v62, 255.0 }
 0x16f   : > { %v2517_v21 = vand.u32 2147483647, %v2516_v59 }
 0x170   : > { %v1823_v30 = vmul.f32 0.023529412, %v1791_v42 }
 0x171   : > { %v2519_v48 = vor.u32 %v2518_v41, %v2517_v21 }
 0x172   : > { %v1625_v11 = vpop.f32.mrf.mxu3  ;;  %1855 = vst [vmem:[%s4033_s0 + $0xa0] sm:$0xff] %v1823_v30 }
 0x173   : > { %v1667_v20 = vmul.f32 %v3959_v49, %v1625_v11  ;;  %v2520_v5 = vsel %vm2514_vm1, %v2519_v48, %v1696_v40 }
 0x174   : > { %v1760_v33 = vmax.f32 %v2520_v5, 0.0 }
 0x175   : > { %v1703_v25 = vadd.f32 %v3974_v31, %v1667_v20 }
 0x176   : > { %v1792_v63 = vmin.f32 %v1760_v33, 255.0 }
 0x177   : > { %v2571_v12 = vcvt.f32.s32 %v1703_v25  ;;  %v1570_v8 = vpop.f32.mrf.mxu0  ;;  %v2569_v52 = vand.u32 2147483647, %v1703_v25  ;;  %v2574_v19 = vand.u32 2147483648, %v1703_v25 }
 0x178   : > { %v1645_v23 = vmul.f32 %v3959_v49, %v1570_v8  ;;  %v1824_v55 = vmul.f32 0.023529412, %v1792_v63 }
 0x179   : > { %v2572_v50 = vcvt.s32.f32 %v2571_v12  ;;  %vm2570_vm8 = vcmp.lt.f32.partialorder %v2569_v52, 8388608.0 }
 0x17a   : > { %v1627_v13 = vpop.f32.mrf.mxu3  ;;  %v1681_v45 = vadd.f32 %v3974_v31, %v1645_v23  ;;  %1856 = vst [vmem:[%s4033_s0 + $0xa8] sm:$0xff] %v1824_v55 }
 0x17b   : > { %v2573_v28 = vand.u32 2147483647, %v2572_v50  ;;  %v1668_v2 = vmul.f32 %v3959_v49, %v1627_v13 }
 0x17c   : > { %v2395_v56 = vcvt.f32.s32 %v1681_v45  ;;  %v2393_v43 = vand.u32 2147483647, %v1681_v45  ;;  %v2398_v14 = vand.u32 2147483648, %v1681_v45 }
 0x17d   : > { %v2575_v47 = vor.u32 %v2574_v19, %v2573_v28  ;;  %v1704_v29 = vadd.f32 %v3974_v31, %v1668_v2 }
 0x17e   : > { %v2396_v60 = vcvt.s32.f32 %v2395_v56  ;;  %vm2394_vm9 = vcmp.lt.f32.partialorder %v2393_v43, 8388608.0 }
 0x17f   : > { %v2576_v46 = vsel %vm2570_vm8, %v2575_v47, %v1703_v25  ;;  %v2579_v15 = vcvt.f32.s32 %v1704_v29  ;;  %v2577_v4 = vand.u32 2147483647, %v1704_v29  ;;  %v2582_v53 = vand.u32 2147483648, %v1704_v29  ;;  %v1572_v22 = vpop.f32.mrf.mxu0 }
 0x180   : > { %v1767_v58 = vmax.f32 %v2576_v46, 0.0  ;;  %v2397_v10 = vand.u32 2147483647, %v2396_v60  ;;  %v1646_v30 = vmul.f32 %v3959_v49, %v1572_v22 }
 0x181   : > { %v2580_v57 = vcvt.s32.f32 %v2579_v15  ;;  %vm2578_vm10 = vcmp.lt.f32.partialorder %v2577_v4, 8388608.0 }
 0x182   : > { %v1799_v9 = vmin.f32 %v1767_v58, 255.0  ;;  %v2399_v16 = vor.u32 %v2398_v14, %v2397_v10  ;;  %v1682_v21 = vadd.f32 %v3974_v31, %v1646_v30 }
 0x183   : > { %v2581_v40 = vand.u32 2147483647, %v2580_v57 }
 0x184   : > { %v1831_v54 = vmul.f32 0.023529412, %v1799_v9  ;;  %v2400_v51 = vsel %vm2394_vm9, %v2399_v16, %v1681_v45  ;;  %v2403_v36 = vcvt.f32.s32 %v1682_v21  ;;  %v2401_v25 = vand.u32 2147483647, %v1682_v21 }
 0x185   : > { %v2583_v62 = vor.u32 %v2582_v53, %v2581_v40  ;;  %v1745_v44 = vmax.f32 %v2400_v51, 0.0  ;;  %v1590_v3 = vpop.f32.mrf.mxu1  ;;  %v2406_v12 = vand.u32 2147483648, %v1682_v21 }
 0x186   : > { %1863 = vst [vmem:[%s4033_s0 + $0xe0] sm:$0xff] %v1831_v54  ;;  %v1653_v42 = vmul.f32 %v3959_v49, %v1590_v3  ;;  %v2404_v48 = vcvt.s32.f32 %v2403_v36  ;;  %vm2402_vm12 = vcmp.lt.f32.partialorder %v2401_v25, 8388608.0 }
 0x187   : > { %v2584_v39 = vsel %vm2578_vm10, %v2583_v62, %v1704_v29  ;;  %v1777_v17 = vmin.f32 %v1745_v44, 255.0 }
 0x188   : > { %v1768_v61 = vmax.f32 %v2584_v39, 0.0  ;;  %v1689_v7 = vadd.f32 %v3974_v31, %v1653_v42  ;;  %v2405_v5 = vand.u32 2147483647, %v2404_v48 }
 0x189   : > { %v1809_v32 = vmul.f32 0.023529412, %v1777_v17 }
 0x18a   : > { %v1800_v26 = vmin.f32 %v1768_v61, 255.0  ;;  %v2459_v59 = vcvt.f32.s32 %v1689_v7  ;;  %v2457_v24 = vand.u32 2147483647, %v1689_v7  ;;  %v2462_v18 = vand.u32 2147483648, %v1689_v7 }
 0x18b   : > { %1841 = vst [vmem:[%s4033_s0 + $0x30] sm:$0xff] %v1809_v32  ;;  %v2407_v0 = vor.u32 %v2406_v12, %v2405_v5 }
 0x18c   : > { %v1832_v27 = vmul.f32 0.023529412, %v1800_v26  ;;  %v2460_v11 = vcvt.s32.f32 %v2459_v59  ;;  %vm2458_vm11 = vcmp.lt.f32.partialorder %v2457_v24, 8388608.0 }
 0x18d   : > { %v1592_v41 = vpop.f32.mrf.mxu1  ;;  %v2408_v50 = vsel %vm2402_vm12, %v2407_v0, %v1682_v21  ;;  %v2658_v21 = vld [vmem:[%s4196_s6] ss:$0 sm:$0xff] }
 0x18e   : > { %1864 = vst [vmem:[%s4033_s0 + $0xe8] sm:$0xff] %v1832_v27  ;;  %v2461_v20 = vand.u32 2147483647, %v2460_v11  ;;  %v1654_v1 = vmul.f32 %v3959_v49, %v1592_v41  ;;  %v1746_v63 = vmax.f32 %v2408_v50, 0.0 }
 0x190   : > { %v2463_v37 = vor.u32 %v2462_v18, %v2461_v20  ;;  %v1690_v38 = vadd.f32 %v3974_v31, %v1654_v1  ;;  %v1778_v19 = vmin.f32 %v1746_v63, 255.0 }
 0x192   : > { %v2464_v35 = vsel %vm2458_vm11, %v2463_v37, %v1689_v7  ;;  %v2467_v8 = vcvt.f32.s32 %v1690_v38  ;;  %v2465_v6 = vand.u32 2147483647, %v1690_v38  ;;  %v2470_v45 = vand.u32 2147483648, %v1690_v38 }
 0x193   : > { %v1753_v34 = vmax.f32 %v2464_v35, 0.0  ;;  %v1810_v56 = vmul.f32 0.023529412, %v1778_v19 }
 0x194   : > { %v2468_v23 = vcvt.s32.f32 %v2467_v8  ;;  %vm2466_vm13 = vcmp.lt.f32.partialorder %v2465_v6, 8388608.0 }
 0x195   : > { %v1785_v33 = vmin.f32 %v1753_v34, 255.0  ;;  %1842 = vst [vmem:[%s4033_s0 + $0x38] sm:$0xff] %v1810_v56 }
 0x196   : > { %v2469_v13 = vand.u32 2147483647, %v2468_v23 }
 0x197   : > { %v1817_v52 = vmul.f32 0.023529412, %v1785_v33 }
 0x198   : > { %v2471_v2 = vor.u32 %v2470_v45, %v2469_v13 }
 0x199   : > { %1849 = vst [vmem:[%s4033_s0 + $0x70] sm:$0xff] %v1817_v52  ;;  %v1610_v28 = vpop.f32.mrf.mxu2 }
 0x19a   : > { %v1661_v55 = vmul.f32 %v3959_v49, %v1610_v28  ;;  %v2472_v47 = vsel %vm2466_vm13, %v2471_v2, %v1690_v38 }
 0x19b   : > { %v1754_v43 = vmax.f32 %v2472_v47, 0.0 }
 0x19c   : > { %v1697_v29 = vadd.f32 %v3974_v31, %v1661_v55 }
 0x19d   : > { %v1786_v14 = vmin.f32 %v1754_v43, 255.0 }
 0x19e   : > { %v2523_v60 = vcvt.f32.s32 %v1697_v29  ;;  %v2521_v58 = vand.u32 2147483647, %v1697_v29  ;;  %v2526_v9 = vand.u32 2147483648, %v1697_v29 }
 0x19f   : > { %v1818_v15 = vmul.f32 0.023529412, %v1786_v14 }
 0x1a0   : > { %v2524_v46 = vcvt.s32.f32 %v2523_v60  ;;  %vm2522_vm14 = vcmp.lt.f32.partialorder %v2521_v58, 8388608.0 }
 0x1a1   : > { %v1612_v10 = vpop.f32.mrf.mxu2  ;;  %1850 = vst [vmem:[%s4033_s0 + $0x78] sm:$0xff] %v1818_v15 }
 0x1a2   : > { %v2525_v57 = vand.u32 2147483647, %v2524_v46  ;;  %v1662_v4 = vmul.f32 %v3959_v49, %v1612_v10 }
 0x1a4   : > { %v2527_v16 = vor.u32 %v2526_v9, %v2525_v57  ;;  %v1698_v40 = vadd.f32 %v3974_v31, %v1662_v4 }
 0x1a6   : > { %v2528_v53 = vsel %vm2522_vm14, %v2527_v16, %v1697_v29  ;;  %v2531_v54 = vcvt.f32.s32 %v1698_v40  ;;  %v2529_v17 = vand.u32 2147483647, %v1698_v40  ;;  %v2534_v32 = vand.u32 2147483648, %v1698_v40 }
 0x1a7   : > { %v1761_v51 = vmax.f32 %v2528_v53, 0.0  ;;  %v1630_v62 = vpop.f32.mrf.mxu3 }
 0x1a8   : > { %v1669_v44 = vmul.f32 %v3959_v49, %v1630_v62  ;;  %v2532_v3 = vcvt.s32.f32 %v2531_v54  ;;  %vm2530_vm15 = vcmp.lt.f32.partialorder %v2529_v17, 8388608.0 }
 0x1a9   : > { %v1793_v39 = vmin.f32 %v1761_v51, 255.0 }
 0x1aa   : > { %v1705_v42 = vadd.f32 %v3974_v31, %v1669_v44  ;;  %v2533_v61 = vand.u32 2147483647, %v2532_v3 }
 0x1ab   : > { %v1825_v7 = vmul.f32 0.023529412, %v1793_v39 }
 0x1ac   : > { %v2587_v26 = vcvt.f32.s32 %v1705_v42  ;;  %v2535_v22 = vor.u32 %v2534_v32, %v2533_v61  ;;  %v2585_v27 = vand.u32 2147483647, %v1705_v42  ;;  %v2590_v49 = vand.u32 2147483648, %v1705_v42 }
 0x1ad   : > { %1857 = vst [vmem:[%s4033_s0 + $0xb0] sm:$0xff] %v1825_v7 }
 0x1ae   : > { %v2588_v59 = vcvt.s32.f32 %v2587_v26  ;;  %v2536_v30 = vsel %vm2530_vm15, %v2535_v22, %v1698_v40  ;;  %vm2586_vm2 = vcmp.lt.f32.partialorder %v2585_v27, 8388608.0 }
 0x1af   : > { %v1762_v24 = vmax.f32 %v2536_v30, 0.0  ;;  %v1632_v11 = vpop.f32.mrf.mxu3 }
 0x1b0   : > { %v2589_v18 = vand.u32 2147483647, %v2588_v59  ;;  %v1670_v41 = vmul.f32 %v2658_v21, %v1632_v11 }
 0x1b1   : > { %v1794_v20 = vmin.f32 %v1762_v24, 255.0 }
 0x1b2   : > { %v2591_v36 = vor.u32 %v2590_v49, %v2589_v18  ;;  %v1706_v1 = vadd.f32 %v3974_v31, %v1670_v41 }
 0x1b3   : > { %v1826_v37 = vmul.f32 0.023529412, %v1794_v20 }
 0x1b4   : > { %v2592_v48 = vsel %vm2586_vm2, %v2591_v36, %v1705_v42  ;;  %v2595_v25 = vcvt.f32.s32 %v1706_v1  ;;  %v2593_v12 = vand.u32 2147483647, %v1706_v1  ;;  %v2598_v8 = vand.u32 2147483648, %v1706_v1 }
 0x1b5   : > { %v1769_v38 = vmax.f32 %v2592_v48, 0.0  ;;  %1858 = vst [vmem:[%s4033_s0 + $0xb8] sm:$0xff] %v1826_v37 }
 0x1b6   : > { %v2596_v35 = vcvt.s32.f32 %v2595_v25  ;;  %vm2594_vm3 = vcmp.lt.f32.partialorder %v2593_v12, 8388608.0 }
 0x1b7   : > { %v1801_v5 = vmin.f32 %v1769_v38, 255.0 }
 0x1b8   : > { %v2597_v34 = vand.u32 2147483647, %v2596_v35 }
 0x1b9   : > { %v1833_v0 = vmul.f32 0.023529412, %v1801_v5 }
 0x1ba   : > { %v2599_v33 = vor.u32 %v2598_v8, %v2597_v34 }
 0x1bb   : > { %1865 = vst [vmem:[%s4033_s0 + $0xf0] sm:$0xff] %v1833_v0 }
 0x1bc   : > { %v2600_v23 = vsel %vm2594_vm3, %v2599_v33, %v1706_v1 }
 0x1bd   : > { %v1770_v50 = vmax.f32 %v2600_v23, 0.0 }
 0x1bf   : > { %v1802_v6 = vmin.f32 %v1770_v50, 255.0 }
 0x1c1   : > { %v1834_v31 = vmul.f32 0.023529412, %v1802_v6 }
 0x1c3   : > { %1866 = vst [vmem:[%s4033_s0 + $0xf8] sm:$0xff] %v1834_v31 }
 0x1c4 PF: > { %s18_s27 = sadd.s32 1, %s2681_s27   ;;  %s4519_s26 = smov %s2677_s2 }
 0x1c5   : > { %p15_p5 = scmp.ge.s32.totalorder %s18_s27, 4   ;;  %s4520_s2 = smov %s4522_s28 }
 0x1c7   :  { %17 = sbr.rel (!%p15_p5) target bundleno = 2 (0x2), region = 88 }

</bundles_post_ra>
